<compile_context>
chip_gen: v7x
topology: tpu7x:2x2x1
jax: 0.10.0
libtpu: 0.0.40
codegen_flags: <defaults>
</compile_context>

<pallas_src>
import functools
import math

import jax
import jax.numpy as jnp
from jax.experimental import pallas as pl
from jax.experimental.pallas import tpu as pltpu

EPS = 1e-6
NEG_INF = -1e9


# ------------------------------ in-kernel helpers ------------------------------
def _ln_rows(x, alpha, bias, eps):
    """Row-wise LayerNormalization matching the PyTorch reference.

    torch.std() defaults to the unbiased estimator (ddof=1) and the reference
    adds eps to the std (not the variance). Kept in f32 (v5e VPU has no bf16)."""
    d = x.shape[-1]
    mean = jnp.mean(x, axis=-1, keepdims=True)
    var = jnp.sum((x - mean) ** 2, axis=-1, keepdims=True) * (1.0 / (d - 1))
    inv = pl.reciprocal(jnp.sqrt(var) + eps, approx=True)
    return alpha * (x - mean) * inv + bias


def _attention_core(x_res, q_in, kv_in, mask, wq, wk, wv, wo, num_heads):
    """Returns x_res + MultiHeadAttention(q_in, kv_in, kv_in, mask)."""
    d_model = q_in.shape[-1]
    d_k = d_model // num_heads
    scale = 1.0 / math.sqrt(d_k)

    # Projections: bf16 MXU operands (casts hoisted), f32 accumulation.
    q16 = q_in.astype(jnp.bfloat16)
    kv16 = kv_in.astype(jnp.bfloat16)
    q = jnp.dot(q16, wq, preferred_element_type=jnp.float32)
    k = jnp.dot(kv16, wk, preferred_element_type=jnp.float32)
    v = jnp.dot(kv16, wv, preferred_element_type=jnp.float32)

    keep = mask != 0.0                                  # compare hoisted out of head loop

    acc = x_res                                         # (Sq, D) f32 accumulator (residual)
    for h in range(num_heads):                          # static unrolled head loop
        lo = h * d_k
        qh = q[:, lo:lo + d_k].astype(jnp.bfloat16)
        kh = k[:, lo:lo + d_k].astype(jnp.bfloat16)
        vh = v[:, lo:lo + d_k].astype(jnp.bfloat16)
        # scores = qh @ kh.T / sqrt(d_k)  (contract d_k dims, no transpose)
        s = jax.lax.dot_general(qh, kh, (((1,), (1,)), ((), ())),
                                preferred_element_type=jnp.float32) * scale
        s = jnp.where(keep, s, NEG_INF)                 # masked_fill(mask == 0, -1e9)
        m = jnp.max(s, axis=-1, keepdims=True)
        p = jnp.exp(s - m)                              # f32 softmax (EUP exp)
        p = p * pl.reciprocal(jnp.sum(p, axis=-1, keepdims=True), approx=True)
        oh = jnp.dot(p.astype(jnp.bfloat16), vh, preferred_element_type=jnp.float32)
        # accumulate the W_O projection per head -> no lane-axis concatenate
        acc = acc + jnp.dot(oh.astype(jnp.bfloat16), wo[lo:lo + d_k, :],
                            preferred_element_type=jnp.float32)
    return acc                                          # residual already folded in


# ----------------------------------- kernels -----------------------------------
def _decoder_block_kernel(x_ref, enc_ref, src_mask_ref, tgt_mask_ref,
                          ln0_a_ref, ln0_b_ref, wq_ref, wk_ref, wv_ref, wo_ref,
                          ln1_a_ref, ln1_b_ref, cq_ref, ck_ref, cv_ref, co_ref,
                          ln2_a_ref, ln2_b_ref, w1_ref, b1_ref, w2_ref, b2_ref,
                          o_ref, *, num_heads, eps):
    """One full DecoderBlock for one batch element, entirely in VMEM."""
    x = x_ref[0]                                        # (Sq, D) raw residual stream
    enc = enc_ref[0]                                    # (Sk, D) encoder output

    # residual 0: masked self-attention (pre-norm fused; q = k = v = LN(x))
    xn = _ln_rows(x, ln0_a_ref[0, 0], ln0_b_ref[0, 0], eps)
    x = _attention_core(x, xn, xn, tgt_mask_ref[0],
                        wq_ref[...], wk_ref[...], wv_ref[...], wo_ref[...], num_heads)

    # residual 1: cross-attention (pre-norm fused; q = LN(x), k = v = encoder_output)
    xn = _ln_rows(x, ln1_a_ref[0, 0], ln1_b_ref[0, 0], eps)
    x = _attention_core(x, xn, enc, src_mask_ref[0],
                        cq_ref[...], ck_ref[...], cv_ref[...], co_ref[...], num_heads)

    # residual 2: feed-forward (pre-norm fused)
    xn = _ln_rows(x, ln2_a_ref[0, 0], ln2_b_ref[0, 0], eps)
    h = jnp.dot(xn.astype(jnp.bfloat16), w1_ref[...], preferred_element_type=jnp.float32)
    h = jnp.maximum(h + b1_ref[...], 0.0)               # ReLU
    out = jnp.dot(h.astype(jnp.bfloat16), w2_ref[...], preferred_element_type=jnp.float32)
    o_ref[0] = x + (out + b2_ref[...])                  # residual connection


def _final_ln_kernel(x_ref, alpha_ref, bias_ref, o_ref, *, eps):
    o_ref[0] = _ln_rows(x_ref[0], alpha_ref[0, 0], bias_ref[0, 0], eps)


# ---------------------------------- wrappers ------------------------------------
def _pick_seq_tile(S, max_tile=256):
    if S <= max_tile:
        return S
    for t in (256, 128, 64, 32, 16, 8):
        if S % t == 0:
            return t
    return S


def decoder_block(x, encoder_output, src_mask, tgt_mask, lp, num_heads, eps=EPS):
    """One fused DecoderBlock: x + SelfAttn(LN x) ; + CrossAttn(LN x, enc) ; + FFN(LN x)."""
    B, Sq, D = x.shape
    Sk = encoder_output.shape[1]
    Dff = lp["w1"].shape[1]

    scalar_spec = pl.BlockSpec((1, 1), lambda b: (0, 0))
    dd_spec = pl.BlockSpec((D, D), lambda b: (0, 0))

    in_specs = [
        pl.BlockSpec((1, Sq, D), lambda b: (b, 0, 0)),     # x (residual stream)
        pl.BlockSpec((1, Sk, D), lambda b: (b, 0, 0)),     # encoder_output
        pl.BlockSpec((1, Sq, Sk), lambda b: (b, 0, 0)),    # src_mask
        pl.BlockSpec((1, Sq, Sq), lambda b: (b, 0, 0)),    # tgt_mask
        scalar_spec, scalar_spec, dd_spec, dd_spec, dd_spec, dd_spec,     # self-attn
        scalar_spec, scalar_spec, dd_spec, dd_spec, dd_spec, dd_spec,     # cross-attn
        scalar_spec, scalar_spec,                                         # FFN LN
        pl.BlockSpec((D, Dff), lambda b: (0, 0)),
        pl.BlockSpec((1, Dff), lambda b: (0, 0)),
        pl.BlockSpec((Dff, D), lambda b: (0, 0)),
        pl.BlockSpec((1, D), lambda b: (0, 0)),
    ]
    inputs = [
        x, encoder_output, src_mask, tgt_mask,
        lp["ln0_a"], lp["ln0_b"], lp["wq"], lp["wk"], lp["wv"], lp["wo"],
        lp["ln1_a"], lp["ln1_b"], lp["cq"], lp["ck"], lp["cv"], lp["co"],
        lp["ln2_a"], lp["ln2_b"], lp["w1"], lp["b1"], lp["w2"], lp["b2"],
    ]

    # Advisory cost (whole call): self-attn + cross-attn + FFN matmuls.
    flops = 2 * B * (
        (3 * Sq * D * D + 2 * Sq * Sq * D + Sq * D * D)                   # self-attn
        + (Sq * D * D + 2 * Sk * D * D + 2 * Sq * Sk * D + Sq * D * D)    # cross-attn
        + 2 * Sq * D * Dff                                                # FFN
    )
    cost = pl.CostEstimate(
        flops=int(flops),
        transcendentals=int(B * num_heads * Sq * (Sq + Sk)),
        bytes_accessed=int(4 * B * Sq * D * 2 + 4 * B * Sk * D
                           + 4 * B * Sq * (Sq + Sk)
                           + 2 * (8 * D * D + 2 * D * Dff)),
    )

    return pl.pallas_call(
        functools.partial(_decoder_block_kernel, num_heads=num_heads, eps=eps),
        out_shape=jax.ShapeDtypeStruct((B, Sq, D), x.dtype),
        grid=(B,),
        in_specs=in_specs,
        out_specs=pl.BlockSpec((1, Sq, D), lambda b: (b, 0, 0)),
        input_output_aliases={0: 0},      # output overwrites the residual-stream buffer
        cost_estimate=cost,
        compiler_params=pltpu.CompilerParams(dimension_semantics=("parallel",)),
    )(*inputs)


def layer_norm(x, alpha, bias, eps=EPS):
    B, S, D = x.shape
    tq = _pick_seq_tile(S)
    return pl.pallas_call(
        functools.partial(_final_ln_kernel, eps=eps),
        out_shape=jax.ShapeDtypeStruct((B, S, D), x.dtype),
        grid=(B, S // tq),
        in_specs=[
            pl.BlockSpec((1, tq, D), lambda b, s: (b, s, 0)),
            pl.BlockSpec((1, 1), lambda b, s: (0, 0)),
            pl.BlockSpec((1, 1), lambda b, s: (0, 0)),
        ],
        out_specs=pl.BlockSpec((1, tq, D), lambda b, s: (b, s, 0)),
        compiler_params=pltpu.CompilerParams(
            dimension_semantics=("parallel", "parallel")),
    )(x, alpha, bias)


# ------------------------------- Decoder forward --------------------------------
def decoder_forward(params, x, encoder_output, src_mask, tgt_mask, num_heads):
    for lp in params["layers"]:
        x = decoder_block(x, encoder_output, src_mask, tgt_mask, lp, num_heads)
    # TODO(synk): dropout in the reference DecoderBlock is identity in eval mode and is omitted.
    return layer_norm(x, params["norm_a"], params["norm_b"])


# ------------------------------ Pure-JAX reference ------------------------------
def _ln_ref(x, alpha, bias, eps=EPS):
    mean = x.mean(-1, keepdims=True)
    std = jnp.sqrt(((x - mean) ** 2).sum(-1, keepdims=True) / (x.shape[-1] - 1))
    return alpha[0, 0] * (x - mean) / (std + eps) + bias[0, 0]


def _mha_ref(q_in, kv_in, mask, res, wq, wk, wv, wo, H):
    wq, wk, wv, wo = (w.astype(jnp.float32) for w in (wq, wk, wv, wo))
    d = q_in.shape[-1]
    dk = d // H
    q, k, v = q_in @ wq, kv_in @ wk, kv_in @ wv
    B, Sq, _ = q.shape
    Sk = k.shape[1]
    q = q.reshape(B, Sq, H, dk).transpose(0, 2, 1, 3)
    k = k.reshape(B, Sk, H, dk).transpose(0, 2, 1, 3)
    v = v.reshape(B, Sk, H, dk).transpose(0, 2, 1, 3)
    s = jnp.einsum("bhqd,bhkd->bhqk", q, k) / math.sqrt(dk)
    s = jnp.where(mask[:, None, :, :] == 0.0, -1e9, s)
    a = jax.nn.softmax(s, axis=-1)
    o = jnp.einsum("bhqk,bhkd->bhqd", a, v).transpose(0, 2, 1, 3).reshape(B, Sq, d)
    return res + o @ wo


def _ffn_ref(xn, res, w1, b1, w2, b2):
    w1 = w1.astype(jnp.float32)
    w2 = w2.astype(jnp.float32)
    return res + (jnp.maximum(xn @ w1 + b1, 0.0) @ w2 + b2)


def decoder_forward_ref(params, x, encoder_output, src_mask, tgt_mask, num_heads):
    for lp in params["layers"]:
        xn = _ln_ref(x, lp["ln0_a"], lp["ln0_b"])
        x = _mha_ref(xn, xn, tgt_mask, x, lp["wq"], lp["wk"], lp["wv"], lp["wo"], num_heads)
        xn = _ln_ref(x, lp["ln1_a"], lp["ln1_b"])
        x = _mha_ref(xn, encoder_output, src_mask, x,
                     lp["cq"], lp["ck"], lp["cv"], lp["co"], num_heads)
        xn = _ln_ref(x, lp["ln2_a"], lp["ln2_b"])
        x = _ffn_ref(xn, x, lp["w1"], lp["b1"], lp["w2"], lp["b2"])
    return _ln_ref(x, params["norm_a"], params["norm_b"])


# ------------------------------- Parameter init ---------------------------------
def init_decoder_params(key, num_layers, d_model, d_ff):
    def linear_w(k, fan_in, fan_out):
        # nn.Linear-style init U(-1/sqrt(fan_in), 1/sqrt(fan_in)); stored [in, out]
        # in bf16 (halves weight DMA / VMEM; kernels accumulate in f32).
        bound = 1.0 / math.sqrt(fan_in)
        w = jax.random.uniform(k, (fan_in, fan_out), jnp.float32, -bound, bound)
        return w.astype(jnp.bfloat16)

    ones = jnp.ones((1, 1), jnp.float32)
    zeros = jnp.zeros((1, 1), jnp.float32)

    layers = []
    for i in range(num_layers):
        ks = jax.random.split(jax.random.fold_in(key, i), 12)
        layers.append(dict(
            # self-attention projections (bias=False as in the reference repo)
            wq=linear_w(ks[0], d_model, d_model), wk=linear_w(ks[1], d_model, d_model),
            wv=linear_w(ks[2], d_model, d_model), wo=linear_w(ks[3], d_model, d_model),
            # cross-attention projections
            cq=linear_w(ks[4], d_model, d_model), ck=linear_w(ks[5], d_model, d_model),
            cv=linear_w(ks[6], d_model, d_model), co=linear_w(ks[7], d_model, d_model),
            # feed-forward
            w1=linear_w(ks[8], d_model, d_ff),
            b1=jax.random.uniform(ks[9], (1, d_ff), jnp.float32,
                                  -1.0 / math.sqrt(d_model), 1.0 / math.sqrt(d_model)),
            w2=linear_w(ks[10], d_ff, d_model),
            b2=jax.random.uniform(ks[11], (1, d_model), jnp.float32,
                                  -1.0 / math.sqrt(d_ff), 1.0 / math.sqrt(d_ff)),
            # LayerNormalization params (scalar alpha=1, bias=0 per __init__)
            ln0_a=ones, ln0_b=zeros, ln1_a=ones, ln1_b=zeros, ln2_a=ones, ln2_b=zeros,
        ))
    return dict(layers=layers, norm_a=ones, norm_b=zeros)


# ------------------------------------- main --------------------------------------
if __name__ == "__main__":
    B, S_TGT, S_SRC, D_MODEL, N_HEADS, D_FF, N_LAYERS = 2, 8, 16, 32, 4, 64, 2

    key = jax.random.PRNGKey(0)
    kx, ke, kp = jax.random.split(key, 3)
    x = jax.random.normal(kx, (B, S_TGT, D_MODEL), jnp.float32)
    encoder_output = jax.random.normal(ke, (B, S_SRC, D_MODEL), jnp.float32)
    params = init_decoder_params(kp, N_LAYERS, D_MODEL, D_FF)

    # Causal target mask, and a source mask that pads out the last 3 source tokens
    # of batch element 1 (1.0 = keep, 0.0 = masked).
    tgt_mask = jnp.broadcast_to(jnp.tril(jnp.ones((S_TGT, S_TGT), jnp.float32)),
                                (B, S_TGT, S_TGT))
    src_valid = jnp.ones((B, S_SRC), jnp.float32).at[1, S_SRC - 3:].set(0.0)
    src_mask = jnp.broadcast_to(src_valid[:, None, :], (B, S_TGT, S_SRC))

    fwd = jax.jit(decoder_forward, static_argnums=5)   # jit so residual aliasing is real
    out = jax.block_until_ready(fwd(params, x, encoder_output, src_mask, tgt_mask, N_HEADS))

    ref = decoder_forward_ref(params, x, encoder_output, src_mask, tgt_mask, N_HEADS)
    assert out.shape == (B, S_TGT, D_MODEL)
    assert bool(jnp.all(jnp.isfinite(out)))
    # bf16 MXU operands + approx reciprocals vs f32 reference -> slightly looser tol
    assert bool(jnp.allclose(out, ref, atol=3e-2, rtol=3e-2))

    print("KERNEL_OK")
</pallas_src>

<mosaic_0001>
module attributes {stable_mosaic.version = 11 : i64} {
  func.func @_final_ln_kernel(%arg0: i32, %arg1: i32, %arg2: memref<1x8x32xf32, #tpu.memory_space<vmem>>, %arg3: memref<1x1xf32, #tpu.memory_space<vmem>>, %arg4: memref<1x1xf32, #tpu.memory_space<vmem>>, %arg5: memref<1x8x32xf32, #tpu.memory_space<vmem>>) attributes {dimension_semantics = [#tpu.dimension_semantics<parallel>, #tpu.dimension_semantics<parallel>], iteration_bounds = array<i64: 2, 1>, scalar_prefetch = 0 : i64, scratch_operands = 0 : i64, tpu.core_type = #tpu.core_type<tc>, window_params = [{transform_indices = @transform_0, window_bounds = array<i64: 1, 8, 32>}, {pipeline_mode = #tpu.pipeline_mode<synchronous>, transform_indices = @transform_1, window_bounds = array<i64: 1, 1>}, {pipeline_mode = #tpu.pipeline_mode<synchronous>, transform_indices = @transform_2, window_bounds = array<i64: 1, 1>}, {transform_indices = @transform_3, window_bounds = array<i64: 1, 8, 32>}]} {
    %c0 = arith.constant 0 : index
    %c0_0 = arith.constant 0 : index
    %c0_1 = arith.constant 0 : index
    %0 = vector.load %arg2[%c0, %c0_0, %c0_1] : memref<1x8x32xf32, #tpu.memory_space<vmem>>, vector<1x8x32xf32>
    %1 = vector.shape_cast %0 : vector<1x8x32xf32> to vector<8x32xf32>
    %c0_2 = arith.constant 0 : index
    %c0_3 = arith.constant 0 : index
    %2 = vector.load %arg3[%c0_2, %c0_3] : memref<1x1xf32, #tpu.memory_space<vmem>>, vector<1x1xf32>
    %3 = vector.extract %2[0, 0] : f32 from vector<1x1xf32>
    %c0_4 = arith.constant 0 : index
    %c0_5 = arith.constant 0 : index
    %4 = vector.load %arg4[%c0_4, %c0_5] : memref<1x1xf32, #tpu.memory_space<vmem>>, vector<1x1xf32>
    %5 = vector.extract %4[0, 0] : f32 from vector<1x1xf32>
    %cst = arith.constant dense<0.000000e+00> : vector<8xf32>
    %6 = vector.multi_reduction <add>, %1, %cst [1] : vector<8x32xf32> to vector<8xf32>
    %7 = vector.shape_cast %6 : vector<8xf32> to vector<8x1xf32>
    %cst_6 = arith.constant 3.200000e+01 : f32
    %8 = vector.broadcast %cst_6 : f32 to vector<8x1xf32>
    %9 = arith.divf %7, %8 : vector<8x1xf32>
    %10 = vector.broadcast %9 : vector<8x1xf32> to vector<8x32xf32>
    %11 = arith.subf %1, %10 : vector<8x32xf32>
    %12 = arith.mulf %11, %11 : vector<8x32xf32>
    %cst_7 = arith.constant dense<0.000000e+00> : vector<8xf32>
    %13 = vector.multi_reduction <add>, %12, %cst_7 [1] : vector<8x32xf32> to vector<8xf32>
    %14 = vector.shape_cast %13 : vector<8xf32> to vector<8x1xf32>
    %cst_8 = arith.constant 0.0322580636 : f32
    %15 = vector.broadcast %cst_8 : f32 to vector<8x1xf32>
    %16 = arith.mulf %14, %15 : vector<8x1xf32>
    %17 = math.sqrt %16 : vector<8x1xf32>
    %cst_9 = arith.constant 9.99999997E-7 : f32
    %18 = vector.broadcast %cst_9 : f32 to vector<8x1xf32>
    %19 = arith.addf %17, %18 : vector<8x1xf32>
    %20 = tpu.reciprocal %19 {approx = true} : vector<8x1xf32> -> vector<8x1xf32>
    %21 = vector.broadcast %9 : vector<8x1xf32> to vector<8x32xf32>
    %22 = arith.subf %1, %21 : vector<8x32xf32>
    %23 = vector.broadcast %3 : f32 to vector<8x32xf32>
    %24 = arith.mulf %23, %22 : vector<8x32xf32>
    %25 = vector.broadcast %20 : vector<8x1xf32> to vector<8x32xf32>
    %26 = arith.mulf %24, %25 : vector<8x32xf32>
    %27 = vector.broadcast %5 : f32 to vector<8x32xf32>
    %28 = arith.addf %26, %27 : vector<8x32xf32>
    %c0_10 = arith.constant 0 : index
    %c0_11 = arith.constant 0 : index
    %c0_12 = arith.constant 0 : index
    %29 = vector.load %arg5[%c0_10, %c0_11, %c0_12] : memref<1x8x32xf32, #tpu.memory_space<vmem>>, vector<1x8x32xf32>
    %30 = vector.shape_cast %29 : vector<1x8x32xf32> to vector<8x32xf32>
    %31 = vector.shape_cast %28 : vector<8x32xf32> to vector<1x8x32xf32>
    tpu.vector_store %arg5[%c0_10, %c0_11, %c0_12], %31 {strides = array<i32>} : memref<1x8x32xf32, #tpu.memory_space<vmem>>, vector<1x8x32xf32>,
    return
  }
  func.func @transform_0(%arg0: i32, %arg1: i32) -> (i32, i32, i32) {
    %c0_i32 = arith.constant 0 : i32
    %c0_i32_0 = arith.constant 0 : i32
    return %arg0, %arg1, %c0_i32 : i32, i32, i32
  }
  func.func @transform_1(%arg0: i32, %arg1: i32) -> (i32, i32) {
    %c0_i32 = arith.constant 0 : i32
    %c0_i32_0 = arith.constant 0 : i32
    %c0_i32_1 = arith.constant 0 : i32
    return %c0_i32, %c0_i32_0 : i32, i32
  }
  func.func @transform_2(%arg0: i32, %arg1: i32) -> (i32, i32) {
    %c0_i32 = arith.constant 0 : i32
    %c0_i32_0 = arith.constant 0 : i32
    %c0_i32_1 = arith.constant 0 : i32
    return %c0_i32, %c0_i32_0 : i32, i32
  }
  func.func @transform_3(%arg0: i32, %arg1: i32) -> (i32, i32, i32) {
    %c0_i32 = arith.constant 0 : i32
    %c0_i32_0 = arith.constant 0 : i32
    return %arg0, %arg1, %c0_i32 : i32, i32, i32
  }
}

module attributes {stable_mosaic.version = 11 : i64} {
  func.func @_decoder_block_kernel(%arg0: i32, %arg1: memref<1x8x32xf32, #tpu.memory_space<vmem>>, %arg2: memref<1x16x32xf32, #tpu.memory_space<vmem>>, %arg3: memref<1x8x16xf32, #tpu.memory_space<vmem>>, %arg4: memref<1x8x8xf32, #tpu.memory_space<vmem>>, %arg5: memref<1x1xf32, #tpu.memory_space<vmem>>, %arg6: memref<1x1xf32, #tpu.memory_space<vmem>>, %arg7: memref<32x32xbf16, #tpu.memory_space<vmem>>, %arg8: memref<32x32xbf16, #tpu.memory_space<vmem>>, %arg9: memref<32x32xbf16, #tpu.memory_space<vmem>>, %arg10: memref<32x32xbf16, #tpu.memory_space<vmem>>, %arg11: memref<1x1xf32, #tpu.memory_space<vmem>>, %arg12: memref<1x1xf32, #tpu.memory_space<vmem>>, %arg13: memref<32x32xbf16, #tpu.memory_space<vmem>>, %arg14: memref<32x32xbf16, #tpu.memory_space<vmem>>, %arg15: memref<32x32xbf16, #tpu.memory_space<vmem>>, %arg16: memref<32x32xbf16, #tpu.memory_space<vmem>>, %arg17: memref<1x1xf32, #tpu.memory_space<vmem>>, %arg18: memref<1x1xf32, #tpu.memory_space<vmem>>, %arg19: memref<32x64xbf16, #tpu.memory_space<vmem>>, %arg20: memref<1x64xf32, #tpu.memory_space<vmem>>, %arg21: memref<64x32xbf16, #tpu.memory_space<vmem>>, %arg22: memref<1x32xf32, #tpu.memory_space<vmem>>, %arg23: memref<1x8x32xf32, #tpu.memory_space<vmem>>) attributes {dimension_semantics = [#tpu.dimension_semantics<parallel>], iteration_bounds = array<i64: 2>, scalar_prefetch = 0 : i64, scratch_operands = 0 : i64, tpu.core_type = #tpu.core_type<tc>, window_params = [{transform_indices = @transform_0, window_bounds = array<i64: 1, 8, 32>}, {transform_indices = @transform_1, window_bounds = array<i64: 1, 16, 32>}, {transform_indices = @transform_2, window_bounds = array<i64: 1, 8, 16>}, {transform_indices = @transform_3, window_bounds = array<i64: 1, 8, 8>}, {pipeline_mode = #tpu.pipeline_mode<synchronous>, transform_indices = @transform_4, window_bounds = array<i64: 1, 1>}, {pipeline_mode = #tpu.pipeline_mode<synchronous>, transform_indices = @transform_5, window_bounds = array<i64: 1, 1>}, {pipeline_mode = #tpu.pipeline_mode<synchronous>, transform_indices = @transform_6, window_bounds = array<i64: 32, 32>}, {pipeline_mode = #tpu.pipeline_mode<synchronous>, transform_indices = @transform_7, window_bounds = array<i64: 32, 32>}, {pipeline_mode = #tpu.pipeline_mode<synchronous>, transform_indices = @transform_8, window_bounds = array<i64: 32, 32>}, {pipeline_mode = #tpu.pipeline_mode<synchronous>, transform_indices = @transform_9, window_bounds = array<i64: 32, 32>}, {pipeline_mode = #tpu.pipeline_mode<synchronous>, transform_indices = @transform_10, window_bounds = array<i64: 1, 1>}, {pipeline_mode = #tpu.pipeline_mode<synchronous>, transform_indices = @transform_11, window_bounds = array<i64: 1, 1>}, {pipeline_mode = #tpu.pipeline_mode<synchronous>, transform_indices = @transform_12, window_bounds = array<i64: 32, 32>}, {pipeline_mode = #tpu.pipeline_mode<synchronous>, transform_indices = @transform_13, window_bounds = array<i64: 32, 32>}, {pipeline_mode = #tpu.pipeline_mode<synchronous>, transform_indices = @transform_14, window_bounds = array<i64: 32, 32>}, {pipeline_mode = #tpu.pipeline_mode<synchronous>, transform_indices = @transform_15, window_bounds = array<i64: 32, 32>}, {pipeline_mode = #tpu.pipeline_mode<synchronous>, transform_indices = @transform_16, window_bounds = array<i64: 1, 1>}, {pipeline_mode = #tpu.pipeline_mode<synchronous>, transform_indices = @transform_17, window_bounds = array<i64: 1, 1>}, {pipeline_mode = #tpu.pipeline_mode<synchronous>, transform_indices = @transform_18, window_bounds = array<i64: 32, 64>}, {pipeline_mode = #tpu.pipeline_mode<synchronous>, transform_indices = @transform_19, window_bounds = array<i64: 1, 64>}, {pipeline_mode = #tpu.pipeline_mode<synchronous>, transform_indices = @transform_20, window_bounds = array<i64: 64, 32>}, {pipeline_mode = #tpu.pipeline_mode<synchronous>, transform_indices = @transform_21, window_bounds = array<i64: 1, 32>}, {transform_indices = @transform_22, window_bounds = array<i64: 1, 8, 32>}]} {
    %c0 = arith.constant 0 : index
    %c0_0 = arith.constant 0 : index
    %c0_1 = arith.constant 0 : index
    %0 = vector.load %arg1[%c0, %c0_0, %c0_1] : memref<1x8x32xf32, #tpu.memory_space<vmem>>, vector<1x8x32xf32>
    %1 = vector.shape_cast %0 : vector<1x8x32xf32> to vector<8x32xf32>
    %c0_2 = arith.constant 0 : index
    %c0_3 = arith.constant 0 : index
    %c0_4 = arith.constant 0 : index
    %2 = vector.load %arg2[%c0_2, %c0_3, %c0_4] : memref<1x16x32xf32, #tpu.memory_space<vmem>>, vector<1x16x32xf32>
    %3 = vector.shape_cast %2 : vector<1x16x32xf32> to vector<16x32xf32>
    %c0_5 = arith.constant 0 : index
    %c0_6 = arith.constant 0 : index
    %4 = vector.load %arg5[%c0_5, %c0_6] : memref<1x1xf32, #tpu.memory_space<vmem>>, vector<1x1xf32>
    %5 = vector.extract %4[0, 0] : f32 from vector<1x1xf32>
    %c0_7 = arith.constant 0 : index
    %c0_8 = arith.constant 0 : index
    %6 = vector.load %arg6[%c0_7, %c0_8] : memref<1x1xf32, #tpu.memory_space<vmem>>, vector<1x1xf32>
    %7 = vector.extract %6[0, 0] : f32 from vector<1x1xf32>
    %cst = arith.constant dense<0.000000e+00> : vector<8xf32>
    %8 = vector.multi_reduction <add>, %1, %cst [1] : vector<8x32xf32> to vector<8xf32>
    %9 = vector.shape_cast %8 : vector<8xf32> to vector<8x1xf32>
    %cst_9 = arith.constant 3.200000e+01 : f32
    %10 = vector.broadcast %cst_9 : f32 to vector<8x1xf32>
    %11 = arith.divf %9, %10 : vector<8x1xf32>
    %12 = vector.broadcast %11 : vector<8x1xf32> to vector<8x32xf32>
    %13 = arith.subf %1, %12 : vector<8x32xf32>
    %14 = arith.mulf %13, %13 : vector<8x32xf32>
    %cst_10 = arith.constant dense<0.000000e+00> : vector<8xf32>
    %15 = vector.multi_reduction <add>, %14, %cst_10 [1] : vector<8x32xf32> to vector<8xf32>
    %16 = vector.shape_cast %15 : vector<8xf32> to vector<8x1xf32>
    %cst_11 = arith.constant 0.0322580636 : f32
    %17 = vector.broadcast %cst_11 : f32 to vector<8x1xf32>
    %18 = arith.mulf %16, %17 : vector<8x1xf32>
    %19 = math.sqrt %18 : vector<8x1xf32>
    %cst_12 = arith.constant 9.99999997E-7 : f32
    %20 = vector.broadcast %cst_12 : f32 to vector<8x1xf32>
    %21 = arith.addf %19, %20 : vector<8x1xf32>
    %22 = tpu.reciprocal %21 {approx = true} : vector<8x1xf32> -> vector<8x1xf32>
    %23 = vector.broadcast %11 : vector<8x1xf32> to vector<8x32xf32>
    %24 = arith.subf %1, %23 : vector<8x32xf32>
    %25 = vector.broadcast %5 : f32 to vector<8x32xf32>
    %26 = arith.mulf %25, %24 : vector<8x32xf32>
    %27 = vector.broadcast %22 : vector<8x1xf32> to vector<8x32xf32>
    %28 = arith.mulf %26, %27 : vector<8x32xf32>
    %29 = vector.broadcast %7 : f32 to vector<8x32xf32>
    %30 = arith.addf %28, %29 : vector<8x32xf32>
    %c0_13 = arith.constant 0 : index
    %c0_14 = arith.constant 0 : index
    %c0_15 = arith.constant 0 : index
    %31 = vector.load %arg4[%c0_13, %c0_14, %c0_15] : memref<1x8x8xf32, #tpu.memory_space<vmem>>, vector<1x8x8xf32>
    %32 = vector.shape_cast %31 : vector<1x8x8xf32> to vector<8x8xf32>
    %c0_16 = arith.constant 0 : index
    %c0_17 = arith.constant 0 : index
    %33 = vector.load %arg7[%c0_16, %c0_17] : memref<32x32xbf16, #tpu.memory_space<vmem>>, vector<32x32xbf16>
    %c0_18 = arith.constant 0 : index
    %c0_19 = arith.constant 0 : index
    %34 = vector.load %arg8[%c0_18, %c0_19] : memref<32x32xbf16, #tpu.memory_space<vmem>>, vector<32x32xbf16>
    %c0_20 = arith.constant 0 : index
    %c0_21 = arith.constant 0 : index
    %35 = vector.load %arg9[%c0_20, %c0_21] : memref<32x32xbf16, #tpu.memory_space<vmem>>, vector<32x32xbf16>
    %c0_22 = arith.constant 0 : index
    %c0_23 = arith.constant 0 : index
    %36 = vector.load %arg10[%c0_22, %c0_23] : memref<32x32xbf16, #tpu.memory_space<vmem>>, vector<32x32xbf16>
    %37 = arith.truncf %30 : vector<8x32xf32> to vector<8x32xbf16>
    %38 = arith.truncf %30 : vector<8x32xf32> to vector<8x32xbf16>
    %cst_24 = arith.constant dense<0.000000e+00> : vector<8x32xf32>
    %39 = tpu.matmul %37, %33, %cst_24 {dimension_numbers = #tpu.dot_dimension_numbers<[1], [0], [0], [1], [0, 0, 1, 1], [], []>} : vector<8x32xbf16>, vector<32x32xbf16>, vector<8x32xf32> -> vector<8x32xf32>
    %cst_25 = arith.constant dense<0.000000e+00> : vector<8x32xf32>
    %40 = tpu.matmul %38, %34, %cst_25 {dimension_numbers = #tpu.dot_dimension_numbers<[1], [0], [0], [1], [0, 0, 1, 1], [], []>} : vector<8x32xbf16>, vector<32x32xbf16>, vector<8x32xf32> -> vector<8x32xf32>
    %cst_26 = arith.constant dense<0.000000e+00> : vector<8x32xf32>
    %41 = tpu.matmul %38, %35, %cst_26 {dimension_numbers = #tpu.dot_dimension_numbers<[1], [0], [0], [1], [0, 0, 1, 1], [], []>} : vector<8x32xbf16>, vector<32x32xbf16>, vector<8x32xf32> -> vector<8x32xf32>
    %cst_27 = arith.constant 0.000000e+00 : f32
    %42 = vector.broadcast %cst_27 : f32 to vector<8x8xf32>
    %43 = arith.cmpf one, %32, %42 : vector<8x8xf32>
    %44 = vector.extract_strided_slice %39 {offsets = [0, 0], sizes = [8, 8], strides = [1, 1]} : vector<8x32xf32> to vector<8x8xf32>
    %45 = arith.truncf %44 : vector<8x8xf32> to vector<8x8xbf16>
    %46 = vector.extract_strided_slice %40 {offsets = [0, 0], sizes = [8, 8], strides = [1, 1]} : vector<8x32xf32> to vector<8x8xf32>
    %47 = arith.truncf %46 : vector<8x8xf32> to vector<8x8xbf16>
    %48 = vector.extract_strided_slice %41 {offsets = [0, 0], sizes = [8, 8], strides = [1, 1]} : vector<8x32xf32> to vector<8x8xf32>
    %49 = arith.truncf %48 : vector<8x8xf32> to vector<8x8xbf16>
    %cst_28 = arith.constant dense<0.000000e+00> : vector<8x8xf32>
    %50 = tpu.matmul %45, %47, %cst_28 {dimension_numbers = #tpu.dot_dimension_numbers<[1], [1], [0], [0], [0, 0, 1, 0], [], []>} : vector<8x8xbf16>, vector<8x8xbf16>, vector<8x8xf32> -> vector<8x8xf32>
    %cst_29 = arith.constant 0.353553385 : f32
    %51 = vector.broadcast %cst_29 : f32 to vector<8x8xf32>
    %52 = arith.mulf %50, %51 : vector<8x8xf32>
    %cst_30 = arith.constant -1.000000e+09 : f32
    %53 = vector.broadcast %cst_30 : f32 to vector<8x8xf32>
    %54 = arith.select %43, %52, %53 : vector<8x8xi1>, vector<8x8xf32>
    %cst_31 = arith.constant dense<0xFF800000> : vector<8xf32>
    %55 = vector.multi_reduction <maximumf>, %54, %cst_31 [1] : vector<8x8xf32> to vector<8xf32>
    %56 = vector.shape_cast %55 : vector<8xf32> to vector<8x1xf32>
    %57 = vector.broadcast %56 : vector<8x1xf32> to vector<8x8xf32>
    %58 = arith.subf %54, %57 : vector<8x8xf32>
    %59 = math.exp %58 : vector<8x8xf32>
    %cst_32 = arith.constant dense<0.000000e+00> : vector<8xf32>
    %60 = vector.multi_reduction <add>, %59, %cst_32 [1] : vector<8x8xf32> to vector<8xf32>
    %61 = vector.shape_cast %60 : vector<8xf32> to vector<8x1xf32>
    %62 = tpu.reciprocal %61 {approx = true} : vector<8x1xf32> -> vector<8x1xf32>
    %63 = vector.broadcast %62 : vector<8x1xf32> to vector<8x8xf32>
    %64 = arith.mulf %59, %63 : vector<8x8xf32>
    %65 = arith.truncf %64 : vector<8x8xf32> to vector<8x8xbf16>
    %cst_33 = arith.constant dense<0.000000e+00> : vector<8x8xf32>
    %66 = tpu.matmul %65, %49, %cst_33 {dimension_numbers = #tpu.dot_dimension_numbers<[1], [0], [0], [1], [0, 0, 1, 1], [], []>} : vector<8x8xbf16>, vector<8x8xbf16>, vector<8x8xf32> -> vector<8x8xf32>
    %67 = arith.truncf %66 : vector<8x8xf32> to vector<8x8xbf16>
    %68 = vector.extract_strided_slice %36 {offsets = [0, 0], sizes = [8, 32], strides = [1, 1]} : vector<32x32xbf16> to vector<8x32xbf16>
    %cst_34 = arith.constant dense<0.000000e+00> : vector<8x32xf32>
    %69 = tpu.matmul %67, %68, %cst_34 {dimension_numbers = #tpu.dot_dimension_numbers<[1], [0], [0], [1], [0, 0, 1, 1], [], []>} : vector<8x8xbf16>, vector<8x32xbf16>, vector<8x32xf32> -> vector<8x32xf32>
    %70 = arith.addf %1, %69 : vector<8x32xf32>
    %71 = vector.extract_strided_slice %39 {offsets = [0, 8], sizes = [8, 8], strides = [1, 1]} : vector<8x32xf32> to vector<8x8xf32>
    %72 = arith.truncf %71 : vector<8x8xf32> to vector<8x8xbf16>
    %73 = vector.extract_strided_slice %40 {offsets = [0, 8], sizes = [8, 8], strides = [1, 1]} : vector<8x32xf32> to vector<8x8xf32>
    %74 = arith.truncf %73 : vector<8x8xf32> to vector<8x8xbf16>
    %75 = vector.extract_strided_slice %41 {offsets = [0, 8], sizes = [8, 8], strides = [1, 1]} : vector<8x32xf32> to vector<8x8xf32>
    %76 = arith.truncf %75 : vector<8x8xf32> to vector<8x8xbf16>
    %cst_35 = arith.constant dense<0.000000e+00> : vector<8x8xf32>
    %77 = tpu.matmul %72, %74, %cst_35 {dimension_numbers = #tpu.dot_dimension_numbers<[1], [1], [0], [0], [0, 0, 1, 0], [], []>} : vector<8x8xbf16>, vector<8x8xbf16>, vector<8x8xf32> -> vector<8x8xf32>
    %cst_36 = arith.constant 0.353553385 : f32
    %78 = vector.broadcast %cst_36 : f32 to vector<8x8xf32>
    %79 = arith.mulf %77, %78 : vector<8x8xf32>
    %cst_37 = arith.constant -1.000000e+09 : f32
    %80 = vector.broadcast %cst_37 : f32 to vector<8x8xf32>
    %81 = arith.select %43, %79, %80 : vector<8x8xi1>, vector<8x8xf32>
    %cst_38 = arith.constant dense<0xFF800000> : vector<8xf32>
    %82 = vector.multi_reduction <maximumf>, %81, %cst_38 [1] : vector<8x8xf32> to vector<8xf32>
    %83 = vector.shape_cast %82 : vector<8xf32> to vector<8x1xf32>
    %84 = vector.broadcast %83 : vector<8x1xf32> to vector<8x8xf32>
    %85 = arith.subf %81, %84 : vector<8x8xf32>
    %86 = math.exp %85 : vector<8x8xf32>
    %cst_39 = arith.constant dense<0.000000e+00> : vector<8xf32>
    %87 = vector.multi_reduction <add>, %86, %cst_39 [1] : vector<8x8xf32> to vector<8xf32>
    %88 = vector.shape_cast %87 : vector<8xf32> to vector<8x1xf32>
    %89 = tpu.reciprocal %88 {approx = true} : vector<8x1xf32> -> vector<8x1xf32>
    %90 = vector.broadcast %89 : vector<8x1xf32> to vector<8x8xf32>
    %91 = arith.mulf %86, %90 : vector<8x8xf32>
    %92 = arith.truncf %91 : vector<8x8xf32> to vector<8x8xbf16>
    %cst_40 = arith.constant dense<0.000000e+00> : vector<8x8xf32>
    %93 = tpu.matmul %92, %76, %cst_40 {dimension_numbers = #tpu.dot_dimension_numbers<[1], [0], [0], [1], [0, 0, 1, 1], [], []>} : vector<8x8xbf16>, vector<8x8xbf16>, vector<8x8xf32> -> vector<8x8xf32>
    %94 = arith.truncf %93 : vector<8x8xf32> to vector<8x8xbf16>
    %95 = vector.extract_strided_slice %36 {offsets = [8, 0], sizes = [8, 32], strides = [1, 1]} : vector<32x32xbf16> to vector<8x32xbf16>
    %cst_41 = arith.constant dense<0.000000e+00> : vector<8x32xf32>
    %96 = tpu.matmul %94, %95, %cst_41 {dimension_numbers = #tpu.dot_dimension_numbers<[1], [0], [0], [1], [0, 0, 1, 1], [], []>} : vector<8x8xbf16>, vector<8x32xbf16>, vector<8x32xf32> -> vector<8x32xf32>
    %97 = arith.addf %70, %96 : vector<8x32xf32>
    %98 = vector.extract_strided_slice %39 {offsets = [0, 16], sizes = [8, 8], strides = [1, 1]} : vector<8x32xf32> to vector<8x8xf32>
    %99 = arith.truncf %98 : vector<8x8xf32> to vector<8x8xbf16>
    %100 = vector.extract_strided_slice %40 {offsets = [0, 16], sizes = [8, 8], strides = [1, 1]} : vector<8x32xf32> to vector<8x8xf32>
    %101 = arith.truncf %100 : vector<8x8xf32> to vector<8x8xbf16>
    %102 = vector.extract_strided_slice %41 {offsets = [0, 16], sizes = [8, 8], strides = [1, 1]} : vector<8x32xf32> to vector<8x8xf32>
    %103 = arith.truncf %102 : vector<8x8xf32> to vector<8x8xbf16>
    %cst_42 = arith.constant dense<0.000000e+00> : vector<8x8xf32>
    %104 = tpu.matmul %99, %101, %cst_42 {dimension_numbers = #tpu.dot_dimension_numbers<[1], [1], [0], [0], [0, 0, 1, 0], [], []>} : vector<8x8xbf16>, vector<8x8xbf16>, vector<8x8xf32> -> vector<8x8xf32>
    %cst_43 = arith.constant 0.353553385 : f32
    %105 = vector.broadcast %cst_43 : f32 to vector<8x8xf32>
    %106 = arith.mulf %104, %105 : vector<8x8xf32>
    %cst_44 = arith.constant -1.000000e+09 : f32
    %107 = vector.broadcast %cst_44 : f32 to vector<8x8xf32>
    %108 = arith.select %43, %106, %107 : vector<8x8xi1>, vector<8x8xf32>
    %cst_45 = arith.constant dense<0xFF800000> : vector<8xf32>
    %109 = vector.multi_reduction <maximumf>, %108, %cst_45 [1] : vector<8x8xf32> to vector<8xf32>
    %110 = vector.shape_cast %109 : vector<8xf32> to vector<8x1xf32>
    %111 = vector.broadcast %110 : vector<8x1xf32> to vector<8x8xf32>
    %112 = arith.subf %108, %111 : vector<8x8xf32>
    %113 = math.exp %112 : vector<8x8xf32>
    %cst_46 = arith.constant dense<0.000000e+00> : vector<8xf32>
    %114 = vector.multi_reduction <add>, %113, %cst_46 [1] : vector<8x8xf32> to vector<8xf32>
    %115 = vector.shape_cast %114 : vector<8xf32> to vector<8x1xf32>
    %116 = tpu.reciprocal %115 {approx = true} : vector<8x1xf32> -> vector<8x1xf32>
    %117 = vector.broadcast %116 : vector<8x1xf32> to vector<8x8xf32>
    %118 = arith.mulf %113, %117 : vector<8x8xf32>
    %119 = arith.truncf %118 : vector<8x8xf32> to vector<8x8xbf16>
    %cst_47 = arith.constant dense<0.000000e+00> : vector<8x8xf32>
    %120 = tpu.matmul %119, %103, %cst_47 {dimension_numbers = #tpu.dot_dimension_numbers<[1], [0], [0], [1], [0, 0, 1, 1], [], []>} : vector<8x8xbf16>, vector<8x8xbf16>, vector<8x8xf32> -> vector<8x8xf32>
    %121 = arith.truncf %120 : vector<8x8xf32> to vector<8x8xbf16>
    %122 = vector.extract_strided_slice %36 {offsets = [16, 0], sizes = [8, 32], strides = [1, 1]} : vector<32x32xbf16> to vector<8x32xbf16>
    %cst_48 = arith.constant dense<0.000000e+00> : vector<8x32xf32>
    %123 = tpu.matmul %121, %122, %cst_48 {dimension_numbers = #tpu.dot_dimension_numbers<[1], [0], [0], [1], [0, 0, 1, 1], [], []>} : vector<8x8xbf16>, vector<8x32xbf16>, vector<8x32xf32> -> vector<8x32xf32>
    %124 = arith.addf %97, %123 : vector<8x32xf32>
    %125 = vector.extract_strided_slice %39 {offsets = [0, 24], sizes = [8, 8], strides = [1, 1]} : vector<8x32xf32> to vector<8x8xf32>
    %126 = arith.truncf %125 : vector<8x8xf32> to vector<8x8xbf16>
    %127 = vector.extract_strided_slice %40 {offsets = [0, 24], sizes = [8, 8], strides = [1, 1]} : vector<8x32xf32> to vector<8x8xf32>
    %128 = arith.truncf %127 : vector<8x8xf32> to vector<8x8xbf16>
    %129 = vector.extract_strided_slice %41 {offsets = [0, 24], sizes = [8, 8], strides = [1, 1]} : vector<8x32xf32> to vector<8x8xf32>
    %130 = arith.truncf %129 : vector<8x8xf32> to vector<8x8xbf16>
    %cst_49 = arith.constant dense<0.000000e+00> : vector<8x8xf32>
    %131 = tpu.matmul %126, %128, %cst_49 {dimension_numbers = #tpu.dot_dimension_numbers<[1], [1], [0], [0], [0, 0, 1, 0], [], []>} : vector<8x8xbf16>, vector<8x8xbf16>, vector<8x8xf32> -> vector<8x8xf32>
    %cst_50 = arith.constant 0.353553385 : f32
    %132 = vector.broadcast %cst_50 : f32 to vector<8x8xf32>
    %133 = arith.mulf %131, %132 : vector<8x8xf32>
    %cst_51 = arith.constant -1.000000e+09 : f32
    %134 = vector.broadcast %cst_51 : f32 to vector<8x8xf32>
    %135 = arith.select %43, %133, %134 : vector<8x8xi1>, vector<8x8xf32>
    %cst_52 = arith.constant dense<0xFF800000> : vector<8xf32>
    %136 = vector.multi_reduction <maximumf>, %135, %cst_52 [1] : vector<8x8xf32> to vector<8xf32>
    %137 = vector.shape_cast %136 : vector<8xf32> to vector<8x1xf32>
    %138 = vector.broadcast %137 : vector<8x1xf32> to vector<8x8xf32>
    %139 = arith.subf %135, %138 : vector<8x8xf32>
    %140 = math.exp %139 : vector<8x8xf32>
    %cst_53 = arith.constant dense<0.000000e+00> : vector<8xf32>
    %141 = vector.multi_reduction <add>, %140, %cst_53 [1] : vector<8x8xf32> to vector<8xf32>
    %142 = vector.shape_cast %141 : vector<8xf32> to vector<8x1xf32>
    %143 = tpu.reciprocal %142 {approx = true} : vector<8x1xf32> -> vector<8x1xf32>
    %144 = vector.broadcast %143 : vector<8x1xf32> to vector<8x8xf32>
    %145 = arith.mulf %140, %144 : vector<8x8xf32>
    %146 = arith.truncf %145 : vector<8x8xf32> to vector<8x8xbf16>
    %cst_54 = arith.constant dense<0.000000e+00> : vector<8x8xf32>
    %147 = tpu.matmul %146, %130, %cst_54 {dimension_numbers = #tpu.dot_dimension_numbers<[1], [0], [0], [1], [0, 0, 1, 1], [], []>} : vector<8x8xbf16>, vector<8x8xbf16>, vector<8x8xf32> -> vector<8x8xf32>
    %148 = arith.truncf %147 : vector<8x8xf32> to vector<8x8xbf16>
    %149 = vector.extract_strided_slice %36 {offsets = [24, 0], sizes = [8, 32], strides = [1, 1]} : vector<32x32xbf16> to vector<8x32xbf16>
    %cst_55 = arith.constant dense<0.000000e+00> : vector<8x32xf32>
    %150 = tpu.matmul %148, %149, %cst_55 {dimension_numbers = #tpu.dot_dimension_numbers<[1], [0], [0], [1], [0, 0, 1, 1], [], []>} : vector<8x8xbf16>, vector<8x32xbf16>, vector<8x32xf32> -> vector<8x32xf32>
    %151 = arith.addf %124, %150 : vector<8x32xf32>
    %c0_56 = arith.constant 0 : index
    %c0_57 = arith.constant 0 : index
    %152 = vector.load %arg11[%c0_56, %c0_57] : memref<1x1xf32, #tpu.memory_space<vmem>>, vector<1x1xf32>
    %153 = vector.extract %152[0, 0] : f32 from vector<1x1xf32>
    %c0_58 = arith.constant 0 : index
    %c0_59 = arith.constant 0 : index
    %154 = vector.load %arg12[%c0_58, %c0_59] : memref<1x1xf32, #tpu.memory_space<vmem>>, vector<1x1xf32>
    %155 = vector.extract %154[0, 0] : f32 from vector<1x1xf32>
    %cst_60 = arith.constant dense<0.000000e+00> : vector<8xf32>
    %156 = vector.multi_reduction <add>, %151, %cst_60 [1] : vector<8x32xf32> to vector<8xf32>
    %157 = vector.shape_cast %156 : vector<8xf32> to vector<8x1xf32>
    %cst_61 = arith.constant 3.200000e+01 : f32
    %158 = vector.broadcast %cst_61 : f32 to vector<8x1xf32>
    %159 = arith.divf %157, %158 : vector<8x1xf32>
    %160 = vector.broadcast %159 : vector<8x1xf32> to vector<8x32xf32>
    %161 = arith.subf %151, %160 : vector<8x32xf32>
    %162 = arith.mulf %161, %161 : vector<8x32xf32>
    %cst_62 = arith.constant dense<0.000000e+00> : vector<8xf32>
    %163 = vector.multi_reduction <add>, %162, %cst_62 [1] : vector<8x32xf32> to vector<8xf32>
    %164 = vector.shape_cast %163 : vector<8xf32> to vector<8x1xf32>
    %cst_63 = arith.constant 0.0322580636 : f32
    %165 = vector.broadcast %cst_63 : f32 to vector<8x1xf32>
    %166 = arith.mulf %164, %165 : vector<8x1xf32>
    %167 = math.sqrt %166 : vector<8x1xf32>
    %cst_64 = arith.constant 9.99999997E-7 : f32
    %168 = vector.broadcast %cst_64 : f32 to vector<8x1xf32>
    %169 = arith.addf %167, %168 : vector<8x1xf32>
    %170 = tpu.reciprocal %169 {approx = true} : vector<8x1xf32> -> vector<8x1xf32>
    %171 = vector.broadcast %159 : vector<8x1xf32> to vector<8x32xf32>
    %172 = arith.subf %151, %171 : vector<8x32xf32>
    %173 = vector.broadcast %153 : f32 to vector<8x32xf32>
    %174 = arith.mulf %173, %172 : vector<8x32xf32>
    %175 = vector.broadcast %170 : vector<8x1xf32> to vector<8x32xf32>
    %176 = arith.mulf %174, %175 : vector<8x32xf32>
    %177 = vector.broadcast %155 : f32 to vector<8x32xf32>
    %178 = arith.addf %176, %177 : vector<8x32xf32>
    %c0_65 = arith.constant 0 : index
    %c0_66 = arith.constant 0 : index
    %c0_67 = arith.constant 0 : index
    %179 = vector.load %arg3[%c0_65, %c0_66, %c0_67] : memref<1x8x16xf32, #tpu.memory_space<vmem>>, vector<1x8x16xf32>
    %180 = vector.shape_cast %179 : vector<1x8x16xf32> to vector<8x16xf32>
    %c0_68 = arith.constant 0 : index
    %c0_69 = arith.constant 0 : index
    %181 = vector.load %arg13[%c0_68, %c0_69] : memref<32x32xbf16, #tpu.memory_space<vmem>>, vector<32x32xbf16>
    %c0_70 = arith.constant 0 : index
    %c0_71 = arith.constant 0 : index
    %182 = vector.load %arg14[%c0_70, %c0_71] : memref<32x32xbf16, #tpu.memory_space<vmem>>, vector<32x32xbf16>
    %c0_72 = arith.constant 0 : index
    %c0_73 = arith.constant 0 : index
    %183 = vector.load %arg15[%c0_72, %c0_73] : memref<32x32xbf16, #tpu.memory_space<vmem>>, vector<32x32xbf16>
    %c0_74 = arith.constant 0 : index
    %c0_75 = arith.constant 0 : index
    %184 = vector.load %arg16[%c0_74, %c0_75] : memref<32x32xbf16, #tpu.memory_space<vmem>>, vector<32x32xbf16>
    %185 = arith.truncf %178 : vector<8x32xf32> to vector<8x32xbf16>
    %186 = arith.truncf %3 : vector<16x32xf32> to vector<16x32xbf16>
    %cst_76 = arith.constant dense<0.000000e+00> : vector<8x32xf32>
    %187 = tpu.matmul %185, %181, %cst_76 {dimension_numbers = #tpu.dot_dimension_numbers<[1], [0], [0], [1], [0, 0, 1, 1], [], []>} : vector<8x32xbf16>, vector<32x32xbf16>, vector<8x32xf32> -> vector<8x32xf32>
    %cst_77 = arith.constant dense<0.000000e+00> : vector<16x32xf32>
    %188 = tpu.matmul %186, %182, %cst_77 {dimension_numbers = #tpu.dot_dimension_numbers<[1], [0], [0], [1], [0, 0, 1, 1], [], []>} : vector<16x32xbf16>, vector<32x32xbf16>, vector<16x32xf32> -> vector<16x32xf32>
    %cst_78 = arith.constant dense<0.000000e+00> : vector<16x32xf32>
    %189 = tpu.matmul %186, %183, %cst_78 {dimension_numbers = #tpu.dot_dimension_numbers<[1], [0], [0], [1], [0, 0, 1, 1], [], []>} : vector<16x32xbf16>, vector<32x32xbf16>, vector<16x32xf32> -> vector<16x32xf32>
    %cst_79 = arith.constant 0.000000e+00 : f32
    %190 = vector.broadcast %cst_79 : f32 to vector<8x16xf32>
    %191 = arith.cmpf one, %180, %190 : vector<8x16xf32>
    %192 = vector.extract_strided_slice %187 {offsets = [0, 0], sizes = [8, 8], strides = [1, 1]} : vector<8x32xf32> to vector<8x8xf32>
    %193 = arith.truncf %192 : vector<8x8xf32> to vector<8x8xbf16>
    %194 = vector.extract_strided_slice %188 {offsets = [0, 0], sizes = [16, 8], strides = [1, 1]} : vector<16x32xf32> to vector<16x8xf32>
    %195 = arith.truncf %194 : vector<16x8xf32> to vector<16x8xbf16>
    %196 = vector.extract_strided_slice %189 {offsets = [0, 0], sizes = [16, 8], strides = [1, 1]} : vector<16x32xf32> to vector<16x8xf32>
    %197 = arith.truncf %196 : vector<16x8xf32> to vector<16x8xbf16>
    %cst_80 = arith.constant dense<0.000000e+00> : vector<8x16xf32>
    %198 = tpu.matmul %193, %195, %cst_80 {dimension_numbers = #tpu.dot_dimension_numbers<[1], [1], [0], [0], [0, 0, 1, 0], [], []>} : vector<8x8xbf16>, vector<16x8xbf16>, vector<8x16xf32> -> vector<8x16xf32>
    %cst_81 = arith.constant 0.353553385 : f32
    %199 = vector.broadcast %cst_81 : f32 to vector<8x16xf32>
    %200 = arith.mulf %198, %199 : vector<8x16xf32>
    %cst_82 = arith.constant -1.000000e+09 : f32
    %201 = vector.broadcast %cst_82 : f32 to vector<8x16xf32>
    %202 = arith.select %191, %200, %201 : vector<8x16xi1>, vector<8x16xf32>
    %cst_83 = arith.constant dense<0xFF800000> : vector<8xf32>
    %203 = vector.multi_reduction <maximumf>, %202, %cst_83 [1] : vector<8x16xf32> to vector<8xf32>
    %204 = vector.shape_cast %203 : vector<8xf32> to vector<8x1xf32>
    %205 = vector.broadcast %204 : vector<8x1xf32> to vector<8x16xf32>
    %206 = arith.subf %202, %205 : vector<8x16xf32>
    %207 = math.exp %206 : vector<8x16xf32>
    %cst_84 = arith.constant dense<0.000000e+00> : vector<8xf32>
    %208 = vector.multi_reduction <add>, %207, %cst_84 [1] : vector<8x16xf32> to vector<8xf32>
    %209 = vector.shape_cast %208 : vector<8xf32> to vector<8x1xf32>
    %210 = tpu.reciprocal %209 {approx = true} : vector<8x1xf32> -> vector<8x1xf32>
    %211 = vector.broadcast %210 : vector<8x1xf32> to vector<8x16xf32>
    %212 = arith.mulf %207, %211 : vector<8x16xf32>
    %213 = arith.truncf %212 : vector<8x16xf32> to vector<8x16xbf16>
    %cst_85 = arith.constant dense<0.000000e+00> : vector<8x8xf32>
    %214 = tpu.matmul %213, %197, %cst_85 {dimension_numbers = #tpu.dot_dimension_numbers<[1], [0], [0], [1], [0, 0, 1, 1], [], []>} : vector<8x16xbf16>, vector<16x8xbf16>, vector<8x8xf32> -> vector<8x8xf32>
    %215 = arith.truncf %214 : vector<8x8xf32> to vector<8x8xbf16>
    %216 = vector.extract_strided_slice %184 {offsets = [0, 0], sizes = [8, 32], strides = [1, 1]} : vector<32x32xbf16> to vector<8x32xbf16>
    %cst_86 = arith.constant dense<0.000000e+00> : vector<8x32xf32>
    %217 = tpu.matmul %215, %216, %cst_86 {dimension_numbers = #tpu.dot_dimension_numbers<[1], [0], [0], [1], [0, 0, 1, 1], [], []>} : vector<8x8xbf16>, vector<8x32xbf16>, vector<8x32xf32> -> vector<8x32xf32>
    %218 = arith.addf %151, %217 : vector<8x32xf32>
    %219 = vector.extract_strided_slice %187 {offsets = [0, 8], sizes = [8, 8], strides = [1, 1]} : vector<8x32xf32> to vector<8x8xf32>
    %220 = arith.truncf %219 : vector<8x8xf32> to vector<8x8xbf16>
    %221 = vector.extract_strided_slice %188 {offsets = [0, 8], sizes = [16, 8], strides = [1, 1]} : vector<16x32xf32> to vector<16x8xf32>
    %222 = arith.truncf %221 : vector<16x8xf32> to vector<16x8xbf16>
    %223 = vector.extract_strided_slice %189 {offsets = [0, 8], sizes = [16, 8], strides = [1, 1]} : vector<16x32xf32> to vector<16x8xf32>
    %224 = arith.truncf %223 : vector<16x8xf32> to vector<16x8xbf16>
    %cst_87 = arith.constant dense<0.000000e+00> : vector<8x16xf32>
    %225 = tpu.matmul %220, %222, %cst_87 {dimension_numbers = #tpu.dot_dimension_numbers<[1], [1], [0], [0], [0, 0, 1, 0], [], []>} : vector<8x8xbf16>, vector<16x8xbf16>, vector<8x16xf32> -> vector<8x16xf32>
    %cst_88 = arith.constant 0.353553385 : f32
    %226 = vector.broadcast %cst_88 : f32 to vector<8x16xf32>
    %227 = arith.mulf %225, %226 : vector<8x16xf32>
    %cst_89 = arith.constant -1.000000e+09 : f32
    %228 = vector.broadcast %cst_89 : f32 to vector<8x16xf32>
    %229 = arith.select %191, %227, %228 : vector<8x16xi1>, vector<8x16xf32>
    %cst_90 = arith.constant dense<0xFF800000> : vector<8xf32>
    %230 = vector.multi_reduction <maximumf>, %229, %cst_90 [1] : vector<8x16xf32> to vector<8xf32>
    %231 = vector.shape_cast %230 : vector<8xf32> to vector<8x1xf32>
    %232 = vector.broadcast %231 : vector<8x1xf32> to vector<8x16xf32>
    %233 = arith.subf %229, %232 : vector<8x16xf32>
    %234 = math.exp %233 : vector<8x16xf32>
    %cst_91 = arith.constant dense<0.000000e+00> : vector<8xf32>
    %235 = vector.multi_reduction <add>, %234, %cst_91 [1] : vector<8x16xf32> to vector<8xf32>
    %236 = vector.shape_cast %235 : vector<8xf32> to vector<8x1xf32>
    %237 = tpu.reciprocal %236 {approx = true} : vector<8x1xf32> -> vector<8x1xf32>
    %238 = vector.broadcast %237 : vector<8x1xf32> to vector<8x16xf32>
    %239 = arith.mulf %234, %238 : vector<8x16xf32>
    %240 = arith.truncf %239 : vector<8x16xf32> to vector<8x16xbf16>
    %cst_92 = arith.constant dense<0.000000e+00> : vector<8x8xf32>
    %241 = tpu.matmul %240, %224, %cst_92 {dimension_numbers = #tpu.dot_dimension_numbers<[1], [0], [0], [1], [0, 0, 1, 1], [], []>} : vector<8x16xbf16>, vector<16x8xbf16>, vector<8x8xf32> -> vector<8x8xf32>
    %242 = arith.truncf %241 : vector<8x8xf32> to vector<8x8xbf16>
    %243 = vector.extract_strided_slice %184 {offsets = [8, 0], sizes = [8, 32], strides = [1, 1]} : vector<32x32xbf16> to vector<8x32xbf16>
    %cst_93 = arith.constant dense<0.000000e+00> : vector<8x32xf32>
    %244 = tpu.matmul %242, %243, %cst_93 {dimension_numbers = #tpu.dot_dimension_numbers<[1], [0], [0], [1], [0, 0, 1, 1], [], []>} : vector<8x8xbf16>, vector<8x32xbf16>, vector<8x32xf32> -> vector<8x32xf32>
    %245 = arith.addf %218, %244 : vector<8x32xf32>
    %246 = vector.extract_strided_slice %187 {offsets = [0, 16], sizes = [8, 8], strides = [1, 1]} : vector<8x32xf32> to vector<8x8xf32>
    %247 = arith.truncf %246 : vector<8x8xf32> to vector<8x8xbf16>
    %248 = vector.extract_strided_slice %188 {offsets = [0, 16], sizes = [16, 8], strides = [1, 1]} : vector<16x32xf32> to vector<16x8xf32>
    %249 = arith.truncf %248 : vector<16x8xf32> to vector<16x8xbf16>
    %250 = vector.extract_strided_slice %189 {offsets = [0, 16], sizes = [16, 8], strides = [1, 1]} : vector<16x32xf32> to vector<16x8xf32>
    %251 = arith.truncf %250 : vector<16x8xf32> to vector<16x8xbf16>
    %cst_94 = arith.constant dense<0.000000e+00> : vector<8x16xf32>
    %252 = tpu.matmul %247, %249, %cst_94 {dimension_numbers = #tpu.dot_dimension_numbers<[1], [1], [0], [0], [0, 0, 1, 0], [], []>} : vector<8x8xbf16>, vector<16x8xbf16>, vector<8x16xf32> -> vector<8x16xf32>
    %cst_95 = arith.constant 0.353553385 : f32
    %253 = vector.broadcast %cst_95 : f32 to vector<8x16xf32>
    %254 = arith.mulf %252, %253 : vector<8x16xf32>
    %cst_96 = arith.constant -1.000000e+09 : f32
    %255 = vector.broadcast %cst_96 : f32 to vector<8x16xf32>
    %256 = arith.select %191, %254, %255 : vector<8x16xi1>, vector<8x16xf32>
    %cst_97 = arith.constant dense<0xFF800000> : vector<8xf32>
    %257 = vector.multi_reduction <maximumf>, %256, %cst_97 [1] : vector<8x16xf32> to vector<8xf32>
    %258 = vector.shape_cast %257 : vector<8xf32> to vector<8x1xf32>
    %259 = vector.broadcast %258 : vector<8x1xf32> to vector<8x16xf32>
    %260 = arith.subf %256, %259 : vector<8x16xf32>
    %261 = math.exp %260 : vector<8x16xf32>
    %cst_98 = arith.constant dense<0.000000e+00> : vector<8xf32>
    %262 = vector.multi_reduction <add>, %261, %cst_98 [1] : vector<8x16xf32> to vector<8xf32>
    %263 = vector.shape_cast %262 : vector<8xf32> to vector<8x1xf32>
    %264 = tpu.reciprocal %263 {approx = true} : vector<8x1xf32> -> vector<8x1xf32>
    %265 = vector.broadcast %264 : vector<8x1xf32> to vector<8x16xf32>
    %266 = arith.mulf %261, %265 : vector<8x16xf32>
    %267 = arith.truncf %266 : vector<8x16xf32> to vector<8x16xbf16>
    %cst_99 = arith.constant dense<0.000000e+00> : vector<8x8xf32>
    %268 = tpu.matmul %267, %251, %cst_99 {dimension_numbers = #tpu.dot_dimension_numbers<[1], [0], [0], [1], [0, 0, 1, 1], [], []>} : vector<8x16xbf16>, vector<16x8xbf16>, vector<8x8xf32> -> vector<8x8xf32>
    %269 = arith.truncf %268 : vector<8x8xf32> to vector<8x8xbf16>
    %270 = vector.extract_strided_slice %184 {offsets = [16, 0], sizes = [8, 32], strides = [1, 1]} : vector<32x32xbf16> to vector<8x32xbf16>
    %cst_100 = arith.constant dense<0.000000e+00> : vector<8x32xf32>
    %271 = tpu.matmul %269, %270, %cst_100 {dimension_numbers = #tpu.dot_dimension_numbers<[1], [0], [0], [1], [0, 0, 1, 1], [], []>} : vector<8x8xbf16>, vector<8x32xbf16>, vector<8x32xf32> -> vector<8x32xf32>
    %272 = arith.addf %245, %271 : vector<8x32xf32>
    %273 = vector.extract_strided_slice %187 {offsets = [0, 24], sizes = [8, 8], strides = [1, 1]} : vector<8x32xf32> to vector<8x8xf32>
    %274 = arith.truncf %273 : vector<8x8xf32> to vector<8x8xbf16>
    %275 = vector.extract_strided_slice %188 {offsets = [0, 24], sizes = [16, 8], strides = [1, 1]} : vector<16x32xf32> to vector<16x8xf32>
    %276 = arith.truncf %275 : vector<16x8xf32> to vector<16x8xbf16>
    %277 = vector.extract_strided_slice %189 {offsets = [0, 24], sizes = [16, 8], strides = [1, 1]} : vector<16x32xf32> to vector<16x8xf32>
    %278 = arith.truncf %277 : vector<16x8xf32> to vector<16x8xbf16>
    %cst_101 = arith.constant dense<0.000000e+00> : vector<8x16xf32>
    %279 = tpu.matmul %274, %276, %cst_101 {dimension_numbers = #tpu.dot_dimension_numbers<[1], [1], [0], [0], [0, 0, 1, 0], [], []>} : vector<8x8xbf16>, vector<16x8xbf16>, vector<8x16xf32> -> vector<8x16xf32>
    %cst_102 = arith.constant 0.353553385 : f32
    %280 = vector.broadcast %cst_102 : f32 to vector<8x16xf32>
    %281 = arith.mulf %279, %280 : vector<8x16xf32>
    %cst_103 = arith.constant -1.000000e+09 : f32
    %282 = vector.broadcast %cst_103 : f32 to vector<8x16xf32>
    %283 = arith.select %191, %281, %282 : vector<8x16xi1>, vector<8x16xf32>
    %cst_104 = arith.constant dense<0xFF800000> : vector<8xf32>
    %284 = vector.multi_reduction <maximumf>, %283, %cst_104 [1] : vector<8x16xf32> to vector<8xf32>
    %285 = vector.shape_cast %284 : vector<8xf32> to vector<8x1xf32>
    %286 = vector.broadcast %285 : vector<8x1xf32> to vector<8x16xf32>
    %287 = arith.subf %283, %286 : vector<8x16xf32>
    %288 = math.exp %287 : vector<8x16xf32>
    %cst_105 = arith.constant dense<0.000000e+00> : vector<8xf32>
    %289 = vector.multi_reduction <add>, %288, %cst_105 [1] : vector<8x16xf32> to vector<8xf32>
    %290 = vector.shape_cast %289 : vector<8xf32> to vector<8x1xf32>
    %291 = tpu.reciprocal %290 {approx = true} : vector<8x1xf32> -> vector<8x1xf32>
    %292 = vector.broadcast %291 : vector<8x1xf32> to vector<8x16xf32>
    %293 = arith.mulf %288, %292 : vector<8x16xf32>
    %294 = arith.truncf %293 : vector<8x16xf32> to vector<8x16xbf16>
    %cst_106 = arith.constant dense<0.000000e+00> : vector<8x8xf32>
    %295 = tpu.matmul %294, %278, %cst_106 {dimension_numbers = #tpu.dot_dimension_numbers<[1], [0], [0], [1], [0, 0, 1, 1], [], []>} : vector<8x16xbf16>, vector<16x8xbf16>, vector<8x8xf32> -> vector<8x8xf32>
    %296 = arith.truncf %295 : vector<8x8xf32> to vector<8x8xbf16>
    %297 = vector.extract_strided_slice %184 {offsets = [24, 0], sizes = [8, 32], strides = [1, 1]} : vector<32x32xbf16> to vector<8x32xbf16>
    %cst_107 = arith.constant dense<0.000000e+00> : vector<8x32xf32>
    %298 = tpu.matmul %296, %297, %cst_107 {dimension_numbers = #tpu.dot_dimension_numbers<[1], [0], [0], [1], [0, 0, 1, 1], [], []>} : vector<8x8xbf16>, vector<8x32xbf16>, vector<8x32xf32> -> vector<8x32xf32>
    %299 = arith.addf %272, %298 : vector<8x32xf32>
    %c0_108 = arith.constant 0 : index
    %c0_109 = arith.constant 0 : index
    %300 = vector.load %arg17[%c0_108, %c0_109] : memref<1x1xf32, #tpu.memory_space<vmem>>, vector<1x1xf32>
    %301 = vector.extract %300[0, 0] : f32 from vector<1x1xf32>
    %c0_110 = arith.constant 0 : index
    %c0_111 = arith.constant 0 : index
    %302 = vector.load %arg18[%c0_110, %c0_111] : memref<1x1xf32, #tpu.memory_space<vmem>>, vector<1x1xf32>
    %303 = vector.extract %302[0, 0] : f32 from vector<1x1xf32>
    %cst_112 = arith.constant dense<0.000000e+00> : vector<8xf32>
    %304 = vector.multi_reduction <add>, %299, %cst_112 [1] : vector<8x32xf32> to vector<8xf32>
    %305 = vector.shape_cast %304 : vector<8xf32> to vector<8x1xf32>
    %cst_113 = arith.constant 3.200000e+01 : f32
    %306 = vector.broadcast %cst_113 : f32 to vector<8x1xf32>
    %307 = arith.divf %305, %306 : vector<8x1xf32>
    %308 = vector.broadcast %307 : vector<8x1xf32> to vector<8x32xf32>
    %309 = arith.subf %299, %308 : vector<8x32xf32>
    %310 = arith.mulf %309, %309 : vector<8x32xf32>
    %cst_114 = arith.constant dense<0.000000e+00> : vector<8xf32>
    %311 = vector.multi_reduction <add>, %310, %cst_114 [1] : vector<8x32xf32> to vector<8xf32>
    %312 = vector.shape_cast %311 : vector<8xf32> to vector<8x1xf32>
    %cst_115 = arith.constant 0.0322580636 : f32
    %313 = vector.broadcast %cst_115 : f32 to vector<8x1xf32>
    %314 = arith.mulf %312, %313 : vector<8x1xf32>
    %315 = math.sqrt %314 : vector<8x1xf32>
    %cst_116 = arith.constant 9.99999997E-7 : f32
    %316 = vector.broadcast %cst_116 : f32 to vector<8x1xf32>
    %317 = arith.addf %315, %316 : vector<8x1xf32>
    %318 = tpu.reciprocal %317 {approx = true} : vector<8x1xf32> -> vector<8x1xf32>
    %319 = vector.broadcast %307 : vector<8x1xf32> to vector<8x32xf32>
    %320 = arith.subf %299, %319 : vector<8x32xf32>
    %321 = vector.broadcast %301 : f32 to vector<8x32xf32>
    %322 = arith.mulf %321, %320 : vector<8x32xf32>
    %323 = vector.broadcast %318 : vector<8x1xf32> to vector<8x32xf32>
    %324 = arith.mulf %322, %323 : vector<8x32xf32>
    %325 = vector.broadcast %303 : f32 to vector<8x32xf32>
    %326 = arith.addf %324, %325 : vector<8x32xf32>
    %327 = arith.truncf %326 : vector<8x32xf32> to vector<8x32xbf16>
    %c0_117 = arith.constant 0 : index
    %c0_118 = arith.constant 0 : index
    %328 = vector.load %arg19[%c0_117, %c0_118] : memref<32x64xbf16, #tpu.memory_space<vmem>>, vector<32x64xbf16>
    %cst_119 = arith.constant dense<0.000000e+00> : vector<8x64xf32>
    %329 = tpu.matmul %327, %328, %cst_119 {dimension_numbers = #tpu.dot_dimension_numbers<[1], [0], [0], [1], [0, 0, 1, 1], [], []>} : vector<8x32xbf16>, vector<32x64xbf16>, vector<8x64xf32> -> vector<8x64xf32>
    %c0_120 = arith.constant 0 : index
    %c0_121 = arith.constant 0 : index
    %330 = vector.load %arg20[%c0_120, %c0_121] : memref<1x64xf32, #tpu.memory_space<vmem>>, vector<1x64xf32>
    %331 = vector.broadcast %330 : vector<1x64xf32> to vector<8x64xf32>
    %332 = arith.addf %329, %331 : vector<8x64xf32>
    %cst_122 = arith.constant 0.000000e+00 : f32
    %333 = vector.broadcast %cst_122 : f32 to vector<8x64xf32>
    %334 = arith.maximumf %332, %333 : vector<8x64xf32>
    %335 = arith.truncf %334 : vector<8x64xf32> to vector<8x64xbf16>
    %c0_123 = arith.constant 0 : index
    %c0_124 = arith.constant 0 : index
    %336 = vector.load %arg21[%c0_123, %c0_124] : memref<64x32xbf16, #tpu.memory_space<vmem>>, vector<64x32xbf16>
    %cst_125 = arith.constant dense<0.000000e+00> : vector<8x32xf32>
    %337 = tpu.matmul %335, %336, %cst_125 {dimension_numbers = #tpu.dot_dimension_numbers<[1], [0], [0], [1], [0, 0, 1, 1], [], []>} : vector<8x64xbf16>, vector<64x32xbf16>, vector<8x32xf32> -> vector<8x32xf32>
    %c0_126 = arith.constant 0 : index
    %c0_127 = arith.constant 0 : index
    %338 = vector.load %arg22[%c0_126, %c0_127] : memref<1x32xf32, #tpu.memory_space<vmem>>, vector<1x32xf32>
    %339 = vector.broadcast %338 : vector<1x32xf32> to vector<8x32xf32>
    %340 = arith.addf %337, %339 : vector<8x32xf32>
    %341 = arith.addf %299, %340 : vector<8x32xf32>
    %c0_128 = arith.constant 0 : index
    %c0_129 = arith.constant 0 : index
    %c0_130 = arith.constant 0 : index
    %342 = vector.load %arg23[%c0_128, %c0_129, %c0_130] : memref<1x8x32xf32, #tpu.memory_space<vmem>>, vector<1x8x32xf32>
    %343 = vector.shape_cast %342 : vector<1x8x32xf32> to vector<8x32xf32>
    %344 = vector.shape_cast %341 : vector<8x32xf32> to vector<1x8x32xf32>
    tpu.vector_store %arg23[%c0_128, %c0_129, %c0_130], %344 {strides = array<i32>} : memref<1x8x32xf32, #tpu.memory_space<vmem>>, vector<1x8x32xf32>,
    return
  }
  func.func @transform_0(%arg0: i32) -> (i32, i32, i32) {
    %c0_i32 = arith.constant 0 : i32
    %c0_i32_0 = arith.constant 0 : i32
    %c0_i32_1 = arith.constant 0 : i32
    return %arg0, %c0_i32, %c0_i32_0 : i32, i32, i32
  }
  func.func @transform_1(%arg0: i32) -> (i32, i32, i32) {
    %c0_i32 = arith.constant 0 : i32
    %c0_i32_0 = arith.constant 0 : i32
    %c0_i32_1 = arith.constant 0 : i32
    return %arg0, %c0_i32, %c0_i32_0 : i32, i32, i32
  }
  func.func @transform_2(%arg0: i32) -> (i32, i32, i32) {
    %c0_i32 = arith.constant 0 : i32
    %c0_i32_0 = arith.constant 0 : i32
    %c0_i32_1 = arith.constant 0 : i32
    return %arg0, %c0_i32, %c0_i32_0 : i32, i32, i32
  }
  func.func @transform_3(%arg0: i32) -> (i32, i32, i32) {
    %c0_i32 = arith.constant 0 : i32
    %c0_i32_0 = arith.constant 0 : i32
    %c0_i32_1 = arith.constant 0 : i32
    return %arg0, %c0_i32, %c0_i32_0 : i32, i32, i32
  }
  func.func @transform_4(%arg0: i32) -> (i32, i32) {
    %c0_i32 = arith.constant 0 : i32
    %c0_i32_0 = arith.constant 0 : i32
    %c0_i32_1 = arith.constant 0 : i32
    return %c0_i32, %c0_i32_0 : i32, i32
  }
  func.func @transform_5(%arg0: i32) -> (i32, i32) {
    %c0_i32 = arith.constant 0 : i32
    %c0_i32_0 = arith.constant 0 : i32
    %c0_i32_1 = arith.constant 0 : i32
    return %c0_i32, %c0_i32_0 : i32, i32
  }
  func.func @transform_6(%arg0: i32) -> (i32, i32) {
    %c0_i32 = arith.constant 0 : i32
    %c0_i32_0 = arith.constant 0 : i32
    %c0_i32_1 = arith.constant 0 : i32
    return %c0_i32, %c0_i32_0 : i32, i32
  }
  func.func @transform_7(%arg0: i32) -> (i32, i32) {
    %c0_i32 = arith.constant 0 : i32
    %c0_i32_0 = arith.constant 0 : i32
    %c0_i32_1 = arith.constant 0 : i32
    return %c0_i32, %c0_i32_0 : i32, i32
  }
  func.func @transform_8(%arg0: i32) -> (i32, i32) {
    %c0_i32 = arith.constant 0 : i32
    %c0_i32_0 = arith.constant 0 : i32
    %c0_i32_1 = arith.constant 0 : i32
    return %c0_i32, %c0_i32_0 : i32, i32
  }
  func.func @transform_9(%arg0: i32) -> (i32, i32) {
    %c0_i32 = arith.constant 0 : i32
    %c0_i32_0 = arith.constant 0 : i32
    %c0_i32_1 = arith.constant 0 : i32
    return %c0_i32, %c0_i32_0 : i32, i32
  }
  func.func @transform_10(%arg0: i32) -> (i32, i32) {
    %c0_i32 = arith.constant 0 : i32
    %c0_i32_0 = arith.constant 0 : i32
    %c0_i32_1 = arith.constant 0 : i32
    return %c0_i32, %c0_i32_0 : i32, i32
  }
  func.func @transform_11(%arg0: i32) -> (i32, i32) {
    %c0_i32 = arith.constant 0 : i32
    %c0_i32_0 = arith.constant 0 : i32
    %c0_i32_1 = arith.constant 0 : i32
    return %c0_i32, %c0_i32_0 : i32, i32
  }
  func.func @transform_12(%arg0: i32) -> (i32, i32) {
    %c0_i32 = arith.constant 0 : i32
    %c0_i32_0 = arith.constant 0 : i32
    %c0_i32_1 = arith.constant 0 : i32
    return %c0_i32, %c0_i32_0 : i32, i32
  }
  func.func @transform_13(%arg0: i32) -> (i32, i32) {
    %c0_i32 = arith.constant 0 : i32
    %c0_i32_0 = arith.constant 0 : i32
    %c0_i32_1 = arith.constant 0 : i32
    return %c0_i32, %c0_i32_0 : i32, i32
  }
  func.func @transform_14(%arg0: i32) -> (i32, i32) {
    %c0_i32 = arith.constant 0 : i32
    %c0_i32_0 = arith.constant 0 : i32
    %c0_i32_1 = arith.constant 0 : i32
    return %c0_i32, %c0_i32_0 : i32, i32
  }
  func.func @transform_15(%arg0: i32) -> (i32, i32) {
    %c0_i32 = arith.constant 0 : i32
    %c0_i32_0 = arith.constant 0 : i32
    %c0_i32_1 = arith.constant 0 : i32
    return %c0_i32, %c0_i32_0 : i32, i32
  }
  func.func @transform_16(%arg0: i32) -> (i32, i32) {
    %c0_i32 = arith.constant 0 : i32
    %c0_i32_0 = arith.constant 0 : i32
    %c0_i32_1 = arith.constant 0 : i32
    return %c0_i32, %c0_i32_0 : i32, i32
  }
  func.func @transform_17(%arg0: i32) -> (i32, i32) {
    %c0_i32 = arith.constant 0 : i32
    %c0_i32_0 = arith.constant 0 : i32
    %c0_i32_1 = arith.constant 0 : i32
    return %c0_i32, %c0_i32_0 : i32, i32
  }
  func.func @transform_18(%arg0: i32) -> (i32, i32) {
    %c0_i32 = arith.constant 0 : i32
    %c0_i32_0 = arith.constant 0 : i32
    %c0_i32_1 = arith.constant 0 : i32
    return %c0_i32, %c0_i32_0 : i32, i32
  }
  func.func @transform_19(%arg0: i32) -> (i32, i32) {
    %c0_i32 = arith.constant 0 : i32
    %c0_i32_0 = arith.constant 0 : i32
    %c0_i32_1 = arith.constant 0 : i32
    return %c0_i32, %c0_i32_0 : i32, i32
  }
  func.func @transform_20(%arg0: i32) -> (i32, i32) {
    %c0_i32 = arith.constant 0 : i32
    %c0_i32_0 = arith.constant 0 : i32
    %c0_i32_1 = arith.constant 0 : i32
    return %c0_i32, %c0_i32_0 : i32, i32
  }
  func.func @transform_21(%arg0: i32) -> (i32, i32) {
    %c0_i32 = arith.constant 0 : i32
    %c0_i32_0 = arith.constant 0 : i32
    %c0_i32_1 = arith.constant 0 : i32
    return %c0_i32, %c0_i32_0 : i32, i32
  }
  func.func @transform_22(%arg0: i32) -> (i32, i32, i32) {
    %c0_i32 = arith.constant 0 : i32
    %c0_i32_0 = arith.constant 0 : i32
    %c0_i32_1 = arith.constant 0 : i32
    return %arg0, %c0_i32, %c0_i32_0 : i32, i32, i32
  }
}

module attributes {stable_mosaic.version = 11 : i64} {
  func.func @_decoder_block_kernel(%arg0: i32, %arg1: memref<1x8x32xf32, #tpu.memory_space<vmem>>, %arg2: memref<1x16x32xf32, #tpu.memory_space<vmem>>, %arg3: memref<1x8x16xf32, #tpu.memory_space<vmem>>, %arg4: memref<1x8x8xf32, #tpu.memory_space<vmem>>, %arg5: memref<1x1xf32, #tpu.memory_space<vmem>>, %arg6: memref<1x1xf32, #tpu.memory_space<vmem>>, %arg7: memref<32x32xbf16, #tpu.memory_space<vmem>>, %arg8: memref<32x32xbf16, #tpu.memory_space<vmem>>, %arg9: memref<32x32xbf16, #tpu.memory_space<vmem>>, %arg10: memref<32x32xbf16, #tpu.memory_space<vmem>>, %arg11: memref<1x1xf32, #tpu.memory_space<vmem>>, %arg12: memref<1x1xf32, #tpu.memory_space<vmem>>, %arg13: memref<32x32xbf16, #tpu.memory_space<vmem>>, %arg14: memref<32x32xbf16, #tpu.memory_space<vmem>>, %arg15: memref<32x32xbf16, #tpu.memory_space<vmem>>, %arg16: memref<32x32xbf16, #tpu.memory_space<vmem>>, %arg17: memref<1x1xf32, #tpu.memory_space<vmem>>, %arg18: memref<1x1xf32, #tpu.memory_space<vmem>>, %arg19: memref<32x64xbf16, #tpu.memory_space<vmem>>, %arg20: memref<1x64xf32, #tpu.memory_space<vmem>>, %arg21: memref<64x32xbf16, #tpu.memory_space<vmem>>, %arg22: memref<1x32xf32, #tpu.memory_space<vmem>>, %arg23: memref<1x8x32xf32, #tpu.memory_space<vmem>>) attributes {dimension_semantics = [#tpu.dimension_semantics<parallel>], iteration_bounds = array<i64: 2>, scalar_prefetch = 0 : i64, scratch_operands = 0 : i64, tpu.core_type = #tpu.core_type<tc>, window_params = [{transform_indices = @transform_0, window_bounds = array<i64: 1, 8, 32>}, {transform_indices = @transform_1, window_bounds = array<i64: 1, 16, 32>}, {transform_indices = @transform_2, window_bounds = array<i64: 1, 8, 16>}, {transform_indices = @transform_3, window_bounds = array<i64: 1, 8, 8>}, {pipeline_mode = #tpu.pipeline_mode<synchronous>, transform_indices = @transform_4, window_bounds = array<i64: 1, 1>}, {pipeline_mode = #tpu.pipeline_mode<synchronous>, transform_indices = @transform_5, window_bounds = array<i64: 1, 1>}, {pipeline_mode = #tpu.pipeline_mode<synchronous>, transform_indices = @transform_6, window_bounds = array<i64: 32, 32>}, {pipeline_mode = #tpu.pipeline_mode<synchronous>, transform_indices = @transform_7, window_bounds = array<i64: 32, 32>}, {pipeline_mode = #tpu.pipeline_mode<synchronous>, transform_indices = @transform_8, window_bounds = array<i64: 32, 32>}, {pipeline_mode = #tpu.pipeline_mode<synchronous>, transform_indices = @transform_9, window_bounds = array<i64: 32, 32>}, {pipeline_mode = #tpu.pipeline_mode<synchronous>, transform_indices = @transform_10, window_bounds = array<i64: 1, 1>}, {pipeline_mode = #tpu.pipeline_mode<synchronous>, transform_indices = @transform_11, window_bounds = array<i64: 1, 1>}, {pipeline_mode = #tpu.pipeline_mode<synchronous>, transform_indices = @transform_12, window_bounds = array<i64: 32, 32>}, {pipeline_mode = #tpu.pipeline_mode<synchronous>, transform_indices = @transform_13, window_bounds = array<i64: 32, 32>}, {pipeline_mode = #tpu.pipeline_mode<synchronous>, transform_indices = @transform_14, window_bounds = array<i64: 32, 32>}, {pipeline_mode = #tpu.pipeline_mode<synchronous>, transform_indices = @transform_15, window_bounds = array<i64: 32, 32>}, {pipeline_mode = #tpu.pipeline_mode<synchronous>, transform_indices = @transform_16, window_bounds = array<i64: 1, 1>}, {pipeline_mode = #tpu.pipeline_mode<synchronous>, transform_indices = @transform_17, window_bounds = array<i64: 1, 1>}, {pipeline_mode = #tpu.pipeline_mode<synchronous>, transform_indices = @transform_18, window_bounds = array<i64: 32, 64>}, {pipeline_mode = #tpu.pipeline_mode<synchronous>, transform_indices = @transform_19, window_bounds = array<i64: 1, 64>}, {pipeline_mode = #tpu.pipeline_mode<synchronous>, transform_indices = @transform_20, window_bounds = array<i64: 64, 32>}, {pipeline_mode = #tpu.pipeline_mode<synchronous>, transform_indices = @transform_21, window_bounds = array<i64: 1, 32>}, {transform_indices = @transform_22, window_bounds = array<i64: 1, 8, 32>}]} {
    %c0 = arith.constant 0 : index
    %c0_0 = arith.constant 0 : index
    %c0_1 = arith.constant 0 : index
    %0 = vector.load %arg1[%c0, %c0_0, %c0_1] : memref<1x8x32xf32, #tpu.memory_space<vmem>>, vector<1x8x32xf32>
    %1 = vector.shape_cast %0 : vector<1x8x32xf32> to vector<8x32xf32>
    %c0_2 = arith.constant 0 : index
    %c0_3 = arith.constant 0 : index
    %c0_4 = arith.constant 0 : index
    %2 = vector.load %arg2[%c0_2, %c0_3, %c0_4] : memref<1x16x32xf32, #tpu.memory_space<vmem>>, vector<1x16x32xf32>
    %3 = vector.shape_cast %2 : vector<1x16x32xf32> to vector<16x32xf32>
    %c0_5 = arith.constant 0 : index
    %c0_6 = arith.constant 0 : index
    %4 = vector.load %arg5[%c0_5, %c0_6] : memref<1x1xf32, #tpu.memory_space<vmem>>, vector<1x1xf32>
    %5 = vector.extract %4[0, 0] : f32 from vector<1x1xf32>
    %c0_7 = arith.constant 0 : index
    %c0_8 = arith.constant 0 : index
    %6 = vector.load %arg6[%c0_7, %c0_8] : memref<1x1xf32, #tpu.memory_space<vmem>>, vector<1x1xf32>
    %7 = vector.extract %6[0, 0] : f32 from vector<1x1xf32>
    %cst = arith.constant dense<0.000000e+00> : vector<8xf32>
    %8 = vector.multi_reduction <add>, %1, %cst [1] : vector<8x32xf32> to vector<8xf32>
    %9 = vector.shape_cast %8 : vector<8xf32> to vector<8x1xf32>
    %cst_9 = arith.constant 3.200000e+01 : f32
    %10 = vector.broadcast %cst_9 : f32 to vector<8x1xf32>
    %11 = arith.divf %9, %10 : vector<8x1xf32>
    %12 = vector.broadcast %11 : vector<8x1xf32> to vector<8x32xf32>
    %13 = arith.subf %1, %12 : vector<8x32xf32>
    %14 = arith.mulf %13, %13 : vector<8x32xf32>
    %cst_10 = arith.constant dense<0.000000e+00> : vector<8xf32>
    %15 = vector.multi_reduction <add>, %14, %cst_10 [1] : vector<8x32xf32> to vector<8xf32>
    %16 = vector.shape_cast %15 : vector<8xf32> to vector<8x1xf32>
    %cst_11 = arith.constant 0.0322580636 : f32
    %17 = vector.broadcast %cst_11 : f32 to vector<8x1xf32>
    %18 = arith.mulf %16, %17 : vector<8x1xf32>
    %19 = math.sqrt %18 : vector<8x1xf32>
    %cst_12 = arith.constant 9.99999997E-7 : f32
    %20 = vector.broadcast %cst_12 : f32 to vector<8x1xf32>
    %21 = arith.addf %19, %20 : vector<8x1xf32>
    %22 = tpu.reciprocal %21 {approx = true} : vector<8x1xf32> -> vector<8x1xf32>
    %23 = vector.broadcast %11 : vector<8x1xf32> to vector<8x32xf32>
    %24 = arith.subf %1, %23 : vector<8x32xf32>
    %25 = vector.broadcast %5 : f32 to vector<8x32xf32>
    %26 = arith.mulf %25, %24 : vector<8x32xf32>
    %27 = vector.broadcast %22 : vector<8x1xf32> to vector<8x32xf32>
    %28 = arith.mulf %26, %27 : vector<8x32xf32>
    %29 = vector.broadcast %7 : f32 to vector<8x32xf32>
    %30 = arith.addf %28, %29 : vector<8x32xf32>
    %c0_13 = arith.constant 0 : index
    %c0_14 = arith.constant 0 : index
    %c0_15 = arith.constant 0 : index
    %31 = vector.load %arg4[%c0_13, %c0_14, %c0_15] : memref<1x8x8xf32, #tpu.memory_space<vmem>>, vector<1x8x8xf32>
    %32 = vector.shape_cast %31 : vector<1x8x8xf32> to vector<8x8xf32>
    %c0_16 = arith.constant 0 : index
    %c0_17 = arith.constant 0 : index
    %33 = vector.load %arg7[%c0_16, %c0_17] : memref<32x32xbf16, #tpu.memory_space<vmem>>, vector<32x32xbf16>
    %c0_18 = arith.constant 0 : index
    %c0_19 = arith.constant 0 : index
    %34 = vector.load %arg8[%c0_18, %c0_19] : memref<32x32xbf16, #tpu.memory_space<vmem>>, vector<32x32xbf16>
    %c0_20 = arith.constant 0 : index
    %c0_21 = arith.constant 0 : index
    %35 = vector.load %arg9[%c0_20, %c0_21] : memref<32x32xbf16, #tpu.memory_space<vmem>>, vector<32x32xbf16>
    %c0_22 = arith.constant 0 : index
    %c0_23 = arith.constant 0 : index
    %36 = vector.load %arg10[%c0_22, %c0_23] : memref<32x32xbf16, #tpu.memory_space<vmem>>, vector<32x32xbf16>
    %37 = arith.truncf %30 : vector<8x32xf32> to vector<8x32xbf16>
    %38 = arith.truncf %30 : vector<8x32xf32> to vector<8x32xbf16>
    %cst_24 = arith.constant dense<0.000000e+00> : vector<8x32xf32>
    %39 = tpu.matmul %37, %33, %cst_24 {dimension_numbers = #tpu.dot_dimension_numbers<[1], [0], [0], [1], [0, 0, 1, 1], [], []>} : vector<8x32xbf16>, vector<32x32xbf16>, vector<8x32xf32> -> vector<8x32xf32>
    %cst_25 = arith.constant dense<0.000000e+00> : vector<8x32xf32>
    %40 = tpu.matmul %38, %34, %cst_25 {dimension_numbers = #tpu.dot_dimension_numbers<[1], [0], [0], [1], [0, 0, 1, 1], [], []>} : vector<8x32xbf16>, vector<32x32xbf16>, vector<8x32xf32> -> vector<8x32xf32>
    %cst_26 = arith.constant dense<0.000000e+00> : vector<8x32xf32>
    %41 = tpu.matmul %38, %35, %cst_26 {dimension_numbers = #tpu.dot_dimension_numbers<[1], [0], [0], [1], [0, 0, 1, 1], [], []>} : vector<8x32xbf16>, vector<32x32xbf16>, vector<8x32xf32> -> vector<8x32xf32>
    %cst_27 = arith.constant 0.000000e+00 : f32
    %42 = vector.broadcast %cst_27 : f32 to vector<8x8xf32>
    %43 = arith.cmpf one, %32, %42 : vector<8x8xf32>
    %44 = vector.extract_strided_slice %39 {offsets = [0, 0], sizes = [8, 8], strides = [1, 1]} : vector<8x32xf32> to vector<8x8xf32>
    %45 = arith.truncf %44 : vector<8x8xf32> to vector<8x8xbf16>
    %46 = vector.extract_strided_slice %40 {offsets = [0, 0], sizes = [8, 8], strides = [1, 1]} : vector<8x32xf32> to vector<8x8xf32>
    %47 = arith.truncf %46 : vector<8x8xf32> to vector<8x8xbf16>
    %48 = vector.extract_strided_slice %41 {offsets = [0, 0], sizes = [8, 8], strides = [1, 1]} : vector<8x32xf32> to vector<8x8xf32>
    %49 = arith.truncf %48 : vector<8x8xf32> to vector<8x8xbf16>
    %cst_28 = arith.constant dense<0.000000e+00> : vector<8x8xf32>
    %50 = tpu.matmul %45, %47, %cst_28 {dimension_numbers = #tpu.dot_dimension_numbers<[1], [1], [0], [0], [0, 0, 1, 0], [], []>} : vector<8x8xbf16>, vector<8x8xbf16>, vector<8x8xf32> -> vector<8x8xf32>
    %cst_29 = arith.constant 0.353553385 : f32
    %51 = vector.broadcast %cst_29 : f32 to vector<8x8xf32>
    %52 = arith.mulf %50, %51 : vector<8x8xf32>
    %cst_30 = arith.constant -1.000000e+09 : f32
    %53 = vector.broadcast %cst_30 : f32 to vector<8x8xf32>
    %54 = arith.select %43, %52, %53 : vector<8x8xi1>, vector<8x8xf32>
    %cst_31 = arith.constant dense<0xFF800000> : vector<8xf32>
    %55 = vector.multi_reduction <maximumf>, %54, %cst_31 [1] : vector<8x8xf32> to vector<8xf32>
    %56 = vector.shape_cast %55 : vector<8xf32> to vector<8x1xf32>
    %57 = vector.broadcast %56 : vector<8x1xf32> to vector<8x8xf32>
    %58 = arith.subf %54, %57 : vector<8x8xf32>
    %59 = math.exp %58 : vector<8x8xf32>
    %cst_32 = arith.constant dense<0.000000e+00> : vector<8xf32>
    %60 = vector.multi_reduction <add>, %59, %cst_32 [1] : vector<8x8xf32> to vector<8xf32>
    %61 = vector.shape_cast %60 : vector<8xf32> to vector<8x1xf32>
    %62 = tpu.reciprocal %61 {approx = true} : vector<8x1xf32> -> vector<8x1xf32>
    %63 = vector.broadcast %62 : vector<8x1xf32> to vector<8x8xf32>
    %64 = arith.mulf %59, %63 : vector<8x8xf32>
    %65 = arith.truncf %64 : vector<8x8xf32> to vector<8x8xbf16>
    %cst_33 = arith.constant dense<0.000000e+00> : vector<8x8xf32>
    %66 = tpu.matmul %65, %49, %cst_33 {dimension_numbers = #tpu.dot_dimension_numbers<[1], [0], [0], [1], [0, 0, 1, 1], [], []>} : vector<8x8xbf16>, vector<8x8xbf16>, vector<8x8xf32> -> vector<8x8xf32>
    %67 = arith.truncf %66 : vector<8x8xf32> to vector<8x8xbf16>
    %68 = vector.extract_strided_slice %36 {offsets = [0, 0], sizes = [8, 32], strides = [1, 1]} : vector<32x32xbf16> to vector<8x32xbf16>
    %cst_34 = arith.constant dense<0.000000e+00> : vector<8x32xf32>
    %69 = tpu.matmul %67, %68, %cst_34 {dimension_numbers = #tpu.dot_dimension_numbers<[1], [0], [0], [1], [0, 0, 1, 1], [], []>} : vector<8x8xbf16>, vector<8x32xbf16>, vector<8x32xf32> -> vector<8x32xf32>
    %70 = arith.addf %1, %69 : vector<8x32xf32>
    %71 = vector.extract_strided_slice %39 {offsets = [0, 8], sizes = [8, 8], strides = [1, 1]} : vector<8x32xf32> to vector<8x8xf32>
    %72 = arith.truncf %71 : vector<8x8xf32> to vector<8x8xbf16>
    %73 = vector.extract_strided_slice %40 {offsets = [0, 8], sizes = [8, 8], strides = [1, 1]} : vector<8x32xf32> to vector<8x8xf32>
    %74 = arith.truncf %73 : vector<8x8xf32> to vector<8x8xbf16>
    %75 = vector.extract_strided_slice %41 {offsets = [0, 8], sizes = [8, 8], strides = [1, 1]} : vector<8x32xf32> to vector<8x8xf32>
    %76 = arith.truncf %75 : vector<8x8xf32> to vector<8x8xbf16>
    %cst_35 = arith.constant dense<0.000000e+00> : vector<8x8xf32>
    %77 = tpu.matmul %72, %74, %cst_35 {dimension_numbers = #tpu.dot_dimension_numbers<[1], [1], [0], [0], [0, 0, 1, 0], [], []>} : vector<8x8xbf16>, vector<8x8xbf16>, vector<8x8xf32> -> vector<8x8xf32>
    %cst_36 = arith.constant 0.353553385 : f32
    %78 = vector.broadcast %cst_36 : f32 to vector<8x8xf32>
    %79 = arith.mulf %77, %78 : vector<8x8xf32>
    %cst_37 = arith.constant -1.000000e+09 : f32
    %80 = vector.broadcast %cst_37 : f32 to vector<8x8xf32>
    %81 = arith.select %43, %79, %80 : vector<8x8xi1>, vector<8x8xf32>
    %cst_38 = arith.constant dense<0xFF800000> : vector<8xf32>
    %82 = vector.multi_reduction <maximumf>, %81, %cst_38 [1] : vector<8x8xf32> to vector<8xf32>
    %83 = vector.shape_cast %82 : vector<8xf32> to vector<8x1xf32>
    %84 = vector.broadcast %83 : vector<8x1xf32> to vector<8x8xf32>
    %85 = arith.subf %81, %84 : vector<8x8xf32>
    %86 = math.exp %85 : vector<8x8xf32>
    %cst_39 = arith.constant dense<0.000000e+00> : vector<8xf32>
    %87 = vector.multi_reduction <add>, %86, %cst_39 [1] : vector<8x8xf32> to vector<8xf32>
    %88 = vector.shape_cast %87 : vector<8xf32> to vector<8x1xf32>
    %89 = tpu.reciprocal %88 {approx = true} : vector<8x1xf32> -> vector<8x1xf32>
    %90 = vector.broadcast %89 : vector<8x1xf32> to vector<8x8xf32>
    %91 = arith.mulf %86, %90 : vector<8x8xf32>
    %92 = arith.truncf %91 : vector<8x8xf32> to vector<8x8xbf16>
    %cst_40 = arith.constant dense<0.000000e+00> : vector<8x8xf32>
    %93 = tpu.matmul %92, %76, %cst_40 {dimension_numbers = #tpu.dot_dimension_numbers<[1], [0], [0], [1], [0, 0, 1, 1], [], []>} : vector<8x8xbf16>, vector<8x8xbf16>, vector<8x8xf32> -> vector<8x8xf32>
    %94 = arith.truncf %93 : vector<8x8xf32> to vector<8x8xbf16>
    %95 = vector.extract_strided_slice %36 {offsets = [8, 0], sizes = [8, 32], strides = [1, 1]} : vector<32x32xbf16> to vector<8x32xbf16>
    %cst_41 = arith.constant dense<0.000000e+00> : vector<8x32xf32>
    %96 = tpu.matmul %94, %95, %cst_41 {dimension_numbers = #tpu.dot_dimension_numbers<[1], [0], [0], [1], [0, 0, 1, 1], [], []>} : vector<8x8xbf16>, vector<8x32xbf16>, vector<8x32xf32> -> vector<8x32xf32>
    %97 = arith.addf %70, %96 : vector<8x32xf32>
    %98 = vector.extract_strided_slice %39 {offsets = [0, 16], sizes = [8, 8], strides = [1, 1]} : vector<8x32xf32> to vector<8x8xf32>
    %99 = arith.truncf %98 : vector<8x8xf32> to vector<8x8xbf16>
    %100 = vector.extract_strided_slice %40 {offsets = [0, 16], sizes = [8, 8], strides = [1, 1]} : vector<8x32xf32> to vector<8x8xf32>
    %101 = arith.truncf %100 : vector<8x8xf32> to vector<8x8xbf16>
    %102 = vector.extract_strided_slice %41 {offsets = [0, 16], sizes = [8, 8], strides = [1, 1]} : vector<8x32xf32> to vector<8x8xf32>
    %103 = arith.truncf %102 : vector<8x8xf32> to vector<8x8xbf16>
    %cst_42 = arith.constant dense<0.000000e+00> : vector<8x8xf32>
    %104 = tpu.matmul %99, %101, %cst_42 {dimension_numbers = #tpu.dot_dimension_numbers<[1], [1], [0], [0], [0, 0, 1, 0], [], []>} : vector<8x8xbf16>, vector<8x8xbf16>, vector<8x8xf32> -> vector<8x8xf32>
    %cst_43 = arith.constant 0.353553385 : f32
    %105 = vector.broadcast %cst_43 : f32 to vector<8x8xf32>
    %106 = arith.mulf %104, %105 : vector<8x8xf32>
    %cst_44 = arith.constant -1.000000e+09 : f32
    %107 = vector.broadcast %cst_44 : f32 to vector<8x8xf32>
    %108 = arith.select %43, %106, %107 : vector<8x8xi1>, vector<8x8xf32>
    %cst_45 = arith.constant dense<0xFF800000> : vector<8xf32>
    %109 = vector.multi_reduction <maximumf>, %108, %cst_45 [1] : vector<8x8xf32> to vector<8xf32>
    %110 = vector.shape_cast %109 : vector<8xf32> to vector<8x1xf32>
    %111 = vector.broadcast %110 : vector<8x1xf32> to vector<8x8xf32>
    %112 = arith.subf %108, %111 : vector<8x8xf32>
    %113 = math.exp %112 : vector<8x8xf32>
    %cst_46 = arith.constant dense<0.000000e+00> : vector<8xf32>
    %114 = vector.multi_reduction <add>, %113, %cst_46 [1] : vector<8x8xf32> to vector<8xf32>
    %115 = vector.shape_cast %114 : vector<8xf32> to vector<8x1xf32>
    %116 = tpu.reciprocal %115 {approx = true} : vector<8x1xf32> -> vector<8x1xf32>
    %117 = vector.broadcast %116 : vector<8x1xf32> to vector<8x8xf32>
    %118 = arith.mulf %113, %117 : vector<8x8xf32>
    %119 = arith.truncf %118 : vector<8x8xf32> to vector<8x8xbf16>
    %cst_47 = arith.constant dense<0.000000e+00> : vector<8x8xf32>
    %120 = tpu.matmul %119, %103, %cst_47 {dimension_numbers = #tpu.dot_dimension_numbers<[1], [0], [0], [1], [0, 0, 1, 1], [], []>} : vector<8x8xbf16>, vector<8x8xbf16>, vector<8x8xf32> -> vector<8x8xf32>
    %121 = arith.truncf %120 : vector<8x8xf32> to vector<8x8xbf16>
    %122 = vector.extract_strided_slice %36 {offsets = [16, 0], sizes = [8, 32], strides = [1, 1]} : vector<32x32xbf16> to vector<8x32xbf16>
    %cst_48 = arith.constant dense<0.000000e+00> : vector<8x32xf32>
    %123 = tpu.matmul %121, %122, %cst_48 {dimension_numbers = #tpu.dot_dimension_numbers<[1], [0], [0], [1], [0, 0, 1, 1], [], []>} : vector<8x8xbf16>, vector<8x32xbf16>, vector<8x32xf32> -> vector<8x32xf32>
    %124 = arith.addf %97, %123 : vector<8x32xf32>
    %125 = vector.extract_strided_slice %39 {offsets = [0, 24], sizes = [8, 8], strides = [1, 1]} : vector<8x32xf32> to vector<8x8xf32>
    %126 = arith.truncf %125 : vector<8x8xf32> to vector<8x8xbf16>
    %127 = vector.extract_strided_slice %40 {offsets = [0, 24], sizes = [8, 8], strides = [1, 1]} : vector<8x32xf32> to vector<8x8xf32>
    %128 = arith.truncf %127 : vector<8x8xf32> to vector<8x8xbf16>
    %129 = vector.extract_strided_slice %41 {offsets = [0, 24], sizes = [8, 8], strides = [1, 1]} : vector<8x32xf32> to vector<8x8xf32>
    %130 = arith.truncf %129 : vector<8x8xf32> to vector<8x8xbf16>
    %cst_49 = arith.constant dense<0.000000e+00> : vector<8x8xf32>
    %131 = tpu.matmul %126, %128, %cst_49 {dimension_numbers = #tpu.dot_dimension_numbers<[1], [1], [0], [0], [0, 0, 1, 0], [], []>} : vector<8x8xbf16>, vector<8x8xbf16>, vector<8x8xf32> -> vector<8x8xf32>
    %cst_50 = arith.constant 0.353553385 : f32
    %132 = vector.broadcast %cst_50 : f32 to vector<8x8xf32>
    %133 = arith.mulf %131, %132 : vector<8x8xf32>
    %cst_51 = arith.constant -1.000000e+09 : f32
    %134 = vector.broadcast %cst_51 : f32 to vector<8x8xf32>
    %135 = arith.select %43, %133, %134 : vector<8x8xi1>, vector<8x8xf32>
    %cst_52 = arith.constant dense<0xFF800000> : vector<8xf32>
    %136 = vector.multi_reduction <maximumf>, %135, %cst_52 [1] : vector<8x8xf32> to vector<8xf32>
    %137 = vector.shape_cast %136 : vector<8xf32> to vector<8x1xf32>
    %138 = vector.broadcast %137 : vector<8x1xf32> to vector<8x8xf32>
    %139 = arith.subf %135, %138 : vector<8x8xf32>
    %140 = math.exp %139 : vector<8x8xf32>
    %cst_53 = arith.constant dense<0.000000e+00> : vector<8xf32>
    %141 = vector.multi_reduction <add>, %140, %cst_53 [1] : vector<8x8xf32> to vector<8xf32>
    %142 = vector.shape_cast %141 : vector<8xf32> to vector<8x1xf32>
    %143 = tpu.reciprocal %142 {approx = true} : vector<8x1xf32> -> vector<8x1xf32>
    %144 = vector.broadcast %143 : vector<8x1xf32> to vector<8x8xf32>
    %145 = arith.mulf %140, %144 : vector<8x8xf32>
    %146 = arith.truncf %145 : vector<8x8xf32> to vector<8x8xbf16>
    %cst_54 = arith.constant dense<0.000000e+00> : vector<8x8xf32>
    %147 = tpu.matmul %146, %130, %cst_54 {dimension_numbers = #tpu.dot_dimension_numbers<[1], [0], [0], [1], [0, 0, 1, 1], [], []>} : vector<8x8xbf16>, vector<8x8xbf16>, vector<8x8xf32> -> vector<8x8xf32>
    %148 = arith.truncf %147 : vector<8x8xf32> to vector<8x8xbf16>
    %149 = vector.extract_strided_slice %36 {offsets = [24, 0], sizes = [8, 32], strides = [1, 1]} : vector<32x32xbf16> to vector<8x32xbf16>
    %cst_55 = arith.constant dense<0.000000e+00> : vector<8x32xf32>
    %150 = tpu.matmul %148, %149, %cst_55 {dimension_numbers = #tpu.dot_dimension_numbers<[1], [0], [0], [1], [0, 0, 1, 1], [], []>} : vector<8x8xbf16>, vector<8x32xbf16>, vector<8x32xf32> -> vector<8x32xf32>
    %151 = arith.addf %124, %150 : vector<8x32xf32>
    %c0_56 = arith.constant 0 : index
    %c0_57 = arith.constant 0 : index
    %152 = vector.load %arg11[%c0_56, %c0_57] : memref<1x1xf32, #tpu.memory_space<vmem>>, vector<1x1xf32>
    %153 = vector.extract %152[0, 0] : f32 from vector<1x1xf32>
    %c0_58 = arith.constant 0 : index
    %c0_59 = arith.constant 0 : index
    %154 = vector.load %arg12[%c0_58, %c0_59] : memref<1x1xf32, #tpu.memory_space<vmem>>, vector<1x1xf32>
    %155 = vector.extract %154[0, 0] : f32 from vector<1x1xf32>
    %cst_60 = arith.constant dense<0.000000e+00> : vector<8xf32>
    %156 = vector.multi_reduction <add>, %151, %cst_60 [1] : vector<8x32xf32> to vector<8xf32>
    %157 = vector.shape_cast %156 : vector<8xf32> to vector<8x1xf32>
    %cst_61 = arith.constant 3.200000e+01 : f32
    %158 = vector.broadcast %cst_61 : f32 to vector<8x1xf32>
    %159 = arith.divf %157, %158 : vector<8x1xf32>
    %160 = vector.broadcast %159 : vector<8x1xf32> to vector<8x32xf32>
    %161 = arith.subf %151, %160 : vector<8x32xf32>
    %162 = arith.mulf %161, %161 : vector<8x32xf32>
    %cst_62 = arith.constant dense<0.000000e+00> : vector<8xf32>
    %163 = vector.multi_reduction <add>, %162, %cst_62 [1] : vector<8x32xf32> to vector<8xf32>
    %164 = vector.shape_cast %163 : vector<8xf32> to vector<8x1xf32>
    %cst_63 = arith.constant 0.0322580636 : f32
    %165 = vector.broadcast %cst_63 : f32 to vector<8x1xf32>
    %166 = arith.mulf %164, %165 : vector<8x1xf32>
    %167 = math.sqrt %166 : vector<8x1xf32>
    %cst_64 = arith.constant 9.99999997E-7 : f32
    %168 = vector.broadcast %cst_64 : f32 to vector<8x1xf32>
    %169 = arith.addf %167, %168 : vector<8x1xf32>
    %170 = tpu.reciprocal %169 {approx = true} : vector<8x1xf32> -> vector<8x1xf32>
    %171 = vector.broadcast %159 : vector<8x1xf32> to vector<8x32xf32>
    %172 = arith.subf %151, %171 : vector<8x32xf32>
    %173 = vector.broadcast %153 : f32 to vector<8x32xf32>
    %174 = arith.mulf %173, %172 : vector<8x32xf32>
    %175 = vector.broadcast %170 : vector<8x1xf32> to vector<8x32xf32>
    %176 = arith.mulf %174, %175 : vector<8x32xf32>
    %177 = vector.broadcast %155 : f32 to vector<8x32xf32>
    %178 = arith.addf %176, %177 : vector<8x32xf32>
    %c0_65 = arith.constant 0 : index
    %c0_66 = arith.constant 0 : index
    %c0_67 = arith.constant 0 : index
    %179 = vector.load %arg3[%c0_65, %c0_66, %c0_67] : memref<1x8x16xf32, #tpu.memory_space<vmem>>, vector<1x8x16xf32>
    %180 = vector.shape_cast %179 : vector<1x8x16xf32> to vector<8x16xf32>
    %c0_68 = arith.constant 0 : index
    %c0_69 = arith.constant 0 : index
    %181 = vector.load %arg13[%c0_68, %c0_69] : memref<32x32xbf16, #tpu.memory_space<vmem>>, vector<32x32xbf16>
    %c0_70 = arith.constant 0 : index
    %c0_71 = arith.constant 0 : index
    %182 = vector.load %arg14[%c0_70, %c0_71] : memref<32x32xbf16, #tpu.memory_space<vmem>>, vector<32x32xbf16>
    %c0_72 = arith.constant 0 : index
    %c0_73 = arith.constant 0 : index
    %183 = vector.load %arg15[%c0_72, %c0_73] : memref<32x32xbf16, #tpu.memory_space<vmem>>, vector<32x32xbf16>
    %c0_74 = arith.constant 0 : index
    %c0_75 = arith.constant 0 : index
    %184 = vector.load %arg16[%c0_74, %c0_75] : memref<32x32xbf16, #tpu.memory_space<vmem>>, vector<32x32xbf16>
    %185 = arith.truncf %178 : vector<8x32xf32> to vector<8x32xbf16>
    %186 = arith.truncf %3 : vector<16x32xf32> to vector<16x32xbf16>
    %cst_76 = arith.constant dense<0.000000e+00> : vector<8x32xf32>
    %187 = tpu.matmul %185, %181, %cst_76 {dimension_numbers = #tpu.dot_dimension_numbers<[1], [0], [0], [1], [0, 0, 1, 1], [], []>} : vector<8x32xbf16>, vector<32x32xbf16>, vector<8x32xf32> -> vector<8x32xf32>
    %cst_77 = arith.constant dense<0.000000e+00> : vector<16x32xf32>
    %188 = tpu.matmul %186, %182, %cst_77 {dimension_numbers = #tpu.dot_dimension_numbers<[1], [0], [0], [1], [0, 0, 1, 1], [], []>} : vector<16x32xbf16>, vector<32x32xbf16>, vector<16x32xf32> -> vector<16x32xf32>
    %cst_78 = arith.constant dense<0.000000e+00> : vector<16x32xf32>
    %189 = tpu.matmul %186, %183, %cst_78 {dimension_numbers = #tpu.dot_dimension_numbers<[1], [0], [0], [1], [0, 0, 1, 1], [], []>} : vector<16x32xbf16>, vector<32x32xbf16>, vector<16x32xf32> -> vector<16x32xf32>
    %cst_79 = arith.constant 0.000000e+00 : f32
    %190 = vector.broadcast %cst_79 : f32 to vector<8x16xf32>
    %191 = arith.cmpf one, %180, %190 : vector<8x16xf32>
    %192 = vector.extract_strided_slice %187 {offsets = [0, 0], sizes = [8, 8], strides = [1, 1]} : vector<8x32xf32> to vector<8x8xf32>
    %193 = arith.truncf %192 : vector<8x8xf32> to vector<8x8xbf16>
    %194 = vector.extract_strided_slice %188 {offsets = [0, 0], sizes = [16, 8], strides = [1, 1]} : vector<16x32xf32> to vector<16x8xf32>
    %195 = arith.truncf %194 : vector<16x8xf32> to vector<16x8xbf16>
    %196 = vector.extract_strided_slice %189 {offsets = [0, 0], sizes = [16, 8], strides = [1, 1]} : vector<16x32xf32> to vector<16x8xf32>
    %197 = arith.truncf %196 : vector<16x8xf32> to vector<16x8xbf16>
    %cst_80 = arith.constant dense<0.000000e+00> : vector<8x16xf32>
    %198 = tpu.matmul %193, %195, %cst_80 {dimension_numbers = #tpu.dot_dimension_numbers<[1], [1], [0], [0], [0, 0, 1, 0], [], []>} : vector<8x8xbf16>, vector<16x8xbf16>, vector<8x16xf32> -> vector<8x16xf32>
    %cst_81 = arith.constant 0.353553385 : f32
    %199 = vector.broadcast %cst_81 : f32 to vector<8x16xf32>
    %200 = arith.mulf %198, %199 : vector<8x16xf32>
    %cst_82 = arith.constant -1.000000e+09 : f32
    %201 = vector.broadcast %cst_82 : f32 to vector<8x16xf32>
    %202 = arith.select %191, %200, %201 : vector<8x16xi1>, vector<8x16xf32>
    %cst_83 = arith.constant dense<0xFF800000> : vector<8xf32>
    %203 = vector.multi_reduction <maximumf>, %202, %cst_83 [1] : vector<8x16xf32> to vector<8xf32>
    %204 = vector.shape_cast %203 : vector<8xf32> to vector<8x1xf32>
    %205 = vector.broadcast %204 : vector<8x1xf32> to vector<8x16xf32>
    %206 = arith.subf %202, %205 : vector<8x16xf32>
    %207 = math.exp %206 : vector<8x16xf32>
    %cst_84 = arith.constant dense<0.000000e+00> : vector<8xf32>
    %208 = vector.multi_reduction <add>, %207, %cst_84 [1] : vector<8x16xf32> to vector<8xf32>
    %209 = vector.shape_cast %208 : vector<8xf32> to vector<8x1xf32>
    %210 = tpu.reciprocal %209 {approx = true} : vector<8x1xf32> -> vector<8x1xf32>
    %211 = vector.broadcast %210 : vector<8x1xf32> to vector<8x16xf32>
    %212 = arith.mulf %207, %211 : vector<8x16xf32>
    %213 = arith.truncf %212 : vector<8x16xf32> to vector<8x16xbf16>
    %cst_85 = arith.constant dense<0.000000e+00> : vector<8x8xf32>
    %214 = tpu.matmul %213, %197, %cst_85 {dimension_numbers = #tpu.dot_dimension_numbers<[1], [0], [0], [1], [0, 0, 1, 1], [], []>} : vector<8x16xbf16>, vector<16x8xbf16>, vector<8x8xf32> -> vector<8x8xf32>
    %215 = arith.truncf %214 : vector<8x8xf32> to vector<8x8xbf16>
    %216 = vector.extract_strided_slice %184 {offsets = [0, 0], sizes = [8, 32], strides = [1, 1]} : vector<32x32xbf16> to vector<8x32xbf16>
    %cst_86 = arith.constant dense<0.000000e+00> : vector<8x32xf32>
    %217 = tpu.matmul %215, %216, %cst_86 {dimension_numbers = #tpu.dot_dimension_numbers<[1], [0], [0], [1], [0, 0, 1, 1], [], []>} : vector<8x8xbf16>, vector<8x32xbf16>, vector<8x32xf32> -> vector<8x32xf32>
    %218 = arith.addf %151, %217 : vector<8x32xf32>
    %219 = vector.extract_strided_slice %187 {offsets = [0, 8], sizes = [8, 8], strides = [1, 1]} : vector<8x32xf32> to vector<8x8xf32>
    %220 = arith.truncf %219 : vector<8x8xf32> to vector<8x8xbf16>
    %221 = vector.extract_strided_slice %188 {offsets = [0, 8], sizes = [16, 8], strides = [1, 1]} : vector<16x32xf32> to vector<16x8xf32>
    %222 = arith.truncf %221 : vector<16x8xf32> to vector<16x8xbf16>
    %223 = vector.extract_strided_slice %189 {offsets = [0, 8], sizes = [16, 8], strides = [1, 1]} : vector<16x32xf32> to vector<16x8xf32>
    %224 = arith.truncf %223 : vector<16x8xf32> to vector<16x8xbf16>
    %cst_87 = arith.constant dense<0.000000e+00> : vector<8x16xf32>
    %225 = tpu.matmul %220, %222, %cst_87 {dimension_numbers = #tpu.dot_dimension_numbers<[1], [1], [0], [0], [0, 0, 1, 0], [], []>} : vector<8x8xbf16>, vector<16x8xbf16>, vector<8x16xf32> -> vector<8x16xf32>
    %cst_88 = arith.constant 0.353553385 : f32
    %226 = vector.broadcast %cst_88 : f32 to vector<8x16xf32>
    %227 = arith.mulf %225, %226 : vector<8x16xf32>
    %cst_89 = arith.constant -1.000000e+09 : f32
    %228 = vector.broadcast %cst_89 : f32 to vector<8x16xf32>
    %229 = arith.select %191, %227, %228 : vector<8x16xi1>, vector<8x16xf32>
    %cst_90 = arith.constant dense<0xFF800000> : vector<8xf32>
    %230 = vector.multi_reduction <maximumf>, %229, %cst_90 [1] : vector<8x16xf32> to vector<8xf32>
    %231 = vector.shape_cast %230 : vector<8xf32> to vector<8x1xf32>
    %232 = vector.broadcast %231 : vector<8x1xf32> to vector<8x16xf32>
    %233 = arith.subf %229, %232 : vector<8x16xf32>
    %234 = math.exp %233 : vector<8x16xf32>
    %cst_91 = arith.constant dense<0.000000e+00> : vector<8xf32>
    %235 = vector.multi_reduction <add>, %234, %cst_91 [1] : vector<8x16xf32> to vector<8xf32>
    %236 = vector.shape_cast %235 : vector<8xf32> to vector<8x1xf32>
    %237 = tpu.reciprocal %236 {approx = true} : vector<8x1xf32> -> vector<8x1xf32>
    %238 = vector.broadcast %237 : vector<8x1xf32> to vector<8x16xf32>
    %239 = arith.mulf %234, %238 : vector<8x16xf32>
    %240 = arith.truncf %239 : vector<8x16xf32> to vector<8x16xbf16>
    %cst_92 = arith.constant dense<0.000000e+00> : vector<8x8xf32>
    %241 = tpu.matmul %240, %224, %cst_92 {dimension_numbers = #tpu.dot_dimension_numbers<[1], [0], [0], [1], [0, 0, 1, 1], [], []>} : vector<8x16xbf16>, vector<16x8xbf16>, vector<8x8xf32> -> vector<8x8xf32>
    %242 = arith.truncf %241 : vector<8x8xf32> to vector<8x8xbf16>
    %243 = vector.extract_strided_slice %184 {offsets = [8, 0], sizes = [8, 32], strides = [1, 1]} : vector<32x32xbf16> to vector<8x32xbf16>
    %cst_93 = arith.constant dense<0.000000e+00> : vector<8x32xf32>
    %244 = tpu.matmul %242, %243, %cst_93 {dimension_numbers = #tpu.dot_dimension_numbers<[1], [0], [0], [1], [0, 0, 1, 1], [], []>} : vector<8x8xbf16>, vector<8x32xbf16>, vector<8x32xf32> -> vector<8x32xf32>
    %245 = arith.addf %218, %244 : vector<8x32xf32>
    %246 = vector.extract_strided_slice %187 {offsets = [0, 16], sizes = [8, 8], strides = [1, 1]} : vector<8x32xf32> to vector<8x8xf32>
    %247 = arith.truncf %246 : vector<8x8xf32> to vector<8x8xbf16>
    %248 = vector.extract_strided_slice %188 {offsets = [0, 16], sizes = [16, 8], strides = [1, 1]} : vector<16x32xf32> to vector<16x8xf32>
    %249 = arith.truncf %248 : vector<16x8xf32> to vector<16x8xbf16>
    %250 = vector.extract_strided_slice %189 {offsets = [0, 16], sizes = [16, 8], strides = [1, 1]} : vector<16x32xf32> to vector<16x8xf32>
    %251 = arith.truncf %250 : vector<16x8xf32> to vector<16x8xbf16>
    %cst_94 = arith.constant dense<0.000000e+00> : vector<8x16xf32>
    %252 = tpu.matmul %247, %249, %cst_94 {dimension_numbers = #tpu.dot_dimension_numbers<[1], [1], [0], [0], [0, 0, 1, 0], [], []>} : vector<8x8xbf16>, vector<16x8xbf16>, vector<8x16xf32> -> vector<8x16xf32>
    %cst_95 = arith.constant 0.353553385 : f32
    %253 = vector.broadcast %cst_95 : f32 to vector<8x16xf32>
    %254 = arith.mulf %252, %253 : vector<8x16xf32>
    %cst_96 = arith.constant -1.000000e+09 : f32
    %255 = vector.broadcast %cst_96 : f32 to vector<8x16xf32>
    %256 = arith.select %191, %254, %255 : vector<8x16xi1>, vector<8x16xf32>
    %cst_97 = arith.constant dense<0xFF800000> : vector<8xf32>
    %257 = vector.multi_reduction <maximumf>, %256, %cst_97 [1] : vector<8x16xf32> to vector<8xf32>
    %258 = vector.shape_cast %257 : vector<8xf32> to vector<8x1xf32>
    %259 = vector.broadcast %258 : vector<8x1xf32> to vector<8x16xf32>
    %260 = arith.subf %256, %259 : vector<8x16xf32>
    %261 = math.exp %260 : vector<8x16xf32>
    %cst_98 = arith.constant dense<0.000000e+00> : vector<8xf32>
    %262 = vector.multi_reduction <add>, %261, %cst_98 [1] : vector<8x16xf32> to vector<8xf32>
    %263 = vector.shape_cast %262 : vector<8xf32> to vector<8x1xf32>
    %264 = tpu.reciprocal %263 {approx = true} : vector<8x1xf32> -> vector<8x1xf32>
    %265 = vector.broadcast %264 : vector<8x1xf32> to vector<8x16xf32>
    %266 = arith.mulf %261, %265 : vector<8x16xf32>
    %267 = arith.truncf %266 : vector<8x16xf32> to vector<8x16xbf16>
    %cst_99 = arith.constant dense<0.000000e+00> : vector<8x8xf32>
    %268 = tpu.matmul %267, %251, %cst_99 {dimension_numbers = #tpu.dot_dimension_numbers<[1], [0], [0], [1], [0, 0, 1, 1], [], []>} : vector<8x16xbf16>, vector<16x8xbf16>, vector<8x8xf32> -> vector<8x8xf32>
    %269 = arith.truncf %268 : vector<8x8xf32> to vector<8x8xbf16>
    %270 = vector.extract_strided_slice %184 {offsets = [16, 0], sizes = [8, 32], strides = [1, 1]} : vector<32x32xbf16> to vector<8x32xbf16>
    %cst_100 = arith.constant dense<0.000000e+00> : vector<8x32xf32>
    %271 = tpu.matmul %269, %270, %cst_100 {dimension_numbers = #tpu.dot_dimension_numbers<[1], [0], [0], [1], [0, 0, 1, 1], [], []>} : vector<8x8xbf16>, vector<8x32xbf16>, vector<8x32xf32> -> vector<8x32xf32>
    %272 = arith.addf %245, %271 : vector<8x32xf32>
    %273 = vector.extract_strided_slice %187 {offsets = [0, 24], sizes = [8, 8], strides = [1, 1]} : vector<8x32xf32> to vector<8x8xf32>
    %274 = arith.truncf %273 : vector<8x8xf32> to vector<8x8xbf16>
    %275 = vector.extract_strided_slice %188 {offsets = [0, 24], sizes = [16, 8], strides = [1, 1]} : vector<16x32xf32> to vector<16x8xf32>
    %276 = arith.truncf %275 : vector<16x8xf32> to vector<16x8xbf16>
    %277 = vector.extract_strided_slice %189 {offsets = [0, 24], sizes = [16, 8], strides = [1, 1]} : vector<16x32xf32> to vector<16x8xf32>
    %278 = arith.truncf %277 : vector<16x8xf32> to vector<16x8xbf16>
    %cst_101 = arith.constant dense<0.000000e+00> : vector<8x16xf32>
    %279 = tpu.matmul %274, %276, %cst_101 {dimension_numbers = #tpu.dot_dimension_numbers<[1], [1], [0], [0], [0, 0, 1, 0], [], []>} : vector<8x8xbf16>, vector<16x8xbf16>, vector<8x16xf32> -> vector<8x16xf32>
    %cst_102 = arith.constant 0.353553385 : f32
    %280 = vector.broadcast %cst_102 : f32 to vector<8x16xf32>
    %281 = arith.mulf %279, %280 : vector<8x16xf32>
    %cst_103 = arith.constant -1.000000e+09 : f32
    %282 = vector.broadcast %cst_103 : f32 to vector<8x16xf32>
    %283 = arith.select %191, %281, %282 : vector<8x16xi1>, vector<8x16xf32>
    %cst_104 = arith.constant dense<0xFF800000> : vector<8xf32>
    %284 = vector.multi_reduction <maximumf>, %283, %cst_104 [1] : vector<8x16xf32> to vector<8xf32>
    %285 = vector.shape_cast %284 : vector<8xf32> to vector<8x1xf32>
    %286 = vector.broadcast %285 : vector<8x1xf32> to vector<8x16xf32>
    %287 = arith.subf %283, %286 : vector<8x16xf32>
    %288 = math.exp %287 : vector<8x16xf32>
    %cst_105 = arith.constant dense<0.000000e+00> : vector<8xf32>
    %289 = vector.multi_reduction <add>, %288, %cst_105 [1] : vector<8x16xf32> to vector<8xf32>
    %290 = vector.shape_cast %289 : vector<8xf32> to vector<8x1xf32>
    %291 = tpu.reciprocal %290 {approx = true} : vector<8x1xf32> -> vector<8x1xf32>
    %292 = vector.broadcast %291 : vector<8x1xf32> to vector<8x16xf32>
    %293 = arith.mulf %288, %292 : vector<8x16xf32>
    %294 = arith.truncf %293 : vector<8x16xf32> to vector<8x16xbf16>
    %cst_106 = arith.constant dense<0.000000e+00> : vector<8x8xf32>
    %295 = tpu.matmul %294, %278, %cst_106 {dimension_numbers = #tpu.dot_dimension_numbers<[1], [0], [0], [1], [0, 0, 1, 1], [], []>} : vector<8x16xbf16>, vector<16x8xbf16>, vector<8x8xf32> -> vector<8x8xf32>
    %296 = arith.truncf %295 : vector<8x8xf32> to vector<8x8xbf16>
    %297 = vector.extract_strided_slice %184 {offsets = [24, 0], sizes = [8, 32], strides = [1, 1]} : vector<32x32xbf16> to vector<8x32xbf16>
    %cst_107 = arith.constant dense<0.000000e+00> : vector<8x32xf32>
    %298 = tpu.matmul %296, %297, %cst_107 {dimension_numbers = #tpu.dot_dimension_numbers<[1], [0], [0], [1], [0, 0, 1, 1], [], []>} : vector<8x8xbf16>, vector<8x32xbf16>, vector<8x32xf32> -> vector<8x32xf32>
    %299 = arith.addf %272, %298 : vector<8x32xf32>
    %c0_108 = arith.constant 0 : index
    %c0_109 = arith.constant 0 : index
    %300 = vector.load %arg17[%c0_108, %c0_109] : memref<1x1xf32, #tpu.memory_space<vmem>>, vector<1x1xf32>
    %301 = vector.extract %300[0, 0] : f32 from vector<1x1xf32>
    %c0_110 = arith.constant 0 : index
    %c0_111 = arith.constant 0 : index
    %302 = vector.load %arg18[%c0_110, %c0_111] : memref<1x1xf32, #tpu.memory_space<vmem>>, vector<1x1xf32>
    %303 = vector.extract %302[0, 0] : f32 from vector<1x1xf32>
    %cst_112 = arith.constant dense<0.000000e+00> : vector<8xf32>
    %304 = vector.multi_reduction <add>, %299, %cst_112 [1] : vector<8x32xf32> to vector<8xf32>
    %305 = vector.shape_cast %304 : vector<8xf32> to vector<8x1xf32>
    %cst_113 = arith.constant 3.200000e+01 : f32
    %306 = vector.broadcast %cst_113 : f32 to vector<8x1xf32>
    %307 = arith.divf %305, %306 : vector<8x1xf32>
    %308 = vector.broadcast %307 : vector<8x1xf32> to vector<8x32xf32>
    %309 = arith.subf %299, %308 : vector<8x32xf32>
    %310 = arith.mulf %309, %309 : vector<8x32xf32>
    %cst_114 = arith.constant dense<0.000000e+00> : vector<8xf32>
    %311 = vector.multi_reduction <add>, %310, %cst_114 [1] : vector<8x32xf32> to vector<8xf32>
    %312 = vector.shape_cast %311 : vector<8xf32> to vector<8x1xf32>
    %cst_115 = arith.constant 0.0322580636 : f32
    %313 = vector.broadcast %cst_115 : f32 to vector<8x1xf32>
    %314 = arith.mulf %312, %313 : vector<8x1xf32>
    %315 = math.sqrt %314 : vector<8x1xf32>
    %cst_116 = arith.constant 9.99999997E-7 : f32
    %316 = vector.broadcast %cst_116 : f32 to vector<8x1xf32>
    %317 = arith.addf %315, %316 : vector<8x1xf32>
    %318 = tpu.reciprocal %317 {approx = true} : vector<8x1xf32> -> vector<8x1xf32>
    %319 = vector.broadcast %307 : vector<8x1xf32> to vector<8x32xf32>
    %320 = arith.subf %299, %319 : vector<8x32xf32>
    %321 = vector.broadcast %301 : f32 to vector<8x32xf32>
    %322 = arith.mulf %321, %320 : vector<8x32xf32>
    %323 = vector.broadcast %318 : vector<8x1xf32> to vector<8x32xf32>
    %324 = arith.mulf %322, %323 : vector<8x32xf32>
    %325 = vector.broadcast %303 : f32 to vector<8x32xf32>
    %326 = arith.addf %324, %325 : vector<8x32xf32>
    %327 = arith.truncf %326 : vector<8x32xf32> to vector<8x32xbf16>
    %c0_117 = arith.constant 0 : index
    %c0_118 = arith.constant 0 : index
    %328 = vector.load %arg19[%c0_117, %c0_118] : memref<32x64xbf16, #tpu.memory_space<vmem>>, vector<32x64xbf16>
    %cst_119 = arith.constant dense<0.000000e+00> : vector<8x64xf32>
    %329 = tpu.matmul %327, %328, %cst_119 {dimension_numbers = #tpu.dot_dimension_numbers<[1], [0], [0], [1], [0, 0, 1, 1], [], []>} : vector<8x32xbf16>, vector<32x64xbf16>, vector<8x64xf32> -> vector<8x64xf32>
    %c0_120 = arith.constant 0 : index
    %c0_121 = arith.constant 0 : index
    %330 = vector.load %arg20[%c0_120, %c0_121] : memref<1x64xf32, #tpu.memory_space<vmem>>, vector<1x64xf32>
    %331 = vector.broadcast %330 : vector<1x64xf32> to vector<8x64xf32>
    %332 = arith.addf %329, %331 : vector<8x64xf32>
    %cst_122 = arith.constant 0.000000e+00 : f32
    %333 = vector.broadcast %cst_122 : f32 to vector<8x64xf32>
    %334 = arith.maximumf %332, %333 : vector<8x64xf32>
    %335 = arith.truncf %334 : vector<8x64xf32> to vector<8x64xbf16>
    %c0_123 = arith.constant 0 : index
    %c0_124 = arith.constant 0 : index
    %336 = vector.load %arg21[%c0_123, %c0_124] : memref<64x32xbf16, #tpu.memory_space<vmem>>, vector<64x32xbf16>
    %cst_125 = arith.constant dense<0.000000e+00> : vector<8x32xf32>
    %337 = tpu.matmul %335, %336, %cst_125 {dimension_numbers = #tpu.dot_dimension_numbers<[1], [0], [0], [1], [0, 0, 1, 1], [], []>} : vector<8x64xbf16>, vector<64x32xbf16>, vector<8x32xf32> -> vector<8x32xf32>
    %c0_126 = arith.constant 0 : index
    %c0_127 = arith.constant 0 : index
    %338 = vector.load %arg22[%c0_126, %c0_127] : memref<1x32xf32, #tpu.memory_space<vmem>>, vector<1x32xf32>
    %339 = vector.broadcast %338 : vector<1x32xf32> to vector<8x32xf32>
    %340 = arith.addf %337, %339 : vector<8x32xf32>
    %341 = arith.addf %299, %340 : vector<8x32xf32>
    %c0_128 = arith.constant 0 : index
    %c0_129 = arith.constant 0 : index
    %c0_130 = arith.constant 0 : index
    %342 = vector.load %arg23[%c0_128, %c0_129, %c0_130] : memref<1x8x32xf32, #tpu.memory_space<vmem>>, vector<1x8x32xf32>
    %343 = vector.shape_cast %342 : vector<1x8x32xf32> to vector<8x32xf32>
    %344 = vector.shape_cast %341 : vector<8x32xf32> to vector<1x8x32xf32>
    tpu.vector_store %arg23[%c0_128, %c0_129, %c0_130], %344 {strides = array<i32>} : memref<1x8x32xf32, #tpu.memory_space<vmem>>, vector<1x8x32xf32>,
    return
  }
  func.func @transform_0(%arg0: i32) -> (i32, i32, i32) {
    %c0_i32 = arith.constant 0 : i32
    %c0_i32_0 = arith.constant 0 : i32
    %c0_i32_1 = arith.constant 0 : i32
    return %arg0, %c0_i32, %c0_i32_0 : i32, i32, i32
  }
  func.func @transform_1(%arg0: i32) -> (i32, i32, i32) {
    %c0_i32 = arith.constant 0 : i32
    %c0_i32_0 = arith.constant 0 : i32
    %c0_i32_1 = arith.constant 0 : i32
    return %arg0, %c0_i32, %c0_i32_0 : i32, i32, i32
  }
  func.func @transform_2(%arg0: i32) -> (i32, i32, i32) {
    %c0_i32 = arith.constant 0 : i32
    %c0_i32_0 = arith.constant 0 : i32
    %c0_i32_1 = arith.constant 0 : i32
    return %arg0, %c0_i32, %c0_i32_0 : i32, i32, i32
  }
  func.func @transform_3(%arg0: i32) -> (i32, i32, i32) {
    %c0_i32 = arith.constant 0 : i32
    %c0_i32_0 = arith.constant 0 : i32
    %c0_i32_1 = arith.constant 0 : i32
    return %arg0, %c0_i32, %c0_i32_0 : i32, i32, i32
  }
  func.func @transform_4(%arg0: i32) -> (i32, i32) {
    %c0_i32 = arith.constant 0 : i32
    %c0_i32_0 = arith.constant 0 : i32
    %c0_i32_1 = arith.constant 0 : i32
    return %c0_i32, %c0_i32_0 : i32, i32
  }
  func.func @transform_5(%arg0: i32) -> (i32, i32) {
    %c0_i32 = arith.constant 0 : i32
    %c0_i32_0 = arith.constant 0 : i32
    %c0_i32_1 = arith.constant 0 : i32
    return %c0_i32, %c0_i32_0 : i32, i32
  }
  func.func @transform_6(%arg0: i32) -> (i32, i32) {
    %c0_i32 = arith.constant 0 : i32
    %c0_i32_0 = arith.constant 0 : i32
    %c0_i32_1 = arith.constant 0 : i32
    return %c0_i32, %c0_i32_0 : i32, i32
  }
  func.func @transform_7(%arg0: i32) -> (i32, i32) {
    %c0_i32 = arith.constant 0 : i32
    %c0_i32_0 = arith.constant 0 : i32
    %c0_i32_1 = arith.constant 0 : i32
    return %c0_i32, %c0_i32_0 : i32, i32
  }
  func.func @transform_8(%arg0: i32) -> (i32, i32) {
    %c0_i32 = arith.constant 0 : i32
    %c0_i32_0 = arith.constant 0 : i32
    %c0_i32_1 = arith.constant 0 : i32
    return %c0_i32, %c0_i32_0 : i32, i32
  }
  func.func @transform_9(%arg0: i32) -> (i32, i32) {
    %c0_i32 = arith.constant 0 : i32
    %c0_i32_0 = arith.constant 0 : i32
    %c0_i32_1 = arith.constant 0 : i32
    return %c0_i32, %c0_i32_0 : i32, i32
  }
  func.func @transform_10(%arg0: i32) -> (i32, i32) {
    %c0_i32 = arith.constant 0 : i32
    %c0_i32_0 = arith.constant 0 : i32
    %c0_i32_1 = arith.constant 0 : i32
    return %c0_i32, %c0_i32_0 : i32, i32
  }
  func.func @transform_11(%arg0: i32) -> (i32, i32) {
    %c0_i32 = arith.constant 0 : i32
    %c0_i32_0 = arith.constant 0 : i32
    %c0_i32_1 = arith.constant 0 : i32
    return %c0_i32, %c0_i32_0 : i32, i32
  }
  func.func @transform_12(%arg0: i32) -> (i32, i32) {
    %c0_i32 = arith.constant 0 : i32
    %c0_i32_0 = arith.constant 0 : i32
    %c0_i32_1 = arith.constant 0 : i32
    return %c0_i32, %c0_i32_0 : i32, i32
  }
  func.func @transform_13(%arg0: i32) -> (i32, i32) {
    %c0_i32 = arith.constant 0 : i32
    %c0_i32_0 = arith.constant 0 : i32
    %c0_i32_1 = arith.constant 0 : i32
    return %c0_i32, %c0_i32_0 : i32, i32
  }
  func.func @transform_14(%arg0: i32) -> (i32, i32) {
    %c0_i32 = arith.constant 0 : i32
    %c0_i32_0 = arith.constant 0 : i32
    %c0_i32_1 = arith.constant 0 : i32
    return %c0_i32, %c0_i32_0 : i32, i32
  }
  func.func @transform_15(%arg0: i32) -> (i32, i32) {
    %c0_i32 = arith.constant 0 : i32
    %c0_i32_0 = arith.constant 0 : i32
    %c0_i32_1 = arith.constant 0 : i32
    return %c0_i32, %c0_i32_0 : i32, i32
  }
  func.func @transform_16(%arg0: i32) -> (i32, i32) {
    %c0_i32 = arith.constant 0 : i32
    %c0_i32_0 = arith.constant 0 : i32
    %c0_i32_1 = arith.constant 0 : i32
    return %c0_i32, %c0_i32_0 : i32, i32
  }
  func.func @transform_17(%arg0: i32) -> (i32, i32) {
    %c0_i32 = arith.constant 0 : i32
    %c0_i32_0 = arith.constant 0 : i32
    %c0_i32_1 = arith.constant 0 : i32
    return %c0_i32, %c0_i32_0 : i32, i32
  }
  func.func @transform_18(%arg0: i32) -> (i32, i32) {
    %c0_i32 = arith.constant 0 : i32
    %c0_i32_0 = arith.constant 0 : i32
    %c0_i32_1 = arith.constant 0 : i32
    return %c0_i32, %c0_i32_0 : i32, i32
  }
  func.func @transform_19(%arg0: i32) -> (i32, i32) {
    %c0_i32 = arith.constant 0 : i32
    %c0_i32_0 = arith.constant 0 : i32
    %c0_i32_1 = arith.constant 0 : i32
    return %c0_i32, %c0_i32_0 : i32, i32
  }
  func.func @transform_20(%arg0: i32) -> (i32, i32) {
    %c0_i32 = arith.constant 0 : i32
    %c0_i32_0 = arith.constant 0 : i32
    %c0_i32_1 = arith.constant 0 : i32
    return %c0_i32, %c0_i32_0 : i32, i32
  }
  func.func @transform_21(%arg0: i32) -> (i32, i32) {
    %c0_i32 = arith.constant 0 : i32
    %c0_i32_0 = arith.constant 0 : i32
    %c0_i32_1 = arith.constant 0 : i32
    return %c0_i32, %c0_i32_0 : i32, i32
  }
  func.func @transform_22(%arg0: i32) -> (i32, i32, i32) {
    %c0_i32 = arith.constant 0 : i32
    %c0_i32_0 = arith.constant 0 : i32
    %c0_i32_1 = arith.constant 0 : i32
    return %arg0, %c0_i32, %c0_i32_0 : i32, i32, i32
  }
}

</mosaic_0001>

<bundles_post_ra>
// kernel: decoder_forward.5
= control target key start
LH: loop header
LB: loop body
LE: loop exit
PB: predicated region body
PF: predicated region fallthrough
CT: control target
= control target key end

     0   :  { %s609_s0 = inlined_call_operand.vmem [shape: f32[2,8,32], index: 0, kind: input, shape index: {}]   ;;  %s610_s1 = inlined_call_operand.<no memory space> [shape: f32[1,1], index: 1, kind: input, shape index: {}]   ;;  %s611_s3 = inlined_call_operand.hbm [shape: f32[2,8,32], index: 3, kind: output, shape index: {}]   ;;  %s612_s2 = inlined_call_operand.<no memory space> [shape: f32[1,1], index: 2, kind: input, shape index: {}]  }
   0x1   :  { %v8_v0 = vstv %s610_s1  ;;  %v10_v1 = vstv %s612_s2 }
   0x2   :  { %9 = vst [vmem:[#allocation2] sm:$0x1] %v8_v0  ;;  %11 = vst [vmem:[#allocation3] sm:$0x1] %v10_v1 }
   0x3   :  { %12 = vsyncpa [#allocation5], 0 }
   0x4   :  { %14 = vsyncpa [#allocation5 + $0x1], 0  ;;  %s494_s16 = smov 0   ;;  %s496_s17 = smov 0  }
   0x5   :  { %s498_s18 = smov 0   ;;  %s500_s19 = smov 0  }
   0x6   :  { %s502_s20 = smov 0   ;;  %s504_s21 = smov 0  }
   0x7 LB: > { %s313_s1 = sadd.s32 4294967295, %s465_s21   ;;  %s314_s2 = sadd.s32 4294967294, %s465_s21   ;;  %s465_s21 = sphi %s504_s21, %s20_s21   ;;  %s461_s20 = sphi %s502_s20, %s619_s20   ;;  %s457_s19 = sphi %s500_s19, %s618_s19   ;;  %s453_s18 = sphi %s498_s18, %s617_s18   ;;  %s449_s17 = sphi %s496_s17, %s616_s17   ;;  %s445_s16 = sphi %s494_s16, %s615_s16  }
   0x8   : > { %s32_s22 = sadd.s32 1, %s461_s20  ;;  %s111_s23 = sadd.s32 1, %s453_s18 }
   0x9   : > { %p34_p0 = scmp.ge.s32.totalorder %s32_s22, 2  ;;  %p121_p1 = scmp.ne.s32.totalorder %s453_s18, %s449_s17 }
   0xa   : > { %p122_p2 = scmp.eq.s32.totalorder %s313_s1, 1  ;;  %p127_p3 = scmp.ne.s32.totalorder %s449_s17, %s445_s16 }
   0xb   : > { %s621_s22 = smov (%p34_p0, %s32_s22), 0  ;;  %p128_p5 = scmp.eq.s32.totalorder %s314_s2, 1 }
   0xc   : > { %p534_p4 = por %p122_p2, %p121_p1  ;;  %s106_s25 = ssub.s32 %s461_s20, %s621_s22 }
   0xd   : > { %p317_p6 = scmp.ge.s32.totalorder %s465_s21, 1  ;;  %p109_p7 = scmp.eq.s32.totalorder %s106_s25, 0 }
   0xe   : > { %p541_p8 = por %p128_p5, %p127_p3  ;;  %p162_p9 = scmp.lt.s32.totalorder %s465_s21, 3 }
   0xf   : > { %s547_s27 = scalar_select %p109_p7, %s453_s18, %s111_s23  }
  0x10   : > { %p163_p10 = pnand %p317_p6, %p162_p9 }
  0x11   : > { %p188_p11 = scmp.lt.s32.totalorder (!%p163_p10), %s457_s19, 1  ;;  %v196_v2 = vld [vmem:[#allocation2] sm:$0x1] (!%p163_p10)  ;;  %vm200_vm0 = vcmask (!%p163_p10), 261120   ;;  %v198_v5 = vld [vmem:[#allocation3] sm:$0x1] (!%p163_p10) }
  0x12   : > { %166 = sbr.rel (%p163_p10) target bundleno = 370 (0x172), region = 32  ;;  %324 = vpush (!%p163_p10), %v196_v2  ;;  %s185_s6 = sand.u32 (!%p163_p10), 1, %s449_s17  }
  0x13   : > { %326 = vpush (!%p163_p10), %v198_v5  ;;  %s318_s8 = sshll.u32 (!%p163_p10), %s185_s6, 3  ;;  %s321_s10 = sshll.u32 (!%p163_p10), %s457_s19, 7 }
  0x14   : > { %s187_s11 = scalar_lea.vmem (!%p163_p10), [#allocation4], %s318_s8  ;;  %s561_s15 = scalar_lea.hbm (!%p163_p10), %s611_s3, %s321_s10 }
  0x15   : > { %s242_s12 = sshll.u32 (!%p163_p10), %s187_s11, 4  ;;  %s228_s1 = scalar_lea.sflag (!%p163_p10), [#allocation5], %s185_s6  ;;  %s563_s12 = int_to_ptr.vmem [resolvable:$true] %s242_s12 }
  0x16   : > { %s387_s2 = scalar_lea.vmem (!%p163_p10), %s563_s12, 128 }
  0x17   : > { %p388_p12 = scmp.ne.s32.totalorder (!%p163_p10), %s563_s12, %s387_s2 }
  0x19   : > { %s189_s28 = scalar_select %p188_p11, %s457_s19, 1 }
  0x1a   : > { %p389_p13 = pnand %p388_p12, %p534_p4  ;;  %s467_s19 = smov [#allocation4]  }
  0x1b   : > { %s319_s29 = sshll.u32 %s189_s28, 3  ;;  %s391_s23 = sshll.u32 %s467_s19, 4  ;;  %s392_s23 = int_to_ptr.vmem [resolvable:$false] %s391_s23 }
  0x1c   : > { %s194_s5 = scalar_lea.vmem %s609_s0, %s319_s29  ;;  %p390_p0 = pneg %p389_p13 }
  0x1d   : > { %v195_v3 = vld [vmem:[%s194_s5] sm:$0xff]  ;;  %s393_s25 = scalar_lea.vmem %s392_s23, 256  ;;  %p394_p1 = scmp.lt.s32.totalorder %s563_s12, %s392_s23 }
  0x1e   : > { %v201_v4 = vsel %vm200_vm0, %v195_v3, 0.0  ;;  %p395_p2 = scmp.lt.s32.totalorder %s393_s25, %s387_s2 }
  0x1f   : > { %202 = vadd.xlane.f32.xlu0 %v201_v4 }
  0x20   : > { %p396_p3 = por %p395_p2, %p394_p1 }
  0x22   : > { %p397_p5 = pnand %p396_p3, %p390_p0 }
  0x43   : > { %s325_s7 = spop %324 }
  0x44   : > { %v221_v19 = vstv %s325_s7  ;;  %s327_s9 = spop %326 }
  0x45   : > { %v224_v22 = vstv %s327_s9 }
  0xac   : > { %v203_v6 = vpop.xlane.xlu0 %202 }
  0xad   : > { %v205_v7 = vmul.f32 0.03125, %v203_v6 }
  0xaf   : > { %v206_v8 = vsub.f32 %v195_v3, %v205_v7 }
  0xb1   : > { %v207_v9 = vmul.f32 %v206_v8, %v206_v8  ;;  %v222_v20 = vmul.f32 %v221_v19, %v206_v8 }
  0xb3   : > { %v208_v10 = vsel %vm200_vm0, %v207_v9, 0.0 }
  0xb4   : > { %209 = vadd.xlane.f32.xlu0 %v208_v10 }
 0x141   : > { %v210_v11 = vpop.xlane.xlu0 %209 }
 0x142   : > { %v211_v12 = vmul.f32 0.032258064, %v210_v11 }
 0x144   : > { %383 = vrsqrt.f32 %v211_v12  ;;  %vm214_vm1 = vcmp.eq.f32.partialorder %v211_v12, inf  ;;  %v217_v15 = vand.u32 2147483648, %v211_v12  ;;  %vm216_vm2 = vcmp.eq.f32.partialorder %v211_v12, 0.0 }
 0x14e   : > { %v384_v13 = vpop.eup %383 }
 0x14f   : > { %v213_v14 = vmul.f32 %v384_v13, %v211_v12 }
 0x151   : > { %v215_v16 = vsel %vm214_vm1, %v211_v12, %v213_v14 }
 0x152   : > { %v218_v17 = vsel %vm216_vm2, %v217_v15, %v215_v16 }
 0x153   : > { %v219_v18 = vadd.f32 1e-06, %v218_v17 }
 0x155   : > { %385 = vrcp.f32 %v219_v18 }
 0x15f   : > { %v386_v21 = vpop.eup %385 }
 0x160   : > { %v223_v23 = vmul.f32 %v386_v21, %v222_v20 }
 0x162   : > { %v225_v24 = vadd.f32 %v224_v22, %v223_v23 }
 0x164   : > { %226 = vst.msk [vmem:[%s187_s11] sm:$0xff] %vm200_vm0, %v225_v24 }
 0x165   : > { %400 = shalt.err (!%p397_p5)
}
 0x166   : > { %s401_s28 = scalar_lea.hbm %s561_s15, 128  ;;  %s405_s4 = scalar_lea.hbm %s611_s3, 256 }
 0x167   : > { %p402_p6 = scmp.ne.s32.totalorder %s561_s15, %s401_s28  ;;  %p406_p10 = scmp.lt.u32.totalorder %s561_s15, %s611_s3 }
 0x168   : > { %p407_p11 = scmp.lt.u32.totalorder %s405_s4, %s401_s28  ;;  %p409_p13 = scmp.lt.u32.totalorder %s401_s28, %s561_s15 }
 0x169   : > { %p403_p7 = pnand %p402_p6, %p534_p4 }
 0x16a   : > { %p408_p12 = por %p407_p11, %p406_p10 }
 0x16b   : > { %p404_p9 = pneg %p403_p7 }
 0x16c   : > { %p410_p0 = por %p409_p13, %p408_p12 }
 0x16e   : > { %p411_p1 = pnand %p410_p0, %p404_p9 }
 0x170   : > { %414 = shalt.err (!%p411_p1)
}
 0x171   : > { %328 = dma.vmem_to_hbm [thread:$0]  (%p534_p4), %s563_s12, 128, %s561_s15, %s228_s1  }
 0x172 PF: > { %p334_p2 = scmp.ge.s32.totalorder %s465_s21, 2  ;;  %s254_s7 = sand.u32 1, %s445_s16  }
 0x173   : > { %s255_s8 = scalar_lea.sflag [#allocation5], %s254_s7 }
 0x174   : > { %p331_p3 = pnand %p334_p2, %p541_p8 }
 0x176   : > { %440 = dma.done.wait (!%p331_p3), %s255_s8, 128  }
 0x177   : > { %442 = vsyncadd (!%p331_p3), %s255_s8, 4294967168  ;;  %s20_s21 = sadd.s32 1, %s465_s21   ;;  %s615_s16 = smov %s449_s17 }
 0x178   : > { %p17_p5 = scmp.ge.s32.totalorder %s20_s21, 4   ;;  %s616_s17 = smov %s453_s18 }
 0x179   : > { %s617_s18 = smov %s547_s27  ;;  %s618_s19 = smov %s461_s20 }
 0x17a   : > { %s619_s20 = smov %s621_s22  ;;  %19 = sbr.rel (!%p17_p5) target bundleno = 7 (0x7), region = 67 }
 0x181   :  { %260 = vsyncpa [#allocation5], 1 }
 0x182   :  { %262 = vsyncpa [#allocation5 + $0x1], 1 }

// kernel: decoder_forward.3
= control target key start
LH: loop header
LB: loop body
LE: loop exit
PB: predicated region body
PF: predicated region fallthrough
CT: control target
= control target key end

     0   :  { %s3830_s0 = inlined_call_operand.vmem [shape: f32[2,8,32], index: 0, kind: input, shape index: {}, may-alias: {0,22}]   ;;  %s3831_s1 = inlined_call_operand.vmem [shape: f32[2,16,32], index: 1, kind: input, shape index: {}]   ;;  %s3832_s2 = inlined_call_operand.vmem [shape: f32[2,8,16], index: 2, kind: input, shape index: {}]   ;;  %s3833_s3 = inlined_call_operand.vmem [shape: f32[2,8,8], index: 3, kind: input, shape index: {}]   ;;  %s3834_s4 = inlined_call_operand.<no memory space> [shape: f32[1,1], index: 4, kind: input, shape index: {}]   ;;  %s3835_s6 = inlined_call_operand.vmem [shape: bf16[32,32], index: 6, kind: input, shape index: {}]   ;;  %s3836_s7 = inlined_call_operand.vmem [shape: bf16[32,32], index: 7, kind: input, shape index: {}]   ;;  %s3837_s8 = inlined_call_operand.vmem [shape: bf16[32,32], index: 8, kind: input, shape index: {}]   ;;  %s3838_s9 = inlined_call_operand.vmem [shape: bf16[32,32], index: 9, kind: input, shape index: {}]   ;;  %s3839_s12 = inlined_call_operand.vmem [shape: bf16[32,32], index: 12, kind: input, shape index: {}]   ;;  %s3840_s13 = inlined_call_operand.vmem [shape: bf16[32,32], index: 13, kind: input, shape index: {}]   ;;  %s3841_s14 = inlined_call_operand.vmem [shape: bf16[32,32], index: 14, kind: input, shape index: {}]   ;;  %s3842_s15 = inlined_call_operand.vmem [shape: bf16[32,32], index: 15, kind: input, shape index: {}]   ;;  %s3843_s18 = inlined_call_operand.hbm [shape: bf16[32,64], index: 18, kind: input, shape index: {}]   ;;  %s3844_s19 = inlined_call_operand.vmem [shape: f32[1,64], index: 19, kind: input, shape index: {}]   ;;  %s3845_s20 = inlined_call_operand.vmem [shape: bf16[64,32], index: 20, kind: input, shape index: {}]   ;;  %s3846_s21 = inlined_call_operand.vmem [shape: f32[1,32], index: 21, kind: input, shape index: {}]   ;;  %s3847_s22 = inlined_call_operand.vmem [shape: f32[2,8,32], index: 22, kind: output, shape index: {}, may-alias: {0,22}]   ;;  %s3848_s5 = inlined_call_operand.<no memory space> [shape: f32[1,1], index: 5, kind: input, shape index: {}]   ;;  %s3849_s10 = inlined_call_operand.<no memory space> [shape: f32[1,1], index: 10, kind: input, shape index: {}]   ;;  %s3850_s11 = inlined_call_operand.<no memory space> [shape: f32[1,1], index: 11, kind: input, shape index: {}]   ;;  %s3851_s16 = inlined_call_operand.<no memory space> [shape: f32[1,1], index: 16, kind: input, shape index: {}]   ;;  %s3852_s17 = inlined_call_operand.<no memory space> [shape: f32[1,1], index: 17, kind: input, shape index: {}]  }
   0x1   :  { %3857 = sst [smem:[#allocation11_spill]] %s3830_s0  ;;  %v29_v1 = vstv %s3848_s5  ;;  %v31_v2 = vstv %s3849_s10  ;;  %v33_v3 = vstv %s3850_s11  ;;  %v35_v4 = vstv %s3851_s16 }
   0x2   :  { %3858 = sst [smem:[#allocation12_spill]] %s3831_s1  ;;  %30 = vst [vmem:[#allocation3] sm:$0x1] %v29_v1  ;;  %32 = vst [vmem:[#allocation4] sm:$0x1] %v31_v2  ;;  %v37_v5 = vstv %s3852_s17 }
   0x3   :  { %3859 = sst [smem:[#allocation13_spill]] %s3832_s2  ;;  %34 = vst [vmem:[#allocation5] sm:$0x1] %v33_v3  ;;  %36 = vst [vmem:[#allocation6] sm:$0x1] %v35_v4 }
   0x4   :  { %3860 = sst [smem:[#allocation14_spill]] %s3833_s3  ;;  %38 = vst [vmem:[#allocation7] sm:$0x1] %v37_v5 }
   0x5   :  { %3861 = sst [smem:[#allocation15_spill]] %s3834_s4 }
   0x6   :  { %3862 = sst [smem:[#allocation16_spill]] %s3835_s6  ;;  %s3864_s29 = sld [smem:[#allocation15_spill]] }
   0x7   :  { %3863 = sst [smem:[#allocation17_spill]] %s3836_s7 }
   0xc   :  { %v27_v0 = vstv %s3864_s29 }
   0xd   :  { %28 = vst [vmem:[#allocation2] sm:$0x1] %v27_v0 }
   0xe   :  { %39 = vsyncpa [#allocation9], 0  ;;  %s3403_s5 = smov 0  }
   0xf LB: > { %s3409_s10 = sadd.s32 4294967295, %s3260_s5   ;;  %p2743_p0 = scmp.ge.s32.totalorder %s3260_s5, 1  ;;  %s3260_s5 = sphi %s3403_s5, %s45_s5  }
  0x10   : > { %p558_p1 = scmp.lt.s32.totalorder %s3260_s5, 3  ;;  %s3262_s11 = smov [#allocation8]  }
  0x11   : > { %s612_s16 = sshll.u32 %s3262_s11, 4  ;;  %p3855_p3 = scmp.eq.s32.totalorder %s3409_s10, 0  ;;  %s613_s16 = int_to_ptr.vmem [resolvable:$true] %s612_s16 }
  0x12   : > { %p3413_p2 = pnand %p2743_p0, %p558_p1  ;;  %s3222_s28 = scalar_lea.hbm %s3843_s18, 256 }
  0x13   : > { %p3223_p6 = scmp.ne.s32.totalorder %s3843_s18, %s3222_s28  ;;  %p3229_p10 = scmp.lt.u32.totalorder %s3222_s28, %s3843_s18 }
  0x14   : > { %s3865_s17 = scalar_select %p3413_p2, 1, 0 }
  0x15   : > { %p3137_p4 = pneg %p3413_p2 }
  0x17   : > { %p3422_p5 = pnand %p3855_p3, %p3137_p4 }
  0x19   : > { %p3224_p7 = pneg %p3422_p5 }
  0x1b   : > { %p3225_p8 = pnand %p3224_p7, %p3223_p6 }
  0x1d   : > { %p3226_p9 = pneg %p3225_p8 }
  0x1f   : > { %p3231_p11 = pnand %p3229_p10, %p3226_p9 }
  0x21   : > { %3234 = shalt.err (!%p3231_p11)
}
  0x22   : > { %s3235_s23 = scalar_lea.vmem %s613_s16, 256  ;;  %p3243_p1 = scmp.lt.s32.totalorder %s613_s16, %s613_s16 }
  0x23   : > { %p3236_p12 = scmp.ne.s32.totalorder %s613_s16, %s3235_s23  ;;  %p3244_p4 = scmp.lt.s32.totalorder %s3235_s23, %s3235_s23 }
  0x25   : > { %p3238_p13 = pnand %p3236_p12, %p3224_p7  ;;  %p3245_p3 = por %p3244_p4, %p3243_p1 }
  0x27   : > { %p3239_p0 = pneg %p3238_p13 }
  0x29   : > { %p3246_p2 = pnand %p3245_p3, %p3239_p0 }
  0x2b   : > { %3249 = shalt.err (!%p3246_p2)
}
  0x2c   : > { %s3263_s1 = smov 64   ;;  %s3264_s6 = smov 4  }
  0x2d   : > { %3140 = dma.hbm_to_vmem [thread:$0]  (!%p3422_p5), %s3843_s18, 256, %s613_s16, [#allocation9], %s3263_s1, %s3263_s1, %s3264_s6  }
  0x2e   : > { %p3867_p6 = scmp.ne.s32.totalorder %s3865_s17, 0 }
  0x2f   : > { %p3868_p8 = scmp.eq.s32.totalorder (!%p3867_p6), %s3409_s10, 0 }
  0x30   : > { %666 = sbr.rel (%p3867_p6) target bundleno = 6027 (0x178b), region = 108 }
  0x37   : > { %3255 = dma.done.wait (%p3868_p8), [#allocation9], 256   ;;  %p3869_p7 = pmov %p3868_p8 }
  0x38   : > { %p739_p2 = scmp.lt.s32.totalorder %s3409_s10, 1  ;;  %s3870_s16 = sld [smem:[#allocation11_spill]]  ;;  %vm768_vm0 = vcmask 261120   ;;  %v764_v7 = vld [vmem:[#allocation2] sm:$0x1]  ;;  %v3265_v17 = vmov 0.0  }
  0x39   : > { %3257 = vsyncadd (%p3869_p7), [#allocation9], 4294967040  ;;  %3121 = vpush %v764_v7  ;;  %v766_v9 = vld [vmem:[#allocation3] sm:$0x1]  ;;  %s3871_s3 = sld [smem:[#allocation16_spill]]  ;;  %s3872_s30 = sld [smem:[#allocation17_spill]]  ;;  %2883 = vmatprep.subr.bf16.mxu0 %v3265_v17  ;;  %2891 = vmatprep.subr.bf16.mxu1 %v3265_v17 }
  0x3a   : > { %s3877_s10 = smov (!%p739_p2, %s3409_s10), 1  ;;  %3123 = vpush %v766_v9  ;;  %vm3266_vm1 = vmmov 0   ;;  %v3163_v34 = vld [vmem:[%s3837_s8] sm:$0xff]   ;;  %v3164_v36 = vld [vmem:[%s3837_s8 + $0x8] sm:$0xff]   ;;  %vm975_vm4 = vcmask 64512   ;;  %s3267_s2 = smov 120  }
  0x3b   : > { %s3453_s25 = sshll.u32 %s3877_s10, 3  ;;  %2887 = vmatprep.mubr.msk.bf16.mxu0 %vm3266_vm1, %v3265_v17  ;;  %2895 = vmatprep.mubr.msk.bf16.mxu1 %vm3266_vm1, %v3265_v17  ;;  %vm1039_vm5 = vcmask 1043456   ;;  %s3873_s29 = sld [smem:[#allocation14_spill]]  ;;  %vm1877_vm10 = vcmask 130048   ;;  %vm2594_vm13 = vcmask 523264  }
  0x3c   : > { %s3268_s0 = smov 112   ;;  %s2808_s7 = sshll.u32 %s3877_s10, 4 }
  0x3d   : > { %s3874_s28 = sld [smem:[#allocation12_spill]] }
  0x3e   : > { %s3459_s17 = scalar_lea.vmem %s3870_s16, %s3453_s25  ;;  %s3875_s16 = sld [smem:[#allocation13_spill]] }
  0x3f   : > { %v3462_v6 = vld [vmem:[%s3459_s17] sm:$0xff]  ;;  %v3161_v18 = vld [vmem:[%s3871_s3 + $0x8] sm:$0xff]  }
  0x40   : > { %v769_v8 = vsel %vm768_vm0, %v3462_v6, 0.0  ;;  %v3159_v15 = vld [vmem:[%s3871_s3] sm:$0xff]   ;;  %v3162_v19 = vld [vmem:[%s3872_s30 + $0x8] sm:$0xff]  }
  0x41   : > { %770 = vadd.xlane.f32.xlu0 %v769_v8  ;;  %v3160_v16 = vld [vmem:[%s3872_s30] sm:$0xff]   ;;  %2884 = vmatpush3.bf16.msra.mxu0 %v3159_v15  ;;  %s755_s4 = scalar_lea.vmem %s3873_s29, %s3453_s25 }
  0x42   : > { %2892 = vmatpush3.bf16.msra.mxu1 %v3160_v16  ;;  %2885 = vmatprep.subr.bf16.mxu0 %v3265_v17  ;;  %v3529_v54 = vld [vmem:[%s755_s4] sm:$0xff] }
  0x43   : > { %2893 = vmatprep.subr.bf16.mxu1 %v3265_v17  ;;  %vm971_vm6 = vcmp.ne.f32.partialorder %v3529_v54, 0.0  ;;  %s747_s29 = scalar_lea.vmem %s3874_s28, %s2808_s7 }
  0x44   : > { %s751_s27 = scalar_lea.vmem %s3875_s16, %s3453_s25 }
  0x45   : > { %2886 = vmatpush3.bf16.msra.mxu0 %v3161_v18 }
  0x46   : > { %2894 = vmatpush3.bf16.msra.mxu1 %v3162_v19  ;;  %2899 = vmatprep.subr.bf16.mxu0 %v3265_v17 }
  0x47   : > { %2907 = vmatprep.subr.bf16.mxu1 %v3265_v17 }
  0x6a   : > { %s3122_s6 = spop %3121 }
  0x6b   : > { %v789_v28 = vstv %s3122_s6  ;;  %s3124_s24 = spop %3123  ;;  %s3269_s6 = smov 104  }
  0x6c   : > { %v792_v31 = vstv %s3124_s24 }
  0xce   : > { %v771_v10 = vpop.xlane.xlu0 %770 }
  0xcf   : > { %v773_v11 = vmul.f32 0.03125, %v771_v10 }
  0xd1   : > { %v774_v12 = vsub.f32 %v3462_v6, %v773_v11 }
  0xd3   : > { %v775_v13 = vmul.f32 %v774_v12, %v774_v12  ;;  %v790_v29 = vmul.f32 %v789_v28, %v774_v12 }
  0xd5   : > { %v776_v14 = vsel %vm768_vm0, %v775_v13, 0.0 }
  0xd6   : > { %777 = vadd.xlane.f32.xlu0 %v776_v14  ;;  %v807_v14 = vld [vmem:[%s3838_s9] sm:$0xf] }
  0xd7   : > { %v1088_v15 = vsel %vm1039_vm5, %v807_v14, 0 }
 0x163   : > { %v778_v20 = vpop.xlane.xlu0 %777 }
 0x164   : > { %v779_v21 = vmul.f32 0.032258064, %v778_v20 }
 0x166   : > { %3177 = vrsqrt.f32 %v779_v21  ;;  %vm782_vm2 = vcmp.eq.f32.partialorder %v779_v21, inf  ;;  %v785_v24 = vand.u32 2147483648, %v779_v21  ;;  %vm784_vm3 = vcmp.eq.f32.partialorder %v779_v21, 0.0 }
 0x170   : > { %v3178_v22 = vpop.eup %3177 }
 0x171   : > { %v781_v23 = vmul.f32 %v3178_v22, %v779_v21 }
 0x173   : > { %v783_v25 = vsel %vm782_vm2, %v779_v21, %v781_v23 }
 0x174   : > { %v786_v26 = vsel %vm784_vm3, %v785_v24, %v783_v25 }
 0x175   : > { %v787_v27 = vadd.f32 1e-06, %v786_v26 }
 0x177   : > { %3179 = vrcp.f32 %v787_v27 }
 0x181   : > { %v3180_v30 = vpop.eup %3179 }
 0x182   : > { %v791_v32 = vmul.f32 %v3180_v30, %v790_v29 }
 0x184   : > { %v793_v33 = vadd.f32 %v792_v31, %v791_v32 }
 0x186   : > { %v811_v35 = vpack.c.bf16 %v793_v33, %v793_v33 }
 0x188   : > { %2888 = vmatmul.mubr.msk.bf16.vlgmr.msra.gmra.mrb[0].mxu0 %vm768_vm0, %v811_v35  ;;  %2896 = vmatmul.mubr.msk.bf16.vlgmr.msra.gmra.mrb[0].mxu1 %vm768_vm0, %v811_v35 }
 0x189   : > { %2900 = vmatpush3.bf16.msra.mxu0 %v3163_v34  ;;  %2903 = vmatprep.mubr.msk.bf16.mxu0 %vm3266_vm1, %v3265_v17 }
 0x18a   : > { %2901 = vmatprep.subr.bf16.mxu0 %v3265_v17  ;;  %2909 = vmatprep.mubr.msk.bf16.mxu1 %vm3266_vm1, %v3265_v17 }
 0x18d   : > { %2902 = vmatpush3.bf16.msra.mxu0 %v3164_v36 }
 0x18e   : > { %2913 = vmatprep.subr.bf16.mxu0 %v3265_v17 }
 0x190   : > { %2904 = vmatmul.mubr.msk.bf16.vlgmr.msra.gmra.mrb[4].mxu0 %vm768_vm0, %v811_v35 }
 0x191   : > { %2915 = vmatprep.mubr.msk.bf16.mxu0 %vm3266_vm1, %v3265_v17 }
 0x25b   : > { %v861_v37 = vpop.f32.mrb[0].mxu0  ;;  %v913_v38 = vpop.f32.mrb[0].mxu1 }
 0x25c   : > { %v3507_v39 = vpack.c.bf16 %v913_v38, %v913_v38  ;;  %v2889_v40 = vpop.f32.mrb[1].mxu0  ;;  %v2897_v41 = vpop.f32.mrb[1].mxu1  ;;  %v3514_v48 = vpack.c.bf16 %v861_v37, %v861_v37 }
 0x25d   : > { %v864_v42 = vpop.f32.mrb[2].mxu0  ;;  %v916_v43 = vpop.f32.mrb[2].mxu1 }
 0x25e   : > { %1135 = vrot.lane.b32.xlu0 %v3507_v39, %s3267_s2  ;;  %v2890_v44 = vpop.f32.mrb[3].mxu0  ;;  %v2898_v45 = vpop.f32.mrb[3].mxu1  ;;  %v980_v46 = vsel %vm975_vm4, %v3507_v39, 0 }
 0x25f   : > { %2908 = vmatpush3.bf16.xpose.msra.mxu1 %v980_v46 }
 0x260   : > { %2919 = vmatprep.subr.bf16.mxu1 %v3265_v17 }
 0x263   : > { %v965_v47 = vpop.f32.mrb[4].mxu0 }
 0x264   : > { %v3516_v49 = vpack.c.bf16 %v965_v47, %v965_v47  ;;  %v2905_v50 = vpop.f32.mrb[5].mxu0 }
 0x265   : > { %v968_v51 = vpop.f32.mrb[6].mxu0 }
 0x266   : > { %v2906_v52 = vpop.f32.mrb[7].mxu0  ;;  %2910 = vmatmul.mubr.msk.bf16.vlgmr.msra.gmra.mrb[4].mxu1 %vm975_vm4, %v3514_v48  ;;  %v1041_v53 = vsel %vm1039_vm5, %v3516_v49, 0 }
 0x267   : > { %2914 = vmatpush3.bf16.msra.mxu0 %v1041_v53  ;;  %2921 = vmatprep.mubr.msk.bf16.mxu1 %vm3266_vm1, %v3265_v17 }
 0x268   : > { %2925 = vmatprep.subr.bf16.mxu0 %v3265_v17  ;;  %2920 = vmatpush3.bf16.msra.mxu1 %v1088_v15 }
 0x269   : > { %2931 = vmatprep.subr.bf16.mxu1 %v3265_v17 }
 0x2d0   : > { %v1136_v7 = vpop.permute.xlu0 %1135 }
 0x2d1   : > { %v1141_v10 = vsel %vm975_vm4, %v1136_v7, 0 }
 0x339   : > { %v1016_v55 = vpop.f32.mrb[4].mxu1 }
 0x33a   : > { %v1022_v56 = vmul.f32 0.35355338, %v1016_v55  ;;  %v2911_v57 = vpop.f32.mrb[5].mxu1 }
 0x33b   : > { %v1019_v58 = vpop.f32.mrb[6].mxu1 }
 0x33c   : > { %v2912_v59 = vpop.f32.mrb[7].mxu1  ;;  %v1023_v60 = vsel %vm971_vm6, %v1022_v56, -1e+09 }
 0x33d   : > { %v1024_v61 = vsel %vm975_vm4, %v1023_v60, -inf }
 0x33e   : > { %1025 = vmax.xlane.f32.xlu1 %v1024_v61 }
 0x3cb   : > { %v1026_v62 = vpop.xlane.xlu1 %1025 }
 0x3cc   : > { %v1027_v63 = vsub.f32 %v1023_v60, %v1026_v62 }
 0x3ce   : > { %v1028_v0 = vmul.f32 1.442695, %v1027_v63 }
 0x3d0   : > { %3181 = vpow2.f32 %v1028_v0 }
 0x3da   : > { %v3182_v1 = vpop.eup %3181 }
 0x3db   : > { %v1030_v2 = vsel %vm975_vm4, %v3182_v1, 0.0 }
 0x3dc   : > { %1031 = vadd.xlane.f32.xlu1 %v1030_v2 }
 0x3ed   : > { %1132 = vrot.lane.b32.xlu1 %v3514_v48, %s3267_s2 }
 0x3f1   : > { %1296 = vrot.lane.b32.xlu1 %v3507_v39, %s3268_s0 }
 0x3f5   : > { %1294 = vrot.lane.b32.xlu1 %v3514_v48, %s3268_s0 }
 0x469   : > { %v1032_v3 = vpop.xlane.xlu1 %1031 }
 0x46a   : > { %3183 = vrcp.f32 %v1032_v3 }
 0x46d   : > { %v1133_v9 = vpop.permute.xlu1 %1132 }
 0x471   : > { %v1297_v11 = vpop.permute.xlu1 %1296 }
 0x472   : > { %v1302_v12 = vsel %vm975_vm4, %v1297_v11, 0  ;;  %v808_v11 = vld [vmem:[%s3838_s9 + $0x4] sm:$0xf] }
 0x474   : > { %v3184_v4 = vpop.eup %3183 }
 0x475   : > { %v1034_v5 = vmul.f32 %v3184_v4, %v3182_v1  ;;  %v1295_v13 = vpop.permute.xlu1 %1294 }
 0x477   : > { %v1035_v8 = vpack.c.bf16 %v1034_v5, %v1034_v5 }
 0x479   : > { %2916 = vmatmul.mubr.msk.bf16.vlgmr.msra.gmra.mrb[8].mxu0 %vm975_vm4, %v1035_v8 }
 0x47a   : > { %2926 = vmatpush3.bf16.xpose.msra.mxu0 %v1141_v10  ;;  %2927 = vmatprep.mubr.msk.bf16.mxu0 %vm3266_vm1, %v3265_v17 }
 0x47b   : > { %2943 = vmatprep.subr.bf16.mxu0 %v3265_v17 }
 0x481   : > { %2928 = vmatmul.mubr.msk.bf16.vlgmr.msra.gmra.mrb[12].mxu0 %vm975_vm4, %v1133_v9 }
 0x482   : > { %2944 = vmatpush3.bf16.xpose.msra.mxu0 %v1302_v12  ;;  %2945 = vmatprep.mubr.msk.bf16.mxu0 %vm3266_vm1, %v3265_v17  ;;  %v1251_v12 = vsel %vm1039_vm5, %v808_v11, 0 }
 0x483   : > { %2949 = vmatprep.subr.bf16.mxu0 %v3265_v17 }
 0x489   : > { %2946 = vmatmul.mubr.msk.bf16.vlgmr.msra.gmra.mrb[16].mxu0 %vm975_vm4, %v1295_v13 }
 0x48a   : > { %2951 = vmatprep.mubr.msk.bf16.mxu0 %vm3266_vm1, %v3265_v17 }
 0x54c   : > { %v1077_v16 = vpop.f32.mrb[8].mxu0 }
 0x54d   : > { %v1083_v18 = vpack.c.bf16 %v1077_v16, %v1077_v16  ;;  %v2917_v19 = vpop.f32.mrb[9].mxu0 }
 0x54e   : > { %v1080_v20 = vpop.f32.mrb[10].mxu0 }
 0x54f   : > { %v2918_v21 = vpop.f32.mrb[11].mxu0  ;;  %2922 = vmatmul.mubr.msk.bf16.vlgmr.msra.gmra.mrb[8].mxu1 %vm975_vm4, %v1083_v18  ;;  %v809_v18 = vld [vmem:[%s3838_s9 + $0x8] sm:$0xf] }
 0x550   : > { %2933 = vmatprep.mubr.msk.bf16.mxu1 %vm3266_vm1, %v3265_v17 }
 0x554   : > { %v1177_v22 = vpop.f32.mrb[12].mxu0 }
 0x555   : > { %v2929_v23 = vpop.f32.mrb[13].mxu0  ;;  %v1183_v41 = vmul.f32 0.35355338, %v1177_v22  ;;  %v1411_v22 = vsel %vm1039_vm5, %v809_v18, 0 }
 0x556   : > { %v1180_v24 = vpop.f32.mrb[14].mxu0 }
 0x557   : > { %v2930_v25 = vpop.f32.mrb[15].mxu0  ;;  %v1184_v42 = vsel %vm971_vm6, %v1183_v41, -1e+09 }
 0x558   : > { %v1185_v43 = vsel %vm975_vm4, %v1184_v42, -inf }
 0x55c   : > { %v1338_v26 = vpop.f32.mrb[16].mxu0 }
 0x55d   : > { %v1344_v27 = vmul.f32 0.35355338, %v1338_v26  ;;  %v2947_v28 = vpop.f32.mrb[17].mxu0 }
 0x55e   : > { %v1341_v29 = vpop.f32.mrb[18].mxu0 }
 0x55f   : > { %v2948_v30 = vpop.f32.mrb[19].mxu0  ;;  %v1345_v31 = vsel %vm971_vm6, %v1344_v27, -1e+09  ;;  %v810_v29 = vld [vmem:[%s3838_s9 + $0xc] sm:$0xf] }
 0x560   : > { %v1346_v32 = vsel %vm975_vm4, %v1345_v31, -inf }
 0x561   : > { %1347 = vmax.xlane.f32.xlu0 %v1346_v32  ;;  %v1571_v32 = vsel %vm1039_vm5, %v810_v29, 0 }
 0x577   : > { %1358 = vrot.lane.b32.xlu0 %v3516_v49, %s3268_s0 }
 0x57b   : > { %1454 = vrot.lane.b32.xlu0 %v3514_v48, %s3269_s6 }
 0x5ee   : > { %v1348_v33 = vpop.xlane.xlu0 %1347 }
 0x5ef   : > { %v1349_v34 = vsub.f32 %v1345_v31, %v1348_v33 }
 0x5f1   : > { %v1350_v35 = vmul.f32 1.442695, %v1349_v34 }
 0x5f2   : > { %v1359_v36 = vpop.permute.xlu0 %1358 }
 0x5f3   : > { %3185 = vpow2.f32 %v1350_v35  ;;  %v1364_v37 = vsel %vm1039_vm5, %v1359_v36, 0 }
 0x5f4   : > { %2950 = vmatpush3.bf16.msra.mxu0 %v1364_v37 }
 0x5f5   : > { %2961 = vmatprep.subr.bf16.mxu0 %v3265_v17 }
 0x5fd   : > { %v3186_v38 = vpop.eup %3185 }
 0x5fe   : > { %v1352_v40 = vsel %vm975_vm4, %v3186_v38, 0.0 }
 0x5ff   : > { %1353 = vadd.xlane.f32.xlu1 %v1352_v40 }
 0x610   : > { %1456 = vrot.lane.b32.xlu1 %v3507_v39, %s3269_s6  ;;  %v1455_v39 = vpop.permute.xlu0 %1454 }
 0x634   : > { %1186 = vmax.xlane.f32.xlu1 %v1185_v43 }
 0x68c   : > { %v1354_v44 = vpop.xlane.xlu1 %1353 }
 0x68d   : > { %3187 = vrcp.f32 %v1354_v44 }
 0x690   : > { %v1457_v47 = vpop.permute.xlu1 %1456 }
 0x691   : > { %v1462_v50 = vsel %vm975_vm4, %v1457_v47, 0 }
 0x697   : > { %v3188_v45 = vpop.eup %3187 }
 0x698   : > { %v1356_v46 = vmul.f32 %v3188_v45, %v3186_v38  ;;  %v1614_v38 = vld [vmem:[#allocation4] sm:$0x1] }
 0x699   : > { %3125 = vpush %v1614_v38 }
 0x69a   : > { %v1357_v48 = vpack.c.bf16 %v1356_v46, %v1356_v46  ;;  %v1616_v46 = vld [vmem:[#allocation5] sm:$0x1] }
 0x69b   : > { %3127 = vpush %v1616_v46 }
 0x69c   : > { %2952 = vmatmul.mubr.msk.bf16.vlgmr.msra.gmra.mrb[20].mxu0 %vm975_vm4, %v1357_v48 }
 0x69d   : > { %2962 = vmatpush3.bf16.xpose.msra.mxu0 %v1462_v50  ;;  %2963 = vmatprep.mubr.msk.bf16.mxu0 %vm3266_vm1, %v3265_v17 }
 0x69e   : > { %2979 = vmatprep.subr.bf16.mxu0 %v3265_v17 }
 0x6a4   : > { %2964 = vmatmul.mubr.msk.bf16.vlgmr.msra.gmra.mrb[24].mxu0 %vm975_vm4, %v1455_v39 }
 0x6a5   : > { %2983 = vmatprep.mubr.msk.bf16.mxu0 %vm3266_vm1, %v3265_v17 }
 0x6c1   : > { %v1187_v51 = vpop.xlane.xlu1 %1186 }
 0x6c2   : > { %v1188_v52 = vsub.f32 %v1184_v42, %v1187_v51 }
 0x6c4   : > { %v1189_v53 = vmul.f32 1.442695, %v1188_v52  ;;  %v3165_v52 = vld [vmem:[%s3839_s12] sm:$0xff]  }
 0x6c5   : > { %2980 = vmatpush3.bf16.msra.mxu0 %v3165_v52 }
 0x6c6   : > { %3189 = vpow2.f32 %v1189_v53  ;;  %2981 = vmatprep.subr.bf16.mxu0 %v3265_v17 }
 0x6ca   : > { %s3126_s1 = spop %3125 }
 0x6cc   : > { %s3128_s24 = spop %3127 }
 0x6d0   : > { %v3190_v55 = vpop.eup %3189 }
 0x6d1   : > { %v1191_v56 = vsel %vm975_vm4, %v3190_v55, 0.0 }
 0x6d2   : > { %1192 = vadd.xlane.f32.xlu0 %v1191_v56 }
 0x6e8   : > { %1198 = vrot.lane.b32.xlu0 %v3516_v49, %s3267_s2 }
 0x75f   : > { %v1193_v57 = vpop.xlane.xlu0 %1192 }
 0x760   : > { %3191 = vrcp.f32 %v1193_v57 }
 0x763   : > { %v1199_v58 = vpop.permute.xlu0 %1198 }
 0x764   : > { %v1204_v59 = vsel %vm1039_vm5, %v1199_v58, 0 }
 0x765   : > { %2932 = vmatpush3.bf16.msra.mxu1 %v1204_v59 }
 0x766   : > { %2937 = vmatprep.subr.bf16.mxu1 %v3265_v17 }
 0x76a   : > { %v3192_v60 = vpop.eup %3191 }
 0x76b   : > { %v1195_v61 = vmul.f32 %v3192_v60, %v3190_v55 }
 0x76d   : > { %v1196_v62 = vpack.c.bf16 %v1195_v61, %v1195_v61 }
 0x76f   : > { %2934 = vmatmul.mubr.msk.bf16.vlgmr.msra.gmra.mrb[12].mxu1 %vm975_vm4, %v1196_v62  ;;  %v1400_v63 = vpop.f32.mrb[20].mxu0  ;;  %v1637_v62 = vstv %s3126_s1 }
 0x770   : > { %v2953_v0 = vpop.f32.mrb[21].mxu0  ;;  %2939 = vmatprep.mubr.msk.bf16.mxu1 %vm3266_vm1, %v3265_v17  ;;  %2938 = vmatpush3.bf16.msra.mxu1 %v1251_v12 }
 0x771   : > { %v1403_v1 = vpop.f32.mrb[22].mxu0  ;;  %2955 = vmatprep.subr.bf16.mxu1 %v3265_v17 }
 0x772   : > { %v2954_v2 = vpop.f32.mrb[23].mxu0  ;;  %v1640_v1 = vstv %s3128_s24 }
 0x777   : > { %v1498_v3 = vpop.f32.mrb[24].mxu0 }
 0x778   : > { %v1504_v4 = vmul.f32 0.35355338, %v1498_v3  ;;  %v2965_v5 = vpop.f32.mrb[25].mxu0 }
 0x779   : > { %v1501_v7 = vpop.f32.mrb[26].mxu0 }
 0x77a   : > { %v2966_v8 = vpop.f32.mrb[27].mxu0  ;;  %v1505_v9 = vsel %vm971_vm6, %v1504_v4, -1e+09  ;;  %v3167_v4 = vld [vmem:[%s3840_s13] sm:$0xff]   ;;  %v3168_v7 = vld [vmem:[%s3840_s13 + $0x8] sm:$0xff]  }
 0x77b   : > { %v1506_v10 = vsel %vm975_vm4, %v1505_v9, -inf  ;;  %v762_v8 = vld [vmem:[%s747_s29] sm:$0xff] }
 0x77c   : > { %1507 = vmax.xlane.f32.xlu1 %v1506_v10 }
 0x809   : > { %v1508_v13 = vpop.xlane.xlu1 %1507 }
 0x80a   : > { %v1509_v14 = vsub.f32 %v1505_v9, %v1508_v13  ;;  %v763_v9 = vld [vmem:[%s747_s29 + $0x8] sm:$0xff] }
 0x80b   : > { %v1660_v10 = vpack.c.bf16 %v763_v9, %v762_v8 }
 0x80c   : > { %v1510_v15 = vmul.f32 1.442695, %v1509_v14 }
 0x80e   : > { %3193 = vpow2.f32 %v1510_v15 }
 0x818   : > { %v3194_v16 = vpop.eup %3193 }
 0x819   : > { %v1512_v54 = vsel %vm975_vm4, %v3194_v16, 0.0 }
 0x81a   : > { %1513 = vadd.xlane.f32.xlu1 %v1512_v54 }
 0x82b   : > { %1518 = vrot.lane.b32.xlu1 %v3516_v49, %s3269_s6  ;;  %v1406_v49 = vpack.c.bf16 %v1400_v63, %v1400_v63 }
 0x842   : > { %v1240_v19 = vpop.f32.mrb[12].mxu1 }
 0x843   : > { %v1246_v20 = vpack.c.bf16 %v1240_v19, %v1240_v19  ;;  %v2935_v21 = vpop.f32.mrb[13].mxu1 }
 0x844   : > { %v1243_v23 = vpop.f32.mrb[14].mxu1 }
 0x845   : > { %v2936_v24 = vpop.f32.mrb[15].mxu1  ;;  %2940 = vmatmul.mubr.msk.bf16.vlgmr.msra.gmra.mrb[8].mxu1 %vm975_vm4, %v1246_v20  ;;  %v3170_v23 = vld [vmem:[%s3841_s14 + $0x8] sm:$0xff]  }
 0x846   : > { %2956 = vmatpush3.bf16.msra.mxu1 %v1411_v22  ;;  %2957 = vmatprep.mubr.msk.bf16.mxu1 %vm3266_vm1, %v3265_v17  ;;  %v3169_v22 = vld [vmem:[%s3841_s14] sm:$0xff]  }
 0x847   : > { %2967 = vmatprep.subr.bf16.mxu1 %v3265_v17  ;;  %v3691_v24 = vld [vmem:[%s751_s27] sm:$0xff] }
 0x848   : > { %vm1825_vm9 = vcmp.ne.f32.partialorder %v3691_v24, 0.0 }
 0x851   : > { %2958 = vmatmul.mubr.msk.bf16.vlgmr.msra.gmra.mrb[8].mxu1 %vm975_vm4, %v1406_v49 }
 0x852   : > { %2969 = vmatprep.mubr.msk.bf16.mxu1 %vm3266_vm1, %v3265_v17 }
 0x8a7   : > { %v1514_v25 = vpop.xlane.xlu1 %1513 }
 0x8a8   : > { %3195 = vrcp.f32 %v1514_v25 }
 0x8ab   : > { %v1519_v26 = vpop.permute.xlu1 %1518 }
 0x8ac   : > { %v1524_v27 = vsel %vm1039_vm5, %v1519_v26, 0 }
 0x8ad   : > { %2968 = vmatpush3.bf16.msra.mxu1 %v1524_v27 }
 0x8ae   : > { %2973 = vmatprep.subr.bf16.mxu1 %v3265_v17 }
 0x8b2   : > { %v3196_v28 = vpop.eup %3195 }
 0x8b3   : > { %v1516_v30 = vmul.f32 %v3196_v28, %v3194_v16 }
 0x8b5   : > { %v1517_v31 = vpack.c.bf16 %v1516_v30, %v1516_v30 }
 0x8b7   : > { %2970 = vmatmul.mubr.msk.bf16.vlgmr.msra.gmra.mrb[16].mxu1 %vm975_vm4, %v1517_v31 }
 0x8b8   : > { %2974 = vmatpush3.bf16.msra.mxu1 %v1571_v32  ;;  %2975 = vmatprep.mubr.msk.bf16.mxu1 %vm3266_vm1, %v3265_v17 }
 0x8b9   : > { %2995 = vmatprep.subr.bf16.mxu1 %v3265_v17 }
 0x98a   : > { %v1560_v33 = vpop.f32.mrb[16].mxu1 }
 0x98b   : > { %v1566_v34 = vpack.c.bf16 %v1560_v33, %v1560_v33  ;;  %v2971_v35 = vpop.f32.mrb[17].mxu1 }
 0x98c   : > { %v1563_v36 = vpop.f32.mrb[18].mxu1 }
 0x98d   : > { %v2972_v37 = vpop.f32.mrb[19].mxu1  ;;  %2976 = vmatmul.mubr.msk.bf16.vlgmr.msra.gmra.mrb[8].mxu1 %vm975_vm4, %v1566_v34 }
 0x98e   : > { %2999 = vmatprep.mubr.msk.bf16.mxu1 %vm3266_vm1, %v3265_v17  ;;  %2996 = vmatpush3.bf16.msra.mxu1 %v3169_v22 }
 0x98f   : > { %2997 = vmatprep.subr.bf16.mxu1 %v3265_v17 }
 0x992   : > { %2998 = vmatpush3.bf16.msra.mxu1 %v3170_v23 }
 0x993   : > { %3009 = vmatprep.subr.bf16.mxu1 %v3265_v17 }
 0x995   : > { %3000 = vmatmul.mubr.msk.bf16.vlgmr.msra.gmra.mrb[20].mxu1 %vm768_vm0, %v1660_v10 }
 0x996   : > { %3011 = vmatprep.mubr.msk.bf16.mxu1 %vm3266_vm1, %v3265_v17 }
 0xa60   : > { %v3629_v40 = vpop.f32.mrb[8].mxu1 }
 0xa61   : > { %v3095_v41 = vadd.f32 %v3629_v40, %v3462_v6  ;;  %v2977_v42 = vpop.f32.mrb[9].mxu1  ;;  %v3166_v6 = vld [vmem:[%s3839_s12 + $0x8] sm:$0xff]  }
 0xa62   : > { %v1610_v43 = vpop.f32.mrb[10].mxu1  ;;  %2982 = vmatpush3.bf16.msra.mxu0 %v3166_v6  ;;  %v1655_v6 = vld [vmem:[%s3842_s15] sm:$0xf] }
 0xa63   : > { %v2978_v44 = vpop.f32.mrb[11].mxu1  ;;  %v1618_v45 = vsel %vm768_vm0, %v3095_v41, 0.0  ;;  %2987 = vmatprep.subr.bf16.mxu0 %v3265_v17 }
 0xa64   : > { %1619 = vadd.xlane.f32.xlu0 %v1618_v45 }
 0xa68   : > { %v1818_v31 = vpop.f32.mrb[20].mxu1 }
 0xa69   : > { %v3001_v32 = vpop.f32.mrb[21].mxu1 }
 0xa6a   : > { %v1821_v38 = vpop.f32.mrb[22].mxu1 }
 0xa6b   : > { %v3698_v42 = vpack.c.bf16 %v1821_v38, %v1818_v31 }
 0xa6d   : > { %3010 = vmatpush3.bf16.msra.mxu1 %v3698_v42 }
 0xa6e   : > { %3021 = vmatprep.subr.bf16.mxu1 %v3265_v17 }
 0xaf1   : > { %v1620_v47 = vpop.xlane.xlu0 %1619 }
 0xaf2   : > { %v1621_v48 = vmul.f32 0.03125, %v1620_v47 }
 0xaf4   : > { %v1622_v50 = vsub.f32 %v3095_v41, %v1621_v48  ;;  %v3002_v41 = vpop.f32.mrb[23].mxu1 }
 0xaf6   : > { %v1623_v39 = vmul.f32 %v1622_v50, %v1622_v50  ;;  %v1638_v63 = vmul.f32 %v1637_v62, %v1622_v50 }
 0xaf8   : > { %v1624_v51 = vsel %vm768_vm0, %v1623_v39, 0.0 }
 0xaf9   : > { %1625 = vadd.xlane.f32.xlu1 %v1624_v51 }
 0xb86   : > { %v1626_v53 = vpop.xlane.xlu1 %1625 }
 0xb87   : > { %v1627_v55 = vmul.f32 0.032258064, %v1626_v53  ;;  %v1938_v53 = vsel %vm1039_vm5, %v1655_v6, 0 }
 0xb89   : > { %3197 = vrsqrt.f32 %v1627_v55  ;;  %vm1630_vm7 = vcmp.eq.f32.partialorder %v1627_v55, inf  ;;  %v1633_v58 = vand.u32 2147483648, %v1627_v55  ;;  %vm1632_vm8 = vcmp.eq.f32.partialorder %v1627_v55, 0.0 }
 0xb93   : > { %v3198_v56 = vpop.eup %3197 }
 0xb94   : > { %v1629_v57 = vmul.f32 %v3198_v56, %v1627_v55 }
 0xb96   : > { %v1631_v59 = vsel %vm1630_vm7, %v1627_v55, %v1629_v57 }
 0xb97   : > { %v1634_v60 = vsel %vm1632_vm8, %v1633_v58, %v1631_v59 }
 0xb98   : > { %v1635_v61 = vadd.f32 1e-06, %v1634_v60 }
 0xb9a   : > { %3199 = vrcp.f32 %v1635_v61 }
 0xba4   : > { %v3200_v0 = vpop.eup %3199 }
 0xba5   : > { %v1639_v2 = vmul.f32 %v3200_v0, %v1638_v63 }
 0xba7   : > { %v1641_v3 = vadd.f32 %v1640_v1, %v1639_v2 }
 0xba9   : > { %v1659_v5 = vpack.c.bf16 %v1641_v3, %v1641_v3 }
 0xbab   : > { %2984 = vmatmul.mubr.msk.bf16.vlgmr.msra.gmra.mrb[28].mxu0 %vm768_vm0, %v1659_v5 }
 0xbac   : > { %2988 = vmatpush3.bf16.msra.mxu0 %v3167_v4  ;;  %2991 = vmatprep.mubr.msk.bf16.mxu0 %vm3266_vm1, %v3265_v17 }
 0xbad   : > { %2989 = vmatprep.subr.bf16.mxu0 %v3265_v17 }
 0xbb0   : > { %2990 = vmatpush3.bf16.msra.mxu0 %v3168_v7 }
 0xbb1   : > { %3003 = vmatprep.subr.bf16.mxu0 %v3265_v17 }
 0xbb3   : > { %2992 = vmatmul.mubr.msk.bf16.vlgmr.msra.gmra.mrb[32].mxu0 %vm768_vm0, %v1660_v10 }
 0xbb4   : > { %3005 = vmatprep.mubr.msk.bf16.mxu0 %vm3266_vm1, %v3265_v17 }
 0xc7e   : > { %v1710_v11 = vpop.f32.mrb[28].mxu0 }
 0xc7f   : > { %v3661_v12 = vpack.c.bf16 %v1710_v11, %v1710_v11  ;;  %v2985_v13 = vpop.f32.mrb[29].mxu0 }
 0xc80   : > { %v1713_v14 = vpop.f32.mrb[30].mxu0 }
 0xc81   : > { %1982 = vrot.lane.b32.xlu1 %v3661_v12, %s3267_s2  ;;  %v2986_v15 = vpop.f32.mrb[31].mxu0 }
 0xc86   : > { %v1765_v16 = vpop.f32.mrb[32].mxu0 }
 0xc87   : > { %v2993_v54 = vpop.f32.mrb[33].mxu0 }
 0xc88   : > { %v1768_v18 = vpop.f32.mrb[34].mxu0 }
 0xc89   : > { %v3665_v19 = vpack.c.bf16 %v1768_v18, %v1765_v16  ;;  %v2994_v20 = vpop.f32.mrb[35].mxu0 }
 0xc8b   : > { %2144 = vrot.lane.b32.xlu1 %v3665_v19, %s3268_s0  ;;  %v1833_v21 = vsel %vm975_vm4, %v3665_v19, 0 }
 0xc8c   : > { %3004 = vmatpush3.bf16.xpose.msra.mxu0 %v1833_v21 }
 0xc8d   : > { %3015 = vmatprep.subr.bf16.mxu0 %v3265_v17 }
 0xc93   : > { %3006 = vmatmul.mubr.msk.bf16.vlgmr.msra.gmra.mrb[36].mxu0 %vm975_vm4, %v3661_v12 }
 0xc94   : > { %3017 = vmatprep.mubr.msk.bf16.mxu0 %vm3266_vm1, %v3265_v17  ;;  %3016 = vmatpush3.bf16.msra.mxu0 %v1938_v53  ;;  %v1657_v53 = vld [vmem:[%s3842_s15 + $0x8] sm:$0xf] }
 0xc95   : > { %3027 = vmatprep.subr.bf16.mxu0 %v3265_v17 }
 0xcf3   : > { %v1983_v50 = vpop.permute.xlu1 %1982 }
 0xcfd   : > { %v2145_v39 = vpop.permute.xlu1 %2144 }
 0xcfe   : > { %v2150_v51 = vsel %vm975_vm4, %v2145_v39, 0 }
 0xd66   : > { %v1869_v49 = vpop.f32.mrb[36].mxu0 }
 0xd67   : > { %v1875_v25 = vmul.f32 0.35355338, %v1869_v49  ;;  %v3007_v26 = vpop.f32.mrb[37].mxu0 }
 0xd68   : > { %v1872_v27 = vpop.f32.mrb[38].mxu0 }
 0xd69   : > { %v3008_v28 = vpop.f32.mrb[39].mxu0  ;;  %v1876_v29 = vsel %vm1825_vm9, %v1875_v25, -1e+09 }
 0xd6a   : > { %v1878_v30 = vsel %vm1877_vm10, %v1876_v29, -inf }
 0xd6b   : > { %1879 = vmax.xlane.f32.xlu0 %v1878_v30 }
 0xdf8   : > { %v1880_v33 = vpop.xlane.xlu0 %1879 }
 0xdf9   : > { %v1881_v34 = vsub.f32 %v1876_v29, %v1880_v33 }
 0xdfb   : > { %v1882_v35 = vmul.f32 1.442695, %v1881_v34 }
 0xdfd   : > { %3201 = vpow2.f32 %v1882_v35 }
 0xe07   : > { %v3202_v36 = vpop.eup %3201 }
 0xe08   : > { %v1884_v37 = vsel %vm1877_vm10, %v3202_v36, 0.0 }
 0xe09   : > { %1885 = vadd.xlane.f32.xlu0 %v1884_v37 }
 0xe1f   : > { %1985 = vrot.lane.b32.xlu0 %v3665_v19, %s3267_s2 }
 0xe23   : > { %2142 = vrot.lane.b32.xlu0 %v3661_v12, %s3268_s0 }
 0xe96   : > { %v1886_v43 = vpop.xlane.xlu0 %1885 }
 0xe97   : > { %3203 = vrcp.f32 %v1886_v43 }
 0xe9a   : > { %v1986_v46 = vpop.permute.xlu0 %1985 }
 0xe9b   : > { %v1991_v48 = vsel %vm975_vm4, %v1986_v46, 0 }
 0xe9e   : > { %v2143_v52 = vpop.permute.xlu0 %2142 }
 0xea1   : > { %v3204_v44 = vpop.eup %3203 }
 0xea2   : > { %v1888_v45 = vmul.f32 %v3204_v44, %v3202_v36 }
 0xea4   : > { %v1889_v47 = vpack.c.bf16 %v1888_v45, %v1888_v45 }
 0xea6   : > { %3012 = vmatmul.mubr.msk.bf16.vlgmr.msra.gmra.mrb[24].mxu1 %vm1877_vm10, %v1889_v47 }
 0xea7   : > { %3022 = vmatpush3.bf16.xpose.msra.mxu1 %v1991_v48  ;;  %3023 = vmatprep.mubr.msk.bf16.mxu1 %vm3266_vm1, %v3265_v17  ;;  %v1656_v48 = vld [vmem:[%s3842_s15 + $0x4] sm:$0xf] }
 0xea8   : > { %3039 = vmatprep.subr.bf16.mxu1 %v3265_v17 }
 0xeae   : > { %3024 = vmatmul.mubr.msk.bf16.vlgmr.msra.gmra.mrb[28].mxu1 %vm975_vm4, %v1983_v50  ;;  %v2099_v50 = vsel %vm1039_vm5, %v1656_v48, 0  ;;  %v3174_v48 = vld [vmem:[%s3845_s20 + $0x8] sm:$0xff]  }
 0xeaf   : > { %3040 = vmatpush3.bf16.xpose.msra.mxu1 %v2150_v51  ;;  %3041 = vmatprep.mubr.msk.bf16.mxu1 %vm3266_vm1, %v3265_v17 }
 0xeb0   : > { %3045 = vmatprep.subr.bf16.mxu1 %v3265_v17 }
 0xeb6   : > { %3042 = vmatmul.mubr.msk.bf16.vlgmr.msra.gmra.mrb[32].mxu1 %vm975_vm4, %v2143_v52 }
 0xeb7   : > { %3047 = vmatprep.mubr.msk.bf16.mxu1 %vm3266_vm1, %v3265_v17 }
 0xf79   : > { %v1927_v55 = vpop.f32.mrb[24].mxu1 }
 0xf7a   : > { %v1933_v56 = vpack.c.bf16 %v1927_v55, %v1927_v55  ;;  %v3013_v57 = vpop.f32.mrb[25].mxu1 }
 0xf7b   : > { %v1930_v58 = vpop.f32.mrb[26].mxu1 }
 0xf7c   : > { %v3014_v59 = vpop.f32.mrb[27].mxu1  ;;  %3018 = vmatmul.mubr.msk.bf16.vlgmr.msra.gmra.mrb[40].mxu0 %vm975_vm4, %v1933_v56  ;;  %v2257_v58 = vsel %vm1039_vm5, %v1657_v53, 0 }
 0xf7d   : > { %3029 = vmatprep.mubr.msk.bf16.mxu0 %vm3266_vm1, %v3265_v17 }
 0xf81   : > { %v2027_v60 = vpop.f32.mrb[28].mxu1 }
 0xf82   : > { %v3025_v61 = vpop.f32.mrb[29].mxu1  ;;  %v2033_v14 = vmul.f32 0.35355338, %v2027_v60 }
 0xf83   : > { %v2030_v62 = vpop.f32.mrb[30].mxu1 }
 0xf84   : > { %v3026_v63 = vpop.f32.mrb[31].mxu1  ;;  %v2034_v15 = vsel %vm1825_vm9, %v2033_v14, -1e+09 }
 0xf85   : > { %v2035_v16 = vsel %vm1877_vm10, %v2034_v15, -inf }
 0xf89   : > { %v2186_v0 = vpop.f32.mrb[32].mxu1 }
 0xf8a   : > { %v2192_v1 = vmul.f32 0.35355338, %v2186_v0  ;;  %v3043_v2 = vpop.f32.mrb[33].mxu1  ;;  %v1658_v0 = vld [vmem:[%s3842_s15 + $0xc] sm:$0xf] }
 0xf8b   : > { %v2189_v3 = vpop.f32.mrb[34].mxu1 }
 0xf8c   : > { %v3044_v4 = vpop.f32.mrb[35].mxu1  ;;  %v2193_v5 = vsel %vm1825_vm9, %v2192_v1, -1e+09  ;;  %v2415_v3 = vsel %vm1039_vm5, %v1658_v0, 0 }
 0xf8d   : > { %v2194_v7 = vsel %vm1877_vm10, %v2193_v5, -inf }
 0xf8e   : > { %2195 = vmax.xlane.f32.xlu1 %v2194_v7 }
 0xf9f   : > { %2302 = vrot.lane.b32.xlu1 %v3665_v19, %s3269_s6 }
 0xfa3   : > { %2300 = vrot.lane.b32.xlu1 %v3661_v12, %s3269_s6 }
0x101b   : > { %v2196_v8 = vpop.xlane.xlu1 %2195 }
0x101c   : > { %v2197_v9 = vsub.f32 %v2193_v5, %v2196_v8 }
0x101e   : > { %v2198_v10 = vmul.f32 1.442695, %v2197_v9 }
0x101f   : > { %v2303_v20 = vpop.permute.xlu1 %2302 }
0x1020   : > { %3205 = vpow2.f32 %v2198_v10  ;;  %v2308_v22 = vsel %vm975_vm4, %v2303_v20, 0  ;;  %v2458_v10 = vld [vmem:[#allocation6] sm:$0x1] }
0x1021   : > { %3129 = vpush %v2458_v10 }
0x1023   : > { %v2301_v23 = vpop.permute.xlu1 %2300 }
0x102a   : > { %v3206_v11 = vpop.eup %3205 }
0x102b   : > { %v2200_v13 = vsel %vm1877_vm10, %v3206_v11, 0.0 }
0x102c   : > { %2201 = vadd.xlane.f32.xlu0 %v2200_v13 }
0x1042   : > { %2206 = vrot.lane.b32.xlu0 %v3698_v42, %s3268_s0 }
0x1061   : > { %2036 = vmax.xlane.f32.xlu0 %v2035_v16 }
0x1077   : > { %2048 = vrot.lane.b32.xlu0 %v3698_v42, %s3267_s2 }
0x10b9   : > { %v2202_v12 = vpop.xlane.xlu0 %2201 }
0x10ba   : > { %3207 = vrcp.f32 %v2202_v12 }
0x10bd   : > { %v2207_v54 = vpop.permute.xlu0 %2206 }
0x10be   : > { %3046 = vmatpush3.bf16.msra.mxu1 %v2207_v54 }
0x10bf   : > { %3057 = vmatprep.subr.bf16.mxu1 %v3265_v17 }
0x10c4   : > { %v3208_v18 = vpop.eup %3207 }
0x10c5   : > { %v2204_v19 = vmul.f32 %v3208_v18, %v3206_v11  ;;  %v3221_v11 = vld [vmem:[%s3459_s17] sm:$0xff]  ;;  %s3130_s17 = spop %3129 }
0x10c6   : > { %v1130_v13 = vadd.f32 nan, %v3221_v11 }
0x10c7   : > { %v2205_v21 = vpack.c.bf16 %v2204_v19, %v2204_v19 }
0x10c8   : > { %v1293_v14 = vadd.f32 nan, %v1130_v13 }
0x10c9   : > { %3048 = vmatmul.mubr.msk.bf16.vlgmr.msra.gmra.mrb[36].mxu1 %vm1877_vm10, %v2205_v21 }
0x10ca   : > { %3058 = vmatpush3.bf16.xpose.msra.mxu1 %v2308_v22  ;;  %3059 = vmatprep.mubr.msk.bf16.mxu1 %vm3266_vm1, %v3265_v17  ;;  %v2460_v22 = vld [vmem:[#allocation7] sm:$0x1] }
0x10cb   : > { %3075 = vmatprep.subr.bf16.mxu1 %v3265_v17  ;;  %3131 = vpush %v2460_v22 }
0x10d1   : > { %3060 = vmatmul.mubr.msk.bf16.vlgmr.msra.gmra.mrb[40].mxu1 %vm975_vm4, %v2301_v23 }
0x10d2   : > { %3079 = vmatprep.mubr.msk.bf16.mxu1 %vm3266_vm1, %v3265_v17 }
0x10ee   : > { %v2037_v49 = vpop.xlane.xlu0 %2036 }
0x10ef   : > { %v2038_v25 = vsub.f32 %v2034_v15, %v2037_v49  ;;  %v1453_v15 = vadd.f32 nan, %v1293_v14 }
0x10f1   : > { %v2039_v26 = vmul.f32 1.442695, %v2038_v25  ;;  %v1613_v16 = vadd.f32 %v3629_v40, %v1453_v15  ;;  %v3171_v40 = vld [vmem:[#allocation8] sm:$0xff]  }
0x10f2   : > { %v2049_v27 = vpop.permute.xlu0 %2048  ;;  %3076 = vmatpush3.bf16.msra.mxu1 %v3171_v40 }
0x10f3   : > { %3209 = vpow2.f32 %v2039_v26  ;;  %3028 = vmatpush3.bf16.msra.mxu0 %v2049_v27  ;;  %3077 = vmatprep.subr.bf16.mxu1 %v3265_v17 }
0x10f4   : > { %3033 = vmatprep.subr.bf16.mxu0 %v3265_v17 }
0x10fc   : > { %s3132_s1 = spop %3131 }
0x10fd   : > { %v3210_v28 = vpop.eup %3209 }
0x10fe   : > { %v2041_v29 = vsel %vm1877_vm10, %v3210_v28, 0.0 }
0x10ff   : > { %2042 = vadd.xlane.f32.xlu1 %v2041_v29 }
0x118c   : > { %v2043_v30 = vpop.xlane.xlu1 %2042 }
0x118d   : > { %3211 = vrcp.f32 %v2043_v30 }
0x1197   : > { %v3212_v31 = vpop.eup %3211 }
0x1198   : > { %v2045_v32 = vmul.f32 %v3212_v31, %v3210_v28  ;;  %v3172_v28 = vld [vmem:[#allocation8 + $0x8] sm:$0xff]  }
0x1199   : > { %3078 = vmatpush3.bf16.msra.mxu1 %v3172_v28 }
0x119a   : > { %v2046_v33 = vpack.c.bf16 %v2045_v32, %v2045_v32  ;;  %3083 = vmatprep.subr.bf16.mxu1 %v3265_v17 }
0x119c   : > { %3030 = vmatmul.mubr.msk.bf16.vlgmr.msra.gmra.mrb[44].mxu0 %vm1877_vm10, %v2046_v33  ;;  %v2246_v34 = vpop.f32.mrb[36].mxu1 }
0x119d   : > { %v3049_v35 = vpop.f32.mrb[37].mxu1  ;;  %3035 = vmatprep.mubr.msk.bf16.mxu0 %vm3266_vm1, %v3265_v17  ;;  %3034 = vmatpush3.bf16.msra.mxu0 %v2099_v50  ;;  %v3175_v50 = vld [vmem:[%s3845_s20 + $0x10] sm:$0xff]  }
0x119e   : > { %v2249_v36 = vpop.f32.mrb[38].mxu1  ;;  %3051 = vmatprep.subr.bf16.mxu0 %v3265_v17 }
0x119f   : > { %v3050_v37 = vpop.f32.mrb[39].mxu1 }
0x11a0   : > { %v2481_v37 = vstv %s3130_s17  ;;  %s759_s17 = scalar_lea.vmem %s3847_s22, %s3453_s25 }
0x11a4   : > { %v2344_v38 = vpop.f32.mrb[40].mxu1 }
0x11a5   : > { %v2350_v41 = vmul.f32 0.35355338, %v2344_v38  ;;  %v3061_v43 = vpop.f32.mrb[41].mxu1 }
0x11a6   : > { %v2347_v44 = vpop.f32.mrb[42].mxu1  ;;  %v2484_v43 = vstv %s3132_s1 }
0x11a7   : > { %v3062_v45 = vpop.f32.mrb[43].mxu1  ;;  %v2351_v46 = vsel %vm1825_vm9, %v2350_v41, -1e+09 }
0x11a8   : > { %v2352_v47 = vsel %vm1877_vm10, %v2351_v46, -inf }
0x11a9   : > { %2353 = vmax.xlane.f32.xlu1 %v2352_v47 }
0x1236   : > { %v2354_v39 = vpop.xlane.xlu1 %2353 }
0x1237   : > { %v2355_v51 = vsub.f32 %v2351_v46, %v2354_v39  ;;  %v3173_v46 = vld [vmem:[%s3845_s20] sm:$0xff]   ;;  %v3176_v39 = vld [vmem:[%s3845_s20 + $0x18] sm:$0xff]  }
0x1239   : > { %v2356_v52 = vmul.f32 1.442695, %v2355_v51  ;;  %v2796_v51 = vld [vmem:[%s3844_s19] ss:$0 sm:$0xff] }
0x123b   : > { %3213 = vpow2.f32 %v2356_v52 }
0x1245   : > { %v3214_v6 = vpop.eup %3213 }
0x1246   : > { %v2358_v24 = vsel %vm1877_vm10, %v3214_v6, 0.0 }
0x1247   : > { %2359 = vadd.xlane.f32.xlu1 %v2358_v24 }
0x1258   : > { %2364 = vrot.lane.b32.xlu1 %v3698_v42, %s3269_s6  ;;  %v2252_v42 = vpack.c.bf16 %v2246_v34, %v2246_v34 }
0x126f   : > { %v2088_v55 = vpop.f32.mrb[44].mxu0 }
0x1270   : > { %v2094_v56 = vpack.c.bf16 %v2088_v55, %v2088_v55  ;;  %v3031_v57 = vpop.f32.mrb[45].mxu0 }
0x1271   : > { %v2091_v59 = vpop.f32.mrb[46].mxu0 }
0x1272   : > { %v3032_v60 = vpop.f32.mrb[47].mxu0  ;;  %3036 = vmatmul.mubr.msk.bf16.vlgmr.msra.gmra.mrb[40].mxu0 %vm975_vm4, %v2094_v56 }
0x1273   : > { %3052 = vmatpush3.bf16.msra.mxu0 %v2257_v58  ;;  %3053 = vmatprep.mubr.msk.bf16.mxu0 %vm3266_vm1, %v3265_v17 }
0x1274   : > { %3063 = vmatprep.subr.bf16.mxu0 %v3265_v17 }
0x127e   : > { %3054 = vmatmul.mubr.msk.bf16.vlgmr.msra.gmra.mrb[40].mxu0 %vm975_vm4, %v2252_v42 }
0x127f   : > { %3065 = vmatprep.mubr.msk.bf16.mxu0 %vm3266_vm1, %v3265_v17 }
0x12d4   : > { %v2360_v61 = vpop.xlane.xlu1 %2359 }
0x12d5   : > { %3215 = vrcp.f32 %v2360_v61 }
0x12d8   : > { %v2365_v62 = vpop.permute.xlu1 %2364 }
0x12d9   : > { %3064 = vmatpush3.bf16.msra.mxu0 %v2365_v62 }
0x12da   : > { %3069 = vmatprep.subr.bf16.mxu0 %v3265_v17 }
0x12df   : > { %v3216_v63 = vpop.eup %3215 }
0x12e0   : > { %v2362_v1 = vmul.f32 %v3216_v63, %v3214_v6 }
0x12e2   : > { %v2363_v2 = vpack.c.bf16 %v2362_v1, %v2362_v1 }
0x12e4   : > { %3066 = vmatmul.mubr.msk.bf16.vlgmr.msra.gmra.mrb[48].mxu0 %vm1877_vm10, %v2363_v2 }
0x12e5   : > { %3070 = vmatpush3.bf16.msra.mxu0 %v2415_v3  ;;  %3071 = vmatprep.mubr.msk.bf16.mxu0 %vm3266_vm1, %v3265_v17 }
0x13b7   : > { %v2404_v4 = vpop.f32.mrb[48].mxu0 }
0x13b8   : > { %v2410_v5 = vpack.c.bf16 %v2404_v4, %v2404_v4  ;;  %v3067_v7 = vpop.f32.mrb[49].mxu0 }
0x13b9   : > { %v2407_v8 = vpop.f32.mrb[50].mxu0 }
0x13ba   : > { %v3068_v9 = vpop.f32.mrb[51].mxu0  ;;  %3072 = vmatmul.mubr.msk.bf16.vlgmr.msra.gmra.mrb[40].mxu0 %vm975_vm4, %v2410_v5 }
0x148d   : > { %v2451_v12 = vpop.f32.mrb[40].mxu0 }
0x148e   : > { %v3789_v54 = vadd.f32 %v2451_v12, %v1613_v16  ;;  %v3073_v18 = vpop.f32.mrb[41].mxu0 }
0x148f   : > { %v2454_v19 = vpop.f32.mrb[42].mxu0 }
0x1490   : > { %v3074_v20 = vpop.f32.mrb[43].mxu0  ;;  %v2462_v21 = vsel %vm768_vm0, %v3789_v54, 0.0 }
0x1491   : > { %2463 = vadd.xlane.f32.xlu0 %v2462_v21 }
0x151e   : > { %v2464_v23 = vpop.xlane.xlu0 %2463 }
0x151f   : > { %v2465_v49 = vmul.f32 0.03125, %v2464_v23 }
0x1521   : > { %v2466_v25 = vsub.f32 %v3789_v54, %v2465_v49 }
0x1523   : > { %v2467_v26 = vmul.f32 %v2466_v25, %v2466_v25  ;;  %v2482_v38 = vmul.f32 %v2481_v37, %v2466_v25 }
0x1525   : > { %v2468_v27 = vsel %vm768_vm0, %v2467_v26, 0.0 }
0x1526   : > { %2469 = vadd.xlane.f32.xlu1 %v2468_v27 }
0x15b3   : > { %v2470_v29 = vpop.xlane.xlu1 %2469 }
0x15b4   : > { %v2471_v30 = vmul.f32 0.032258064, %v2470_v29 }
0x15b6   : > { %3217 = vrsqrt.f32 %v2471_v30  ;;  %vm2474_vm11 = vcmp.eq.f32.partialorder %v2471_v30, inf  ;;  %v2477_v33 = vand.u32 2147483648, %v2471_v30  ;;  %vm2476_vm12 = vcmp.eq.f32.partialorder %v2471_v30, 0.0 }
0x15c0   : > { %v3218_v31 = vpop.eup %3217 }
0x15c1   : > { %v2473_v32 = vmul.f32 %v3218_v31, %v2471_v30 }
0x15c3   : > { %v2475_v34 = vsel %vm2474_vm11, %v2471_v30, %v2473_v32 }
0x15c4   : > { %v2478_v35 = vsel %vm2476_vm12, %v2477_v33, %v2475_v34 }
0x15c5   : > { %v2479_v36 = vadd.f32 1e-06, %v2478_v35 }
0x15c7   : > { %3219 = vrcp.f32 %v2479_v36 }
0x15d1   : > { %v3220_v41 = vpop.eup %3219 }
0x15d2   : > { %v2483_v44 = vmul.f32 %v3220_v41, %v2482_v38 }
0x15d4   : > { %v2485_v45 = vadd.f32 %v2484_v43, %v2483_v44 }
0x15d6   : > { %v2486_v47 = vpack.c.bf16 %v2485_v45, %v2485_v45 }
0x15d8   : > { %3080 = vmatmul.mubr.msk.bf16.vlgmr.msra.gmra.mrb[44].mxu1 %vm768_vm0, %v2486_v47 }
0x15d9   : > { %3084 = vmatpush3.bf16.msra.mxu1 %v3173_v46  ;;  %3091 = vmatprep.mubr.msk.bf16.mxu1 %vm3266_vm1, %v3265_v17 }
0x15da   : > { %3085 = vmatprep.subr.bf16.mxu1 %v3265_v17 }
0x15dd   : > { %3086 = vmatpush3.bf16.msra.mxu1 %v3174_v48 }
0x15de   : > { %3087 = vmatprep.subr.bf16.mxu1 %v3265_v17 }
0x15e1   : > { %3088 = vmatpush3.bf16.msra.mxu1 %v3175_v50 }
0x15e2   : > { %3089 = vmatprep.subr.bf16.mxu1 %v3265_v17  ;;  %v2800_v17 = vld [vmem:[%s3846_s21] ss:$0 sm:$0xff] }
0x15e5   : > { %3090 = vmatpush3.bf16.msra.mxu1 %v3176_v39 }
0x16ab   : > { %v2547_v52 = vpop.f32.mrb[44].mxu1 }
0x16ac   : > { %v2548_v6 = vadd.f32 %v2796_v51, %v2547_v52  ;;  %v3081_v24 = vpop.f32.mrb[45].mxu1 }
0x16ad   : > { %v2550_v53 = vpop.f32.mrb[46].mxu1 }
0x16ae   : > { %v2553_v55 = vmax.f32 %v2548_v6, 0.0  ;;  %v3082_v56 = vpop.f32.mrb[47].mxu1 }
0x16b0   : > { %v2554_v57 = vpack.c.bf16 %v2553_v55, %v2553_v55 }
0x16b2   : > { %3092 = vmatmul.mubr.msk.bf16.vlgmr.msra.gmra.mrb[48].mxu1 %vm2594_vm13, %v2554_v57 }
0x1785   : > { %v2632_v58 = vpop.f32.mrb[48].mxu1 }
0x1786   : > { %v2633_v59 = vadd.f32 %v2800_v17, %v2632_v58  ;;  %v3093_v60 = vpop.f32.mrb[49].mxu1 }
0x1787   : > { %v2635_v42 = vpop.f32.mrb[50].mxu1 }
0x1788   : > { %v2638_v61 = vadd.f32 %v3789_v54, %v2633_v59  ;;  %v3094_v62 = vpop.f32.mrb[51].mxu1 }
0x178a   : > { %2639 = vst.msk [vmem:[%s759_s17] sm:$0xff] %vm768_vm0, %v2638_v61 }
0x178b PF: > { %s45_s5 = sadd.s32 1, %s3260_s5  }
0x178c   : > { %p42_p3 = scmp.ge.s32.totalorder %s45_s5, 4  }
0x178e   :  { %44 = sbr.rel (!%p42_p3) target bundleno = 15 (0xf), region = 152 }
0x1795   :  { %2659 = vsyncpa [#allocation9], 1 }
0x1796   :  { %2661 = vsyncpa [#allocation9 + $0x1], 1 }

// kernel: decoder_forward.4
= control target key start
LH: loop header
LB: loop body
LE: loop exit
PB: predicated region body
PF: predicated region fallthrough
CT: control target
= control target key end

     0   :  { %s3720_s0 = inlined_call_operand.vmem [shape: f32[2,8,32], index: 0, kind: input, shape index: {}, may-alias: {0,22}]   ;;  %s3721_s1 = inlined_call_operand.vmem [shape: f32[2,16,32], index: 1, kind: input, shape index: {}]   ;;  %s3722_s2 = inlined_call_operand.vmem [shape: f32[2,8,16], index: 2, kind: input, shape index: {}]   ;;  %s3723_s3 = inlined_call_operand.vmem [shape: f32[2,8,8], index: 3, kind: input, shape index: {}]   ;;  %s3724_s4 = inlined_call_operand.<no memory space> [shape: f32[1,1], index: 4, kind: input, shape index: {}]   ;;  %s3725_s6 = inlined_call_operand.vmem [shape: bf16[32,32], index: 6, kind: input, shape index: {}]   ;;  %s3726_s7 = inlined_call_operand.vmem [shape: bf16[32,32], index: 7, kind: input, shape index: {}]   ;;  %s3727_s8 = inlined_call_operand.vmem [shape: bf16[32,32], index: 8, kind: input, shape index: {}]   ;;  %s3728_s9 = inlined_call_operand.vmem [shape: bf16[32,32], index: 9, kind: input, shape index: {}]   ;;  %s3729_s12 = inlined_call_operand.vmem [shape: bf16[32,32], index: 12, kind: input, shape index: {}]   ;;  %s3730_s13 = inlined_call_operand.vmem [shape: bf16[32,32], index: 13, kind: input, shape index: {}]   ;;  %s3731_s14 = inlined_call_operand.vmem [shape: bf16[32,32], index: 14, kind: input, shape index: {}]   ;;  %s3732_s15 = inlined_call_operand.vmem [shape: bf16[32,32], index: 15, kind: input, shape index: {}]   ;;  %s3733_s18 = inlined_call_operand.vmem [shape: bf16[32,64], index: 18, kind: input, shape index: {}]   ;;  %s3734_s19 = inlined_call_operand.vmem [shape: f32[1,64], index: 19, kind: input, shape index: {}]   ;;  %s3735_s20 = inlined_call_operand.vmem [shape: bf16[64,32], index: 20, kind: input, shape index: {}]   ;;  %s3736_s21 = inlined_call_operand.vmem [shape: f32[1,32], index: 21, kind: input, shape index: {}]   ;;  %s3737_s22 = inlined_call_operand.vmem [shape: f32[2,8,32], index: 22, kind: output, shape index: {}, may-alias: {0,22}]   ;;  %s3738_s5 = inlined_call_operand.<no memory space> [shape: f32[1,1], index: 5, kind: input, shape index: {}]   ;;  %s3739_s10 = inlined_call_operand.<no memory space> [shape: f32[1,1], index: 10, kind: input, shape index: {}]   ;;  %s3740_s11 = inlined_call_operand.<no memory space> [shape: f32[1,1], index: 11, kind: input, shape index: {}]   ;;  %s3741_s16 = inlined_call_operand.<no memory space> [shape: f32[1,1], index: 16, kind: input, shape index: {}]   ;;  %s3742_s17 = inlined_call_operand.<no memory space> [shape: f32[1,1], index: 17, kind: input, shape index: {}]  }
   0x1   :  { %3745 = sst [smem:[#allocation8_spill]] %s3720_s0  ;;  %v29_v1 = vstv %s3738_s5  ;;  %v31_v2 = vstv %s3739_s10  ;;  %v33_v3 = vstv %s3740_s11  ;;  %v35_v4 = vstv %s3741_s16  ;;  %s3326_s5 = smov 0  }
   0x2   :  { %3746 = sst [smem:[#allocation9_spill]] %s3721_s1  ;;  %30 = vst [vmem:[#allocation3] sm:$0x1] %v29_v1  ;;  %32 = vst [vmem:[#allocation4] sm:$0x1] %v31_v2  ;;  %v37_v5 = vstv %s3742_s17 }
   0x3   :  { %3747 = sst [smem:[#allocation10_spill]] %s3722_s2  ;;  %34 = vst [vmem:[#allocation5] sm:$0x1] %v33_v3  ;;  %36 = vst [vmem:[#allocation6] sm:$0x1] %v35_v4 }
   0x4   :  { %3748 = sst [smem:[#allocation11_spill]] %s3723_s3  ;;  %38 = vst [vmem:[#allocation7] sm:$0x1] %v37_v5 }
   0x5   :  { %3749 = sst [smem:[#allocation12_spill]] %s3724_s4 }
   0x6   :  { %3750 = sst [smem:[#allocation13_spill]] %s3725_s6  ;;  %s3752_s29 = sld [smem:[#allocation12_spill]] }
   0x7   :  { %3751 = sst [smem:[#allocation14_spill]] %s3726_s7 }
   0xc   :  { %v27_v0 = vstv %s3752_s29 }
   0xd   :  { %28 = vst [vmem:[#allocation2] sm:$0x1] %v27_v0 }
   0xe LB: > { %s2714_s10 = sadd.s32 4294967295, %s3186_s5   ;;  %p2718_p0 = scmp.ge.s32.totalorder %s3186_s5, 1  ;;  %s3186_s5 = sphi %s3326_s5, %s44_s5  }
   0xf   : > { %p651_p1 = scmp.lt.s32.totalorder %s3186_s5, 3 }
  0x11   : > { %p652_p2 = pnand %p2718_p0, %p651_p1 }
  0x12   : > { %p724_p3 = scmp.lt.s32.totalorder (!%p652_p2), %s2714_s10, 1  ;;  %vm753_vm0 = vcmask (!%p652_p2), 261120   ;;  %s3753_s2 = sld [smem:[#allocation8_spill]] (!%p652_p2)  ;;  %v751_v9 = vld [vmem:[#allocation3] sm:$0x1] (!%p652_p2)  ;;  %v3188_v17 = vmov (!%p652_p2), 0.0  }
  0x13   : > { %655 = sbr.rel (%p652_p2) target bundleno = 5993 (0x1769), region = 108  ;;  %s3754_s29 = sld [smem:[#allocation13_spill]] (!%p652_p2)  ;;  %2854 = vmatprep.subr.bf16.mxu0 (!%p652_p2), %v3188_v17  ;;  %2862 = vmatprep.subr.bf16.mxu1 (!%p652_p2), %v3188_v17  ;;  %vm3189_vm1 = vmmov (!%p652_p2), 0   ;;  %v3121_v34 = vld [vmem:[%s3727_s8] sm:$0xff] (!%p652_p2)   ;;  %v3122_v36 = vld [vmem:[%s3727_s8 + $0x8] sm:$0xff] (!%p652_p2)   ;;  %vm960_vm4 = vcmask (!%p652_p2), 64512  }
  0x14   : > { %v749_v6 = vld [vmem:[#allocation2] sm:$0x1] (!%p652_p2)  ;;  %s3755_s0 = sld [smem:[#allocation14_spill]] (!%p652_p2)  ;;  %2858 = vmatprep.mubr.msk.bf16.mxu0 (!%p652_p2), %vm3189_vm1, %v3188_v17  ;;  %2866 = vmatprep.mubr.msk.bf16.mxu1 (!%p652_p2), %vm3189_vm1, %v3188_v17  ;;  %s3190_s3 = smov (!%p652_p2), 120   ;;  %vm1024_vm5 = vcmask (!%p652_p2), 1043456   ;;  %vm1862_vm10 = vcmask (!%p652_p2), 130048  }
  0x15   : > { %3092 = vpush (!%p652_p2), %v749_v6  ;;  %s3756_s4 = sld [smem:[#allocation11_spill]] (!%p652_p2)  ;;  %s3191_s1 = smov (!%p652_p2), 112   ;;  %vm2579_vm13 = vcmask (!%p652_p2), 523264  }
  0x16   : > { %3094 = vpush (!%p652_p2), %v751_v9  ;;  %s3757_s30 = sld [smem:[#allocation9_spill]] (!%p652_p2) }
  0x19   : > { %v3117_v15 = vld [vmem:[%s3754_s29] sm:$0xff] (!%p652_p2)   ;;  %v3119_v18 = vld [vmem:[%s3754_s29 + $0x8] sm:$0xff] (!%p652_p2)  }
  0x1a   : > { %s3760_s10 = smov (!%p724_p3, %s2714_s10), 1  ;;  %v3118_v16 = vld [vmem:[%s3755_s0] sm:$0xff]   ;;  %2855 = vmatpush3.bf16.msra.mxu0 %v3117_v15  ;;  %v3120_v19 = vld [vmem:[%s3755_s0 + $0x8] sm:$0xff]  }
  0x1b   : > { %s3337_s11 = sshll.u32 %s3760_s10, 3  ;;  %2863 = vmatpush3.bf16.msra.mxu1 %v3118_v16  ;;  %2856 = vmatprep.subr.bf16.mxu0 %v3188_v17  ;;  %s2779_s26 = sshll.u32 %s3760_s10, 4 }
  0x1c   : > { %s3343_s27 = scalar_lea.vmem %s3753_s2, %s3337_s11  ;;  %2864 = vmatprep.subr.bf16.mxu1 %v3188_v17  ;;  %s740_s23 = scalar_lea.vmem %s3756_s4, %s3337_s11 }
  0x1d   : > { %v3346_v7 = vld [vmem:[%s3343_s27] sm:$0xff]  ;;  %s732_s4 = scalar_lea.vmem %s3757_s30, %s2779_s26  ;;  %s3758_s2 = sld [smem:[#allocation10_spill]] }
  0x1e   : > { %v754_v8 = vsel %vm753_vm0, %v3346_v7, 0.0  ;;  %2857 = vmatpush3.bf16.msra.mxu0 %v3119_v18  ;;  %v3413_v54 = vld [vmem:[%s740_s23] sm:$0xff] }
  0x1f   : > { %755 = vadd.xlane.f32.xlu0 %v754_v8  ;;  %2865 = vmatpush3.bf16.msra.mxu1 %v3120_v19  ;;  %vm956_vm6 = vcmp.ne.f32.partialorder %v3413_v54, 0.0 }
  0x20   : > { %2870 = vmatprep.subr.bf16.mxu0 %v3188_v17  ;;  %2878 = vmatprep.subr.bf16.mxu1 %v3188_v17 }
  0x23   : > { %s736_s28 = scalar_lea.vmem %s3758_s2, %s3337_s11 }
  0x46   : > { %s3093_s7 = spop %3092 }
  0x47   : > { %v774_v28 = vstv %s3093_s7  ;;  %s3095_s25 = spop %3094  ;;  %s3192_s7 = smov 104  }
  0x48   : > { %v777_v31 = vstv %s3095_s25 }
  0xac   : > { %v756_v10 = vpop.xlane.xlu0 %755 }
  0xad   : > { %v758_v11 = vmul.f32 0.03125, %v756_v10 }
  0xaf   : > { %v759_v12 = vsub.f32 %v3346_v7, %v758_v11 }
  0xb1   : > { %v760_v13 = vmul.f32 %v759_v12, %v759_v12  ;;  %v775_v29 = vmul.f32 %v774_v28, %v759_v12 }
  0xb3   : > { %v761_v14 = vsel %vm753_vm0, %v760_v13, 0.0 }
  0xb4   : > { %762 = vadd.xlane.f32.xlu0 %v761_v14  ;;  %v792_v14 = vld [vmem:[%s3728_s9] sm:$0xf] }
  0xb5   : > { %v1073_v15 = vsel %vm1024_vm5, %v792_v14, 0 }
 0x141   : > { %v763_v20 = vpop.xlane.xlu0 %762 }
 0x142   : > { %v764_v21 = vmul.f32 0.032258064, %v763_v20 }
 0x144   : > { %3135 = vrsqrt.f32 %v764_v21  ;;  %vm767_vm2 = vcmp.eq.f32.partialorder %v764_v21, inf  ;;  %v770_v24 = vand.u32 2147483648, %v764_v21  ;;  %vm769_vm3 = vcmp.eq.f32.partialorder %v764_v21, 0.0 }
 0x14e   : > { %v3136_v22 = vpop.eup %3135 }
 0x14f   : > { %v766_v23 = vmul.f32 %v3136_v22, %v764_v21 }
 0x151   : > { %v768_v25 = vsel %vm767_vm2, %v764_v21, %v766_v23 }
 0x152   : > { %v771_v26 = vsel %vm769_vm3, %v770_v24, %v768_v25 }
 0x153   : > { %v772_v27 = vadd.f32 1e-06, %v771_v26 }
 0x155   : > { %3137 = vrcp.f32 %v772_v27 }
 0x15f   : > { %v3138_v30 = vpop.eup %3137 }
 0x160   : > { %v776_v32 = vmul.f32 %v3138_v30, %v775_v29 }
 0x162   : > { %v778_v33 = vadd.f32 %v777_v31, %v776_v32 }
 0x164   : > { %v796_v35 = vpack.c.bf16 %v778_v33, %v778_v33 }
 0x166   : > { %2859 = vmatmul.mubr.msk.bf16.vlgmr.msra.gmra.mrb[0].mxu0 %vm753_vm0, %v796_v35  ;;  %2867 = vmatmul.mubr.msk.bf16.vlgmr.msra.gmra.mrb[0].mxu1 %vm753_vm0, %v796_v35 }
 0x167   : > { %2871 = vmatpush3.bf16.msra.mxu0 %v3121_v34  ;;  %2874 = vmatprep.mubr.msk.bf16.mxu0 %vm3189_vm1, %v3188_v17 }
 0x168   : > { %2872 = vmatprep.subr.bf16.mxu0 %v3188_v17  ;;  %2880 = vmatprep.mubr.msk.bf16.mxu1 %vm3189_vm1, %v3188_v17 }
 0x16b   : > { %2873 = vmatpush3.bf16.msra.mxu0 %v3122_v36 }
 0x16c   : > { %2884 = vmatprep.subr.bf16.mxu0 %v3188_v17 }
 0x16e   : > { %2875 = vmatmul.mubr.msk.bf16.vlgmr.msra.gmra.mrb[4].mxu0 %vm753_vm0, %v796_v35 }
 0x16f   : > { %2886 = vmatprep.mubr.msk.bf16.mxu0 %vm3189_vm1, %v3188_v17 }
 0x239   : > { %v846_v37 = vpop.f32.mrb[0].mxu0  ;;  %v898_v38 = vpop.f32.mrb[0].mxu1 }
 0x23a   : > { %v3391_v39 = vpack.c.bf16 %v898_v38, %v898_v38  ;;  %v2860_v40 = vpop.f32.mrb[1].mxu0  ;;  %v2868_v41 = vpop.f32.mrb[1].mxu1  ;;  %v3398_v48 = vpack.c.bf16 %v846_v37, %v846_v37 }
 0x23b   : > { %v849_v42 = vpop.f32.mrb[2].mxu0  ;;  %v901_v43 = vpop.f32.mrb[2].mxu1 }
 0x23c   : > { %1120 = vrot.lane.b32.xlu0 %v3391_v39, %s3190_s3  ;;  %v2861_v44 = vpop.f32.mrb[3].mxu0  ;;  %v2869_v45 = vpop.f32.mrb[3].mxu1  ;;  %v965_v46 = vsel %vm960_vm4, %v3391_v39, 0 }
 0x23d   : > { %2879 = vmatpush3.bf16.xpose.msra.mxu1 %v965_v46 }
 0x23e   : > { %2890 = vmatprep.subr.bf16.mxu1 %v3188_v17 }
 0x241   : > { %v950_v47 = vpop.f32.mrb[4].mxu0 }
 0x242   : > { %v3400_v49 = vpack.c.bf16 %v950_v47, %v950_v47  ;;  %v2876_v50 = vpop.f32.mrb[5].mxu0 }
 0x243   : > { %v953_v51 = vpop.f32.mrb[6].mxu0 }
 0x244   : > { %v2877_v52 = vpop.f32.mrb[7].mxu0  ;;  %2881 = vmatmul.mubr.msk.bf16.vlgmr.msra.gmra.mrb[4].mxu1 %vm960_vm4, %v3398_v48  ;;  %v1026_v53 = vsel %vm1024_vm5, %v3400_v49, 0 }
 0x245   : > { %2885 = vmatpush3.bf16.msra.mxu0 %v1026_v53  ;;  %2892 = vmatprep.mubr.msk.bf16.mxu1 %vm3189_vm1, %v3188_v17 }
 0x246   : > { %2896 = vmatprep.subr.bf16.mxu0 %v3188_v17  ;;  %2891 = vmatpush3.bf16.msra.mxu1 %v1073_v15 }
 0x247   : > { %2902 = vmatprep.subr.bf16.mxu1 %v3188_v17 }
 0x2ae   : > { %v1121_v6 = vpop.permute.xlu0 %1120 }
 0x2af   : > { %v1126_v10 = vsel %vm960_vm4, %v1121_v6, 0 }
 0x317   : > { %v1001_v55 = vpop.f32.mrb[4].mxu1 }
 0x318   : > { %v1007_v56 = vmul.f32 0.35355338, %v1001_v55  ;;  %v2882_v57 = vpop.f32.mrb[5].mxu1 }
 0x319   : > { %v1004_v58 = vpop.f32.mrb[6].mxu1 }
 0x31a   : > { %v2883_v59 = vpop.f32.mrb[7].mxu1  ;;  %v1008_v60 = vsel %vm956_vm6, %v1007_v56, -1e+09 }
 0x31b   : > { %v1009_v61 = vsel %vm960_vm4, %v1008_v60, -inf }
 0x31c   : > { %1010 = vmax.xlane.f32.xlu1 %v1009_v61 }
 0x3a9   : > { %v1011_v62 = vpop.xlane.xlu1 %1010 }
 0x3aa   : > { %v1012_v63 = vsub.f32 %v1008_v60, %v1011_v62 }
 0x3ac   : > { %v1013_v0 = vmul.f32 1.442695, %v1012_v63 }
 0x3ae   : > { %3139 = vpow2.f32 %v1013_v0 }
 0x3b8   : > { %v3140_v1 = vpop.eup %3139 }
 0x3b9   : > { %v1015_v2 = vsel %vm960_vm4, %v3140_v1, 0.0 }
 0x3ba   : > { %1016 = vadd.xlane.f32.xlu1 %v1015_v2 }
 0x3cb   : > { %1117 = vrot.lane.b32.xlu1 %v3398_v48, %s3190_s3 }
 0x3cf   : > { %1281 = vrot.lane.b32.xlu1 %v3391_v39, %s3191_s1 }
 0x3d3   : > { %1279 = vrot.lane.b32.xlu1 %v3398_v48, %s3191_s1 }
 0x447   : > { %v1017_v3 = vpop.xlane.xlu1 %1016 }
 0x448   : > { %3141 = vrcp.f32 %v1017_v3 }
 0x44b   : > { %v1118_v9 = vpop.permute.xlu1 %1117 }
 0x44f   : > { %v1282_v11 = vpop.permute.xlu1 %1281 }
 0x450   : > { %v1287_v12 = vsel %vm960_vm4, %v1282_v11, 0  ;;  %v793_v11 = vld [vmem:[%s3728_s9 + $0x4] sm:$0xf] }
 0x452   : > { %v3142_v4 = vpop.eup %3141 }
 0x453   : > { %v1019_v5 = vmul.f32 %v3142_v4, %v3140_v1  ;;  %v1280_v13 = vpop.permute.xlu1 %1279 }
 0x455   : > { %v1020_v8 = vpack.c.bf16 %v1019_v5, %v1019_v5 }
 0x457   : > { %2887 = vmatmul.mubr.msk.bf16.vlgmr.msra.gmra.mrb[8].mxu0 %vm960_vm4, %v1020_v8 }
 0x458   : > { %2897 = vmatpush3.bf16.xpose.msra.mxu0 %v1126_v10  ;;  %2898 = vmatprep.mubr.msk.bf16.mxu0 %vm3189_vm1, %v3188_v17 }
 0x459   : > { %2914 = vmatprep.subr.bf16.mxu0 %v3188_v17 }
 0x45f   : > { %2899 = vmatmul.mubr.msk.bf16.vlgmr.msra.gmra.mrb[12].mxu0 %vm960_vm4, %v1118_v9 }
 0x460   : > { %2915 = vmatpush3.bf16.xpose.msra.mxu0 %v1287_v12  ;;  %2916 = vmatprep.mubr.msk.bf16.mxu0 %vm3189_vm1, %v3188_v17  ;;  %v1236_v12 = vsel %vm1024_vm5, %v793_v11, 0 }
 0x461   : > { %2920 = vmatprep.subr.bf16.mxu0 %v3188_v17 }
 0x467   : > { %2917 = vmatmul.mubr.msk.bf16.vlgmr.msra.gmra.mrb[16].mxu0 %vm960_vm4, %v1280_v13 }
 0x468   : > { %2922 = vmatprep.mubr.msk.bf16.mxu0 %vm3189_vm1, %v3188_v17 }
 0x52a   : > { %v1062_v16 = vpop.f32.mrb[8].mxu0 }
 0x52b   : > { %v1068_v18 = vpack.c.bf16 %v1062_v16, %v1062_v16  ;;  %v2888_v19 = vpop.f32.mrb[9].mxu0 }
 0x52c   : > { %v1065_v20 = vpop.f32.mrb[10].mxu0 }
 0x52d   : > { %v2889_v21 = vpop.f32.mrb[11].mxu0  ;;  %2893 = vmatmul.mubr.msk.bf16.vlgmr.msra.gmra.mrb[8].mxu1 %vm960_vm4, %v1068_v18  ;;  %v794_v18 = vld [vmem:[%s3728_s9 + $0x8] sm:$0xf] }
 0x52e   : > { %2904 = vmatprep.mubr.msk.bf16.mxu1 %vm3189_vm1, %v3188_v17 }
 0x532   : > { %v1162_v22 = vpop.f32.mrb[12].mxu0 }
 0x533   : > { %v2900_v23 = vpop.f32.mrb[13].mxu0  ;;  %v1168_v41 = vmul.f32 0.35355338, %v1162_v22  ;;  %v1396_v22 = vsel %vm1024_vm5, %v794_v18, 0 }
 0x534   : > { %v1165_v24 = vpop.f32.mrb[14].mxu0 }
 0x535   : > { %v2901_v25 = vpop.f32.mrb[15].mxu0  ;;  %v1169_v42 = vsel %vm956_vm6, %v1168_v41, -1e+09 }
 0x536   : > { %v1170_v43 = vsel %vm960_vm4, %v1169_v42, -inf }
 0x53a   : > { %v1323_v26 = vpop.f32.mrb[16].mxu0 }
 0x53b   : > { %v1329_v27 = vmul.f32 0.35355338, %v1323_v26  ;;  %v2918_v28 = vpop.f32.mrb[17].mxu0 }
 0x53c   : > { %v1326_v29 = vpop.f32.mrb[18].mxu0 }
 0x53d   : > { %v2919_v30 = vpop.f32.mrb[19].mxu0  ;;  %v1330_v31 = vsel %vm956_vm6, %v1329_v27, -1e+09  ;;  %v795_v29 = vld [vmem:[%s3728_s9 + $0xc] sm:$0xf] }
 0x53e   : > { %v1331_v32 = vsel %vm960_vm4, %v1330_v31, -inf }
 0x53f   : > { %1332 = vmax.xlane.f32.xlu0 %v1331_v32  ;;  %v1556_v32 = vsel %vm1024_vm5, %v795_v29, 0 }
 0x555   : > { %1343 = vrot.lane.b32.xlu0 %v3400_v49, %s3191_s1 }
 0x559   : > { %1439 = vrot.lane.b32.xlu0 %v3398_v48, %s3192_s7 }
 0x5cc   : > { %v1333_v33 = vpop.xlane.xlu0 %1332 }
 0x5cd   : > { %v1334_v34 = vsub.f32 %v1330_v31, %v1333_v33 }
 0x5cf   : > { %v1335_v35 = vmul.f32 1.442695, %v1334_v34 }
 0x5d0   : > { %v1344_v36 = vpop.permute.xlu0 %1343 }
 0x5d1   : > { %3143 = vpow2.f32 %v1335_v35  ;;  %v1349_v37 = vsel %vm1024_vm5, %v1344_v36, 0 }
 0x5d2   : > { %2921 = vmatpush3.bf16.msra.mxu0 %v1349_v37 }
 0x5d3   : > { %2932 = vmatprep.subr.bf16.mxu0 %v3188_v17 }
 0x5db   : > { %v3144_v38 = vpop.eup %3143 }
 0x5dc   : > { %v1337_v40 = vsel %vm960_vm4, %v3144_v38, 0.0 }
 0x5dd   : > { %1338 = vadd.xlane.f32.xlu1 %v1337_v40 }
 0x5ee   : > { %1441 = vrot.lane.b32.xlu1 %v3391_v39, %s3192_s7  ;;  %v1440_v39 = vpop.permute.xlu0 %1439 }
 0x612   : > { %1171 = vmax.xlane.f32.xlu1 %v1170_v43 }
 0x66a   : > { %v1339_v44 = vpop.xlane.xlu1 %1338 }
 0x66b   : > { %3145 = vrcp.f32 %v1339_v44 }
 0x66e   : > { %v1442_v47 = vpop.permute.xlu1 %1441 }
 0x66f   : > { %v1447_v50 = vsel %vm960_vm4, %v1442_v47, 0 }
 0x675   : > { %v3146_v45 = vpop.eup %3145 }
 0x676   : > { %v1341_v46 = vmul.f32 %v3146_v45, %v3144_v38  ;;  %v1599_v38 = vld [vmem:[#allocation4] sm:$0x1] }
 0x677   : > { %3096 = vpush %v1599_v38 }
 0x678   : > { %v1342_v48 = vpack.c.bf16 %v1341_v46, %v1341_v46  ;;  %v1601_v46 = vld [vmem:[#allocation5] sm:$0x1] }
 0x679   : > { %3098 = vpush %v1601_v46 }
 0x67a   : > { %2923 = vmatmul.mubr.msk.bf16.vlgmr.msra.gmra.mrb[20].mxu0 %vm960_vm4, %v1342_v48 }
 0x67b   : > { %2933 = vmatpush3.bf16.xpose.msra.mxu0 %v1447_v50  ;;  %2934 = vmatprep.mubr.msk.bf16.mxu0 %vm3189_vm1, %v3188_v17 }
 0x67c   : > { %2950 = vmatprep.subr.bf16.mxu0 %v3188_v17 }
 0x682   : > { %2935 = vmatmul.mubr.msk.bf16.vlgmr.msra.gmra.mrb[24].mxu0 %vm960_vm4, %v1440_v39 }
 0x683   : > { %2954 = vmatprep.mubr.msk.bf16.mxu0 %vm3189_vm1, %v3188_v17 }
 0x69f   : > { %v1172_v51 = vpop.xlane.xlu1 %1171 }
 0x6a0   : > { %v1173_v52 = vsub.f32 %v1169_v42, %v1172_v51 }
 0x6a2   : > { %v1174_v53 = vmul.f32 1.442695, %v1173_v52  ;;  %v3123_v52 = vld [vmem:[%s3729_s12] sm:$0xff]  }
 0x6a3   : > { %2951 = vmatpush3.bf16.msra.mxu0 %v3123_v52 }
 0x6a4   : > { %3147 = vpow2.f32 %v1174_v53  ;;  %2952 = vmatprep.subr.bf16.mxu0 %v3188_v17 }
 0x6a8   : > { %s3097_s24 = spop %3096 }
 0x6aa   : > { %s3099_s25 = spop %3098 }
 0x6ae   : > { %v3148_v55 = vpop.eup %3147 }
 0x6af   : > { %v1176_v56 = vsel %vm960_vm4, %v3148_v55, 0.0 }
 0x6b0   : > { %1177 = vadd.xlane.f32.xlu0 %v1176_v56 }
 0x6c6   : > { %1183 = vrot.lane.b32.xlu0 %v3400_v49, %s3190_s3 }
 0x73d   : > { %v1178_v57 = vpop.xlane.xlu0 %1177 }
 0x73e   : > { %3149 = vrcp.f32 %v1178_v57 }
 0x741   : > { %v1184_v58 = vpop.permute.xlu0 %1183 }
 0x742   : > { %v1189_v59 = vsel %vm1024_vm5, %v1184_v58, 0 }
 0x743   : > { %2903 = vmatpush3.bf16.msra.mxu1 %v1189_v59 }
 0x744   : > { %2908 = vmatprep.subr.bf16.mxu1 %v3188_v17 }
 0x748   : > { %v3150_v60 = vpop.eup %3149 }
 0x749   : > { %v1180_v61 = vmul.f32 %v3150_v60, %v3148_v55 }
 0x74b   : > { %v1181_v62 = vpack.c.bf16 %v1180_v61, %v1180_v61 }
 0x74d   : > { %2905 = vmatmul.mubr.msk.bf16.vlgmr.msra.gmra.mrb[12].mxu1 %vm960_vm4, %v1181_v62  ;;  %v1385_v63 = vpop.f32.mrb[20].mxu0  ;;  %v1622_v62 = vstv %s3097_s24 }
 0x74e   : > { %v2924_v0 = vpop.f32.mrb[21].mxu0  ;;  %2910 = vmatprep.mubr.msk.bf16.mxu1 %vm3189_vm1, %v3188_v17  ;;  %2909 = vmatpush3.bf16.msra.mxu1 %v1236_v12 }
 0x74f   : > { %v1388_v1 = vpop.f32.mrb[22].mxu0  ;;  %2926 = vmatprep.subr.bf16.mxu1 %v3188_v17 }
 0x750   : > { %v2925_v2 = vpop.f32.mrb[23].mxu0  ;;  %v1625_v1 = vstv %s3099_s25 }
 0x755   : > { %v1483_v3 = vpop.f32.mrb[24].mxu0 }
 0x756   : > { %v1489_v4 = vmul.f32 0.35355338, %v1483_v3  ;;  %v2936_v5 = vpop.f32.mrb[25].mxu0 }
 0x757   : > { %v1486_v6 = vpop.f32.mrb[26].mxu0 }
 0x758   : > { %v2937_v8 = vpop.f32.mrb[27].mxu0  ;;  %v1490_v9 = vsel %vm956_vm6, %v1489_v4, -1e+09  ;;  %v3125_v4 = vld [vmem:[%s3730_s13] sm:$0xff]   ;;  %v3126_v6 = vld [vmem:[%s3730_s13 + $0x8] sm:$0xff]  }
 0x759   : > { %v1491_v10 = vsel %vm960_vm4, %v1490_v9, -inf  ;;  %v747_v8 = vld [vmem:[%s732_s4] sm:$0xff] }
 0x75a   : > { %1492 = vmax.xlane.f32.xlu1 %v1491_v10 }
 0x7e7   : > { %v1493_v13 = vpop.xlane.xlu1 %1492 }
 0x7e8   : > { %v1494_v14 = vsub.f32 %v1490_v9, %v1493_v13  ;;  %v748_v9 = vld [vmem:[%s732_s4 + $0x8] sm:$0xff] }
 0x7e9   : > { %v1645_v10 = vpack.c.bf16 %v748_v9, %v747_v8 }
 0x7ea   : > { %v1495_v15 = vmul.f32 1.442695, %v1494_v14 }
 0x7ec   : > { %3151 = vpow2.f32 %v1495_v15 }
 0x7f6   : > { %v3152_v16 = vpop.eup %3151 }
 0x7f7   : > { %v1497_v54 = vsel %vm960_vm4, %v3152_v16, 0.0 }
 0x7f8   : > { %1498 = vadd.xlane.f32.xlu1 %v1497_v54 }
 0x809   : > { %1503 = vrot.lane.b32.xlu1 %v3400_v49, %s3192_s7  ;;  %v1391_v49 = vpack.c.bf16 %v1385_v63, %v1385_v63 }
 0x820   : > { %v1225_v19 = vpop.f32.mrb[12].mxu1 }
 0x821   : > { %v1231_v20 = vpack.c.bf16 %v1225_v19, %v1225_v19  ;;  %v2906_v21 = vpop.f32.mrb[13].mxu1 }
 0x822   : > { %v1228_v23 = vpop.f32.mrb[14].mxu1 }
 0x823   : > { %v2907_v24 = vpop.f32.mrb[15].mxu1  ;;  %2911 = vmatmul.mubr.msk.bf16.vlgmr.msra.gmra.mrb[8].mxu1 %vm960_vm4, %v1231_v20  ;;  %v3128_v23 = vld [vmem:[%s3731_s14 + $0x8] sm:$0xff]  }
 0x824   : > { %2927 = vmatpush3.bf16.msra.mxu1 %v1396_v22  ;;  %2928 = vmatprep.mubr.msk.bf16.mxu1 %vm3189_vm1, %v3188_v17  ;;  %v3127_v22 = vld [vmem:[%s3731_s14] sm:$0xff]  }
 0x825   : > { %2938 = vmatprep.subr.bf16.mxu1 %v3188_v17  ;;  %v3575_v24 = vld [vmem:[%s736_s28] sm:$0xff] }
 0x826   : > { %vm1810_vm9 = vcmp.ne.f32.partialorder %v3575_v24, 0.0 }
 0x82f   : > { %2929 = vmatmul.mubr.msk.bf16.vlgmr.msra.gmra.mrb[8].mxu1 %vm960_vm4, %v1391_v49 }
 0x830   : > { %2940 = vmatprep.mubr.msk.bf16.mxu1 %vm3189_vm1, %v3188_v17 }
 0x885   : > { %v1499_v25 = vpop.xlane.xlu1 %1498 }
 0x886   : > { %3153 = vrcp.f32 %v1499_v25 }
 0x889   : > { %v1504_v26 = vpop.permute.xlu1 %1503 }
 0x88a   : > { %v1509_v27 = vsel %vm1024_vm5, %v1504_v26, 0 }
 0x88b   : > { %2939 = vmatpush3.bf16.msra.mxu1 %v1509_v27 }
 0x88c   : > { %2944 = vmatprep.subr.bf16.mxu1 %v3188_v17 }
 0x890   : > { %v3154_v28 = vpop.eup %3153 }
 0x891   : > { %v1501_v30 = vmul.f32 %v3154_v28, %v3152_v16 }
 0x893   : > { %v1502_v31 = vpack.c.bf16 %v1501_v30, %v1501_v30 }
 0x895   : > { %2941 = vmatmul.mubr.msk.bf16.vlgmr.msra.gmra.mrb[16].mxu1 %vm960_vm4, %v1502_v31 }
 0x896   : > { %2945 = vmatpush3.bf16.msra.mxu1 %v1556_v32  ;;  %2946 = vmatprep.mubr.msk.bf16.mxu1 %vm3189_vm1, %v3188_v17 }
 0x897   : > { %2966 = vmatprep.subr.bf16.mxu1 %v3188_v17 }
 0x968   : > { %v1545_v33 = vpop.f32.mrb[16].mxu1 }
 0x969   : > { %v1551_v34 = vpack.c.bf16 %v1545_v33, %v1545_v33  ;;  %v2942_v35 = vpop.f32.mrb[17].mxu1 }
 0x96a   : > { %v1548_v36 = vpop.f32.mrb[18].mxu1 }
 0x96b   : > { %v2943_v37 = vpop.f32.mrb[19].mxu1  ;;  %2947 = vmatmul.mubr.msk.bf16.vlgmr.msra.gmra.mrb[8].mxu1 %vm960_vm4, %v1551_v34 }
 0x96c   : > { %2970 = vmatprep.mubr.msk.bf16.mxu1 %vm3189_vm1, %v3188_v17  ;;  %2967 = vmatpush3.bf16.msra.mxu1 %v3127_v22 }
 0x96d   : > { %2968 = vmatprep.subr.bf16.mxu1 %v3188_v17 }
 0x970   : > { %2969 = vmatpush3.bf16.msra.mxu1 %v3128_v23 }
 0x971   : > { %2980 = vmatprep.subr.bf16.mxu1 %v3188_v17 }
 0x973   : > { %2971 = vmatmul.mubr.msk.bf16.vlgmr.msra.gmra.mrb[20].mxu1 %vm753_vm0, %v1645_v10 }
 0x974   : > { %2982 = vmatprep.mubr.msk.bf16.mxu1 %vm3189_vm1, %v3188_v17 }
 0xa3e   : > { %v3513_v40 = vpop.f32.mrb[8].mxu1 }
 0xa3f   : > { %v3066_v41 = vadd.f32 %v3513_v40, %v3346_v7  ;;  %v2948_v42 = vpop.f32.mrb[9].mxu1  ;;  %v3124_v7 = vld [vmem:[%s3729_s12 + $0x8] sm:$0xff]  }
 0xa40   : > { %v1595_v43 = vpop.f32.mrb[10].mxu1  ;;  %2953 = vmatpush3.bf16.msra.mxu0 %v3124_v7  ;;  %v1640_v7 = vld [vmem:[%s3732_s15] sm:$0xf] }
 0xa41   : > { %v2949_v44 = vpop.f32.mrb[11].mxu1  ;;  %v1603_v45 = vsel %vm753_vm0, %v3066_v41, 0.0  ;;  %2958 = vmatprep.subr.bf16.mxu0 %v3188_v17 }
 0xa42   : > { %1604 = vadd.xlane.f32.xlu0 %v1603_v45 }
 0xa46   : > { %v1803_v31 = vpop.f32.mrb[20].mxu1 }
 0xa47   : > { %v2972_v32 = vpop.f32.mrb[21].mxu1 }
 0xa48   : > { %v1806_v38 = vpop.f32.mrb[22].mxu1 }
 0xa49   : > { %v3582_v42 = vpack.c.bf16 %v1806_v38, %v1803_v31 }
 0xa4b   : > { %2981 = vmatpush3.bf16.msra.mxu1 %v3582_v42 }
 0xa4c   : > { %2992 = vmatprep.subr.bf16.mxu1 %v3188_v17 }
 0xacf   : > { %v1605_v47 = vpop.xlane.xlu0 %1604 }
 0xad0   : > { %v1606_v48 = vmul.f32 0.03125, %v1605_v47 }
 0xad2   : > { %v1607_v50 = vsub.f32 %v3066_v41, %v1606_v48  ;;  %v2973_v41 = vpop.f32.mrb[23].mxu1 }
 0xad4   : > { %v1608_v39 = vmul.f32 %v1607_v50, %v1607_v50  ;;  %v1623_v63 = vmul.f32 %v1622_v62, %v1607_v50 }
 0xad6   : > { %v1609_v51 = vsel %vm753_vm0, %v1608_v39, 0.0 }
 0xad7   : > { %1610 = vadd.xlane.f32.xlu1 %v1609_v51 }
 0xb64   : > { %v1611_v53 = vpop.xlane.xlu1 %1610 }
 0xb65   : > { %v1612_v55 = vmul.f32 0.032258064, %v1611_v53  ;;  %v1923_v53 = vsel %vm1024_vm5, %v1640_v7, 0 }
 0xb67   : > { %3155 = vrsqrt.f32 %v1612_v55  ;;  %vm1615_vm7 = vcmp.eq.f32.partialorder %v1612_v55, inf  ;;  %v1618_v58 = vand.u32 2147483648, %v1612_v55  ;;  %vm1617_vm8 = vcmp.eq.f32.partialorder %v1612_v55, 0.0 }
 0xb71   : > { %v3156_v56 = vpop.eup %3155 }
 0xb72   : > { %v1614_v57 = vmul.f32 %v3156_v56, %v1612_v55 }
 0xb74   : > { %v1616_v59 = vsel %vm1615_vm7, %v1612_v55, %v1614_v57 }
 0xb75   : > { %v1619_v60 = vsel %vm1617_vm8, %v1618_v58, %v1616_v59 }
 0xb76   : > { %v1620_v61 = vadd.f32 1e-06, %v1619_v60 }
 0xb78   : > { %3157 = vrcp.f32 %v1620_v61 }
 0xb82   : > { %v3158_v0 = vpop.eup %3157 }
 0xb83   : > { %v1624_v2 = vmul.f32 %v3158_v0, %v1623_v63 }
 0xb85   : > { %v1626_v3 = vadd.f32 %v1625_v1, %v1624_v2 }
 0xb87   : > { %v1644_v5 = vpack.c.bf16 %v1626_v3, %v1626_v3 }
 0xb89   : > { %2955 = vmatmul.mubr.msk.bf16.vlgmr.msra.gmra.mrb[28].mxu0 %vm753_vm0, %v1644_v5 }
 0xb8a   : > { %2959 = vmatpush3.bf16.msra.mxu0 %v3125_v4  ;;  %2962 = vmatprep.mubr.msk.bf16.mxu0 %vm3189_vm1, %v3188_v17 }
 0xb8b   : > { %2960 = vmatprep.subr.bf16.mxu0 %v3188_v17 }
 0xb8e   : > { %2961 = vmatpush3.bf16.msra.mxu0 %v3126_v6 }
 0xb8f   : > { %2974 = vmatprep.subr.bf16.mxu0 %v3188_v17 }
 0xb91   : > { %2963 = vmatmul.mubr.msk.bf16.vlgmr.msra.gmra.mrb[32].mxu0 %vm753_vm0, %v1645_v10 }
 0xb92   : > { %2976 = vmatprep.mubr.msk.bf16.mxu0 %vm3189_vm1, %v3188_v17 }
 0xc5c   : > { %v1695_v11 = vpop.f32.mrb[28].mxu0 }
 0xc5d   : > { %v3545_v12 = vpack.c.bf16 %v1695_v11, %v1695_v11  ;;  %v2956_v13 = vpop.f32.mrb[29].mxu0 }
 0xc5e   : > { %v1698_v14 = vpop.f32.mrb[30].mxu0 }
 0xc5f   : > { %1967 = vrot.lane.b32.xlu1 %v3545_v12, %s3190_s3  ;;  %v2957_v15 = vpop.f32.mrb[31].mxu0 }
 0xc64   : > { %v1750_v16 = vpop.f32.mrb[32].mxu0 }
 0xc65   : > { %v2964_v54 = vpop.f32.mrb[33].mxu0 }
 0xc66   : > { %v1753_v18 = vpop.f32.mrb[34].mxu0 }
 0xc67   : > { %v3549_v19 = vpack.c.bf16 %v1753_v18, %v1750_v16  ;;  %v2965_v20 = vpop.f32.mrb[35].mxu0 }
 0xc69   : > { %2129 = vrot.lane.b32.xlu1 %v3549_v19, %s3191_s1  ;;  %v1818_v21 = vsel %vm960_vm4, %v3549_v19, 0 }
 0xc6a   : > { %2975 = vmatpush3.bf16.xpose.msra.mxu0 %v1818_v21 }
 0xc6b   : > { %2986 = vmatprep.subr.bf16.mxu0 %v3188_v17 }
 0xc71   : > { %2977 = vmatmul.mubr.msk.bf16.vlgmr.msra.gmra.mrb[36].mxu0 %vm960_vm4, %v3545_v12 }
 0xc72   : > { %2988 = vmatprep.mubr.msk.bf16.mxu0 %vm3189_vm1, %v3188_v17  ;;  %2987 = vmatpush3.bf16.msra.mxu0 %v1923_v53  ;;  %v1642_v53 = vld [vmem:[%s3732_s15 + $0x8] sm:$0xf] }
 0xc73   : > { %2998 = vmatprep.subr.bf16.mxu0 %v3188_v17 }
 0xcd1   : > { %v1968_v50 = vpop.permute.xlu1 %1967 }
 0xcdb   : > { %v2130_v39 = vpop.permute.xlu1 %2129 }
 0xcdc   : > { %v2135_v51 = vsel %vm960_vm4, %v2130_v39, 0 }
 0xd44   : > { %v1854_v49 = vpop.f32.mrb[36].mxu0 }
 0xd45   : > { %v1860_v25 = vmul.f32 0.35355338, %v1854_v49  ;;  %v2978_v26 = vpop.f32.mrb[37].mxu0 }
 0xd46   : > { %v1857_v27 = vpop.f32.mrb[38].mxu0 }
 0xd47   : > { %v2979_v28 = vpop.f32.mrb[39].mxu0  ;;  %v1861_v29 = vsel %vm1810_vm9, %v1860_v25, -1e+09 }
 0xd48   : > { %v1863_v30 = vsel %vm1862_vm10, %v1861_v29, -inf }
 0xd49   : > { %1864 = vmax.xlane.f32.xlu0 %v1863_v30 }
 0xdd6   : > { %v1865_v33 = vpop.xlane.xlu0 %1864 }
 0xdd7   : > { %v1866_v34 = vsub.f32 %v1861_v29, %v1865_v33 }
 0xdd9   : > { %v1867_v35 = vmul.f32 1.442695, %v1866_v34 }
 0xddb   : > { %3159 = vpow2.f32 %v1867_v35 }
 0xde5   : > { %v3160_v36 = vpop.eup %3159 }
 0xde6   : > { %v1869_v37 = vsel %vm1862_vm10, %v3160_v36, 0.0 }
 0xde7   : > { %1870 = vadd.xlane.f32.xlu0 %v1869_v37 }
 0xdfd   : > { %1970 = vrot.lane.b32.xlu0 %v3549_v19, %s3190_s3 }
 0xe01   : > { %2127 = vrot.lane.b32.xlu0 %v3545_v12, %s3191_s1 }
 0xe74   : > { %v1871_v43 = vpop.xlane.xlu0 %1870 }
 0xe75   : > { %3161 = vrcp.f32 %v1871_v43 }
 0xe78   : > { %v1971_v46 = vpop.permute.xlu0 %1970 }
 0xe79   : > { %v1976_v48 = vsel %vm960_vm4, %v1971_v46, 0 }
 0xe7c   : > { %v2128_v52 = vpop.permute.xlu0 %2127 }
 0xe7f   : > { %v3162_v44 = vpop.eup %3161 }
 0xe80   : > { %v1873_v45 = vmul.f32 %v3162_v44, %v3160_v36 }
 0xe82   : > { %v1874_v47 = vpack.c.bf16 %v1873_v45, %v1873_v45 }
 0xe84   : > { %2983 = vmatmul.mubr.msk.bf16.vlgmr.msra.gmra.mrb[24].mxu1 %vm1862_vm10, %v1874_v47 }
 0xe85   : > { %2993 = vmatpush3.bf16.xpose.msra.mxu1 %v1976_v48  ;;  %2994 = vmatprep.mubr.msk.bf16.mxu1 %vm3189_vm1, %v3188_v17  ;;  %v1641_v48 = vld [vmem:[%s3732_s15 + $0x4] sm:$0xf] }
 0xe86   : > { %3010 = vmatprep.subr.bf16.mxu1 %v3188_v17 }
 0xe8c   : > { %2995 = vmatmul.mubr.msk.bf16.vlgmr.msra.gmra.mrb[28].mxu1 %vm960_vm4, %v1968_v50  ;;  %v2084_v50 = vsel %vm1024_vm5, %v1641_v48, 0  ;;  %v3132_v48 = vld [vmem:[%s3735_s20 + $0x8] sm:$0xff]  }
 0xe8d   : > { %3011 = vmatpush3.bf16.xpose.msra.mxu1 %v2135_v51  ;;  %3012 = vmatprep.mubr.msk.bf16.mxu1 %vm3189_vm1, %v3188_v17 }
 0xe8e   : > { %3016 = vmatprep.subr.bf16.mxu1 %v3188_v17 }
 0xe94   : > { %3013 = vmatmul.mubr.msk.bf16.vlgmr.msra.gmra.mrb[32].mxu1 %vm960_vm4, %v2128_v52 }
 0xe95   : > { %3018 = vmatprep.mubr.msk.bf16.mxu1 %vm3189_vm1, %v3188_v17 }
 0xf57   : > { %v1912_v55 = vpop.f32.mrb[24].mxu1 }
 0xf58   : > { %v1918_v56 = vpack.c.bf16 %v1912_v55, %v1912_v55  ;;  %v2984_v57 = vpop.f32.mrb[25].mxu1 }
 0xf59   : > { %v1915_v58 = vpop.f32.mrb[26].mxu1 }
 0xf5a   : > { %v2985_v59 = vpop.f32.mrb[27].mxu1  ;;  %2989 = vmatmul.mubr.msk.bf16.vlgmr.msra.gmra.mrb[40].mxu0 %vm960_vm4, %v1918_v56  ;;  %v2242_v58 = vsel %vm1024_vm5, %v1642_v53, 0 }
 0xf5b   : > { %3000 = vmatprep.mubr.msk.bf16.mxu0 %vm3189_vm1, %v3188_v17 }
 0xf5f   : > { %v2012_v60 = vpop.f32.mrb[28].mxu1 }
 0xf60   : > { %v2996_v61 = vpop.f32.mrb[29].mxu1  ;;  %v2018_v14 = vmul.f32 0.35355338, %v2012_v60 }
 0xf61   : > { %v2015_v62 = vpop.f32.mrb[30].mxu1 }
 0xf62   : > { %v2997_v63 = vpop.f32.mrb[31].mxu1  ;;  %v2019_v15 = vsel %vm1810_vm9, %v2018_v14, -1e+09 }
 0xf63   : > { %v2020_v16 = vsel %vm1862_vm10, %v2019_v15, -inf }
 0xf67   : > { %v2171_v0 = vpop.f32.mrb[32].mxu1 }
 0xf68   : > { %v2177_v1 = vmul.f32 0.35355338, %v2171_v0  ;;  %v3014_v2 = vpop.f32.mrb[33].mxu1  ;;  %v1643_v0 = vld [vmem:[%s3732_s15 + $0xc] sm:$0xf] }
 0xf69   : > { %v2174_v3 = vpop.f32.mrb[34].mxu1 }
 0xf6a   : > { %v3015_v4 = vpop.f32.mrb[35].mxu1  ;;  %v2178_v5 = vsel %vm1810_vm9, %v2177_v1, -1e+09  ;;  %v2400_v3 = vsel %vm1024_vm5, %v1643_v0, 0 }
 0xf6b   : > { %v2179_v6 = vsel %vm1862_vm10, %v2178_v5, -inf }
 0xf6c   : > { %2180 = vmax.xlane.f32.xlu1 %v2179_v6 }
 0xf7d   : > { %2287 = vrot.lane.b32.xlu1 %v3549_v19, %s3192_s7 }
 0xf81   : > { %2285 = vrot.lane.b32.xlu1 %v3545_v12, %s3192_s7 }
 0xff9   : > { %v2181_v8 = vpop.xlane.xlu1 %2180 }
 0xffa   : > { %v2182_v9 = vsub.f32 %v2178_v5, %v2181_v8 }
 0xffc   : > { %v2183_v10 = vmul.f32 1.442695, %v2182_v9 }
 0xffd   : > { %v2288_v20 = vpop.permute.xlu1 %2287 }
 0xffe   : > { %3163 = vpow2.f32 %v2183_v10  ;;  %v2293_v22 = vsel %vm960_vm4, %v2288_v20, 0  ;;  %v2443_v10 = vld [vmem:[#allocation6] sm:$0x1] }
 0xfff   : > { %3100 = vpush %v2443_v10 }
0x1001   : > { %v2286_v23 = vpop.permute.xlu1 %2285 }
0x1008   : > { %v3164_v11 = vpop.eup %3163 }
0x1009   : > { %v2185_v13 = vsel %vm1862_vm10, %v3164_v11, 0.0 }
0x100a   : > { %2186 = vadd.xlane.f32.xlu0 %v2185_v13 }
0x1020   : > { %2191 = vrot.lane.b32.xlu0 %v3582_v42, %s3191_s1 }
0x1030   : > { %s3101_s16 = spop %3100 }
0x103f   : > { %2021 = vmax.xlane.f32.xlu0 %v2020_v16 }
0x1055   : > { %2033 = vrot.lane.b32.xlu0 %v3582_v42, %s3190_s3 }
0x1097   : > { %v2187_v12 = vpop.xlane.xlu0 %2186 }
0x1098   : > { %3165 = vrcp.f32 %v2187_v12 }
0x109b   : > { %v2192_v54 = vpop.permute.xlu0 %2191 }
0x109c   : > { %3017 = vmatpush3.bf16.msra.mxu1 %v2192_v54 }
0x109d   : > { %3028 = vmatprep.subr.bf16.mxu1 %v3188_v17 }
0x10a2   : > { %v3166_v18 = vpop.eup %3165 }
0x10a3   : > { %v2189_v19 = vmul.f32 %v3166_v18, %v3164_v11  ;;  %v3179_v11 = vld [vmem:[%s3343_s27] sm:$0xff] }
0x10a4   : > { %v1115_v13 = vadd.f32 nan, %v3179_v11 }
0x10a5   : > { %v2190_v21 = vpack.c.bf16 %v2189_v19, %v2189_v19 }
0x10a6   : > { %v1278_v14 = vadd.f32 nan, %v1115_v13 }
0x10a7   : > { %3019 = vmatmul.mubr.msk.bf16.vlgmr.msra.gmra.mrb[36].mxu1 %vm1862_vm10, %v2190_v21 }
0x10a8   : > { %3029 = vmatpush3.bf16.xpose.msra.mxu1 %v2293_v22  ;;  %3030 = vmatprep.mubr.msk.bf16.mxu1 %vm3189_vm1, %v3188_v17  ;;  %v2445_v22 = vld [vmem:[#allocation7] sm:$0x1] }
0x10a9   : > { %3046 = vmatprep.subr.bf16.mxu1 %v3188_v17  ;;  %3102 = vpush %v2445_v22 }
0x10af   : > { %3031 = vmatmul.mubr.msk.bf16.vlgmr.msra.gmra.mrb[40].mxu1 %vm960_vm4, %v2286_v23 }
0x10b0   : > { %3050 = vmatprep.mubr.msk.bf16.mxu1 %vm3189_vm1, %v3188_v17 }
0x10cc   : > { %v2022_v49 = vpop.xlane.xlu0 %2021 }
0x10cd   : > { %v2023_v25 = vsub.f32 %v2019_v15, %v2022_v49  ;;  %v1438_v15 = vadd.f32 nan, %v1278_v14 }
0x10cf   : > { %v2024_v26 = vmul.f32 1.442695, %v2023_v25  ;;  %v1598_v16 = vadd.f32 %v3513_v40, %v1438_v15  ;;  %v3129_v40 = vld [vmem:[%s3733_s18] sm:$0xff]  }
0x10d0   : > { %v2034_v27 = vpop.permute.xlu0 %2033  ;;  %3047 = vmatpush3.bf16.msra.mxu1 %v3129_v40 }
0x10d1   : > { %3167 = vpow2.f32 %v2024_v26  ;;  %2999 = vmatpush3.bf16.msra.mxu0 %v2034_v27  ;;  %3048 = vmatprep.subr.bf16.mxu1 %v3188_v17 }
0x10d2   : > { %3004 = vmatprep.subr.bf16.mxu0 %v3188_v17 }
0x10da   : > { %s3103_s17 = spop %3102 }
0x10db   : > { %v3168_v28 = vpop.eup %3167 }
0x10dc   : > { %v2026_v29 = vsel %vm1862_vm10, %v3168_v28, 0.0 }
0x10dd   : > { %2027 = vadd.xlane.f32.xlu1 %v2026_v29 }
0x116a   : > { %v2028_v30 = vpop.xlane.xlu1 %2027 }
0x116b   : > { %3169 = vrcp.f32 %v2028_v30 }
0x1175   : > { %v3170_v31 = vpop.eup %3169 }
0x1176   : > { %v2030_v32 = vmul.f32 %v3170_v31, %v3168_v28  ;;  %v3130_v28 = vld [vmem:[%s3733_s18 + $0x8] sm:$0xff]  }
0x1177   : > { %3049 = vmatpush3.bf16.msra.mxu1 %v3130_v28 }
0x1178   : > { %v2031_v33 = vpack.c.bf16 %v2030_v32, %v2030_v32  ;;  %3054 = vmatprep.subr.bf16.mxu1 %v3188_v17 }
0x117a   : > { %3001 = vmatmul.mubr.msk.bf16.vlgmr.msra.gmra.mrb[44].mxu0 %vm1862_vm10, %v2031_v33  ;;  %v2231_v34 = vpop.f32.mrb[36].mxu1 }
0x117b   : > { %v3020_v35 = vpop.f32.mrb[37].mxu1  ;;  %3006 = vmatprep.mubr.msk.bf16.mxu0 %vm3189_vm1, %v3188_v17  ;;  %3005 = vmatpush3.bf16.msra.mxu0 %v2084_v50  ;;  %v3133_v50 = vld [vmem:[%s3735_s20 + $0x10] sm:$0xff]  }
0x117c   : > { %v2234_v36 = vpop.f32.mrb[38].mxu1  ;;  %3022 = vmatprep.subr.bf16.mxu0 %v3188_v17 }
0x117d   : > { %v3021_v37 = vpop.f32.mrb[39].mxu1 }
0x117e   : > { %v2466_v37 = vstv %s3101_s16  ;;  %s744_s16 = scalar_lea.vmem %s3737_s22, %s3337_s11 }
0x1182   : > { %v2329_v38 = vpop.f32.mrb[40].mxu1 }
0x1183   : > { %v2335_v41 = vmul.f32 0.35355338, %v2329_v38  ;;  %v3032_v43 = vpop.f32.mrb[41].mxu1 }
0x1184   : > { %v2332_v44 = vpop.f32.mrb[42].mxu1  ;;  %v2469_v43 = vstv %s3103_s17 }
0x1185   : > { %v3033_v45 = vpop.f32.mrb[43].mxu1  ;;  %v2336_v46 = vsel %vm1810_vm9, %v2335_v41, -1e+09 }
0x1186   : > { %v2337_v47 = vsel %vm1862_vm10, %v2336_v46, -inf }
0x1187   : > { %2338 = vmax.xlane.f32.xlu1 %v2337_v47 }
0x1214   : > { %v2339_v39 = vpop.xlane.xlu1 %2338 }
0x1215   : > { %v2340_v51 = vsub.f32 %v2336_v46, %v2339_v39  ;;  %v3131_v46 = vld [vmem:[%s3735_s20] sm:$0xff]   ;;  %v3134_v39 = vld [vmem:[%s3735_s20 + $0x18] sm:$0xff]  }
0x1217   : > { %v2341_v52 = vmul.f32 1.442695, %v2340_v51  ;;  %v2767_v51 = vld [vmem:[%s3734_s19] ss:$0 sm:$0xff] }
0x1219   : > { %3171 = vpow2.f32 %v2341_v52 }
0x1223   : > { %v3172_v7 = vpop.eup %3171 }
0x1224   : > { %v2343_v24 = vsel %vm1862_vm10, %v3172_v7, 0.0 }
0x1225   : > { %2344 = vadd.xlane.f32.xlu1 %v2343_v24 }
0x1236   : > { %2349 = vrot.lane.b32.xlu1 %v3582_v42, %s3192_s7  ;;  %v2237_v42 = vpack.c.bf16 %v2231_v34, %v2231_v34 }
0x124d   : > { %v2073_v55 = vpop.f32.mrb[44].mxu0 }
0x124e   : > { %v2079_v56 = vpack.c.bf16 %v2073_v55, %v2073_v55  ;;  %v3002_v57 = vpop.f32.mrb[45].mxu0 }
0x124f   : > { %v2076_v59 = vpop.f32.mrb[46].mxu0 }
0x1250   : > { %v3003_v60 = vpop.f32.mrb[47].mxu0  ;;  %3007 = vmatmul.mubr.msk.bf16.vlgmr.msra.gmra.mrb[40].mxu0 %vm960_vm4, %v2079_v56 }
0x1251   : > { %3023 = vmatpush3.bf16.msra.mxu0 %v2242_v58  ;;  %3024 = vmatprep.mubr.msk.bf16.mxu0 %vm3189_vm1, %v3188_v17 }
0x1252   : > { %3034 = vmatprep.subr.bf16.mxu0 %v3188_v17 }
0x125c   : > { %3025 = vmatmul.mubr.msk.bf16.vlgmr.msra.gmra.mrb[40].mxu0 %vm960_vm4, %v2237_v42 }
0x125d   : > { %3036 = vmatprep.mubr.msk.bf16.mxu0 %vm3189_vm1, %v3188_v17 }
0x12b2   : > { %v2345_v61 = vpop.xlane.xlu1 %2344 }
0x12b3   : > { %3173 = vrcp.f32 %v2345_v61 }
0x12b6   : > { %v2350_v62 = vpop.permute.xlu1 %2349 }
0x12b7   : > { %3035 = vmatpush3.bf16.msra.mxu0 %v2350_v62 }
0x12b8   : > { %3040 = vmatprep.subr.bf16.mxu0 %v3188_v17 }
0x12bd   : > { %v3174_v63 = vpop.eup %3173 }
0x12be   : > { %v2347_v1 = vmul.f32 %v3174_v63, %v3172_v7 }
0x12c0   : > { %v2348_v2 = vpack.c.bf16 %v2347_v1, %v2347_v1 }
0x12c2   : > { %3037 = vmatmul.mubr.msk.bf16.vlgmr.msra.gmra.mrb[48].mxu0 %vm1862_vm10, %v2348_v2 }
0x12c3   : > { %3041 = vmatpush3.bf16.msra.mxu0 %v2400_v3  ;;  %3042 = vmatprep.mubr.msk.bf16.mxu0 %vm3189_vm1, %v3188_v17 }
0x1395   : > { %v2389_v4 = vpop.f32.mrb[48].mxu0 }
0x1396   : > { %v2395_v5 = vpack.c.bf16 %v2389_v4, %v2389_v4  ;;  %v3038_v6 = vpop.f32.mrb[49].mxu0 }
0x1397   : > { %v2392_v8 = vpop.f32.mrb[50].mxu0 }
0x1398   : > { %v3039_v9 = vpop.f32.mrb[51].mxu0  ;;  %3043 = vmatmul.mubr.msk.bf16.vlgmr.msra.gmra.mrb[40].mxu0 %vm960_vm4, %v2395_v5 }
0x146b   : > { %v2436_v12 = vpop.f32.mrb[40].mxu0 }
0x146c   : > { %v3673_v54 = vadd.f32 %v2436_v12, %v1598_v16  ;;  %v3044_v18 = vpop.f32.mrb[41].mxu0 }
0x146d   : > { %v2439_v19 = vpop.f32.mrb[42].mxu0 }
0x146e   : > { %v3045_v20 = vpop.f32.mrb[43].mxu0  ;;  %v2447_v21 = vsel %vm753_vm0, %v3673_v54, 0.0 }
0x146f   : > { %2448 = vadd.xlane.f32.xlu0 %v2447_v21 }
0x14fc   : > { %v2449_v23 = vpop.xlane.xlu0 %2448 }
0x14fd   : > { %v2450_v49 = vmul.f32 0.03125, %v2449_v23 }
0x14ff   : > { %v2451_v25 = vsub.f32 %v3673_v54, %v2450_v49 }
0x1501   : > { %v2452_v26 = vmul.f32 %v2451_v25, %v2451_v25  ;;  %v2467_v38 = vmul.f32 %v2466_v37, %v2451_v25 }
0x1503   : > { %v2453_v27 = vsel %vm753_vm0, %v2452_v26, 0.0 }
0x1504   : > { %2454 = vadd.xlane.f32.xlu1 %v2453_v27 }
0x1591   : > { %v2455_v29 = vpop.xlane.xlu1 %2454 }
0x1592   : > { %v2456_v30 = vmul.f32 0.032258064, %v2455_v29 }
0x1594   : > { %3175 = vrsqrt.f32 %v2456_v30  ;;  %vm2459_vm11 = vcmp.eq.f32.partialorder %v2456_v30, inf  ;;  %v2462_v33 = vand.u32 2147483648, %v2456_v30  ;;  %vm2461_vm12 = vcmp.eq.f32.partialorder %v2456_v30, 0.0 }
0x159e   : > { %v3176_v31 = vpop.eup %3175 }
0x159f   : > { %v2458_v32 = vmul.f32 %v3176_v31, %v2456_v30 }
0x15a1   : > { %v2460_v34 = vsel %vm2459_vm11, %v2456_v30, %v2458_v32 }
0x15a2   : > { %v2463_v35 = vsel %vm2461_vm12, %v2462_v33, %v2460_v34 }
0x15a3   : > { %v2464_v36 = vadd.f32 1e-06, %v2463_v35 }
0x15a5   : > { %3177 = vrcp.f32 %v2464_v36 }
0x15af   : > { %v3178_v41 = vpop.eup %3177 }
0x15b0   : > { %v2468_v44 = vmul.f32 %v3178_v41, %v2467_v38 }
0x15b2   : > { %v2470_v45 = vadd.f32 %v2469_v43, %v2468_v44 }
0x15b4   : > { %v2471_v47 = vpack.c.bf16 %v2470_v45, %v2470_v45 }
0x15b6   : > { %3051 = vmatmul.mubr.msk.bf16.vlgmr.msra.gmra.mrb[44].mxu1 %vm753_vm0, %v2471_v47 }
0x15b7   : > { %3055 = vmatpush3.bf16.msra.mxu1 %v3131_v46  ;;  %3062 = vmatprep.mubr.msk.bf16.mxu1 %vm3189_vm1, %v3188_v17 }
0x15b8   : > { %3056 = vmatprep.subr.bf16.mxu1 %v3188_v17 }
0x15bb   : > { %3057 = vmatpush3.bf16.msra.mxu1 %v3132_v48 }
0x15bc   : > { %3058 = vmatprep.subr.bf16.mxu1 %v3188_v17 }
0x15bf   : > { %3059 = vmatpush3.bf16.msra.mxu1 %v3133_v50 }
0x15c0   : > { %3060 = vmatprep.subr.bf16.mxu1 %v3188_v17  ;;  %v2771_v17 = vld [vmem:[%s3736_s21] ss:$0 sm:$0xff] }
0x15c3   : > { %3061 = vmatpush3.bf16.msra.mxu1 %v3134_v39 }
0x1689   : > { %v2532_v52 = vpop.f32.mrb[44].mxu1 }
0x168a   : > { %v2533_v7 = vadd.f32 %v2767_v51, %v2532_v52  ;;  %v3052_v24 = vpop.f32.mrb[45].mxu1 }
0x168b   : > { %v2535_v53 = vpop.f32.mrb[46].mxu1 }
0x168c   : > { %v2538_v55 = vmax.f32 %v2533_v7, 0.0  ;;  %v3053_v56 = vpop.f32.mrb[47].mxu1 }
0x168e   : > { %v2539_v57 = vpack.c.bf16 %v2538_v55, %v2538_v55 }
0x1690   : > { %3063 = vmatmul.mubr.msk.bf16.vlgmr.msra.gmra.mrb[48].mxu1 %vm2579_vm13, %v2539_v57 }
0x1763   : > { %v2617_v58 = vpop.f32.mrb[48].mxu1 }
0x1764   : > { %v2618_v59 = vadd.f32 %v2771_v17, %v2617_v58  ;;  %v3064_v60 = vpop.f32.mrb[49].mxu1 }
0x1765   : > { %v2620_v42 = vpop.f32.mrb[50].mxu1 }
0x1766   : > { %v2623_v61 = vadd.f32 %v3673_v54, %v2618_v59  ;;  %v3065_v62 = vpop.f32.mrb[51].mxu1 }
0x1768   : > { %2624 = vst.msk [vmem:[%s744_s16] sm:$0xff] %vm753_vm0, %v2623_v61 }
0x1769 PF: > { %s44_s5 = sadd.s32 1, %s3186_s5  }
0x176a   : > { %p41_p4 = scmp.ge.s32.totalorder %s44_s5, 4  }
0x176c   :  { %43 = sbr.rel (!%p41_p4) target bundleno = 14 (0xe), region = 147 }

</bundles_post_ra>
